<compile_context>
chip_gen: v6e
topology: v6e:2x2x1
jax: 0.10.0
libtpu: 0.0.40
codegen_flags: <defaults>
</compile_context>

<pallas_src>
import functools
import math

import jax
import jax.numpy as jnp
from jax.experimental import pallas as pl
from jax.experimental.pallas import tpu as pltpu


# ----------------------------------------------------------------------------
# Generation-aware VMEM budgeting
# ----------------------------------------------------------------------------
def _detect_vmem_capacity():
    try:
        return int(pltpu.get_tpu_info().vmem_capacity_bytes)
    except Exception:
        return 64 * 1024 * 1024          # conservative fallback (v7x-sized)


_VMEM_CAP = _detect_vmem_capacity()
# ~45% of physical, clamped to [32 MiB, 64 MiB]; leaves headroom for compiler
# scratch on v7x (64 MiB/TC) while allowing big tiles on v5e/v6e (128 MiB).
_VMEM_LIMIT = max(32 * 1024 * 1024, min(int(_VMEM_CAP * 0.45), 64 * 1024 * 1024))
_BLOCK_BUDGET = int(_VMEM_LIMIT * 0.75)

_K_FULL_MAX = 4096    # K below this runs as a single full-K MXU pass


# ----------------------------------------------------------------------------
# Pallas kernels
# ----------------------------------------------------------------------------
def _apply_act(y, act):
    if act == "relu":
        return jnp.maximum(y, 0.0)
    if act == "silu":
        # reciprocal on the EUP (approx) keeps the VALU free in the epilogue
        return y * pl.reciprocal(1.0 + jnp.exp(-y), approx=True)
    if act == "sigmoid":
        return pl.reciprocal(1.0 + jnp.exp(-y), approx=True)
    return y


def _mm_single_kernel(*refs, act, has_aff2, has_res):
    # refs: a, b, s, c, [s2, c2], [res], out
    a_ref, b_ref, s_ref, c_ref = refs[:4]
    i = 4
    if has_aff2:
        s2_ref, c2_ref = refs[i], refs[i + 1]
        i += 2
    if has_res:
        r_ref = refs[i]
        i += 1
    o_ref = refs[i]

    y = jnp.dot(a_ref[...], b_ref[...], preferred_element_type=jnp.float32)
    y = _apply_act(y * s_ref[...] + c_ref[...], act)
    if has_aff2:
        y = y * s2_ref[...] + c2_ref[...]
    if has_res:
        y = y + r_ref[...].astype(jnp.float32)
    o_ref[...] = y.astype(o_ref.dtype)


def _mm_acc_kernel(*refs, act, has_aff2):
    # refs: a, b, s, c, [s2, c2], out, acc_scratch
    a_ref, b_ref, s_ref, c_ref = refs[:4]
    i = 4
    if has_aff2:
        s2_ref, c2_ref = refs[i], refs[i + 1]
        i += 2
    o_ref, acc_ref = refs[i], refs[i + 1]

    @pl.when(pl.program_id(2) == 0)
    def _init():
        acc_ref[...] = jnp.zeros_like(acc_ref)

    acc_ref[...] += jnp.dot(a_ref[...], b_ref[...],
                            preferred_element_type=jnp.float32)

    @pl.when(pl.program_id(2) == pl.num_programs(2) - 1)
    def _finish():
        y = _apply_act(acc_ref[...] * s_ref[...] + c_ref[...], act)
        if has_aff2:
            y = y * s2_ref[...] + c2_ref[...]
        o_ref[...] = y.astype(o_ref.dtype)


def _final_head_kernel(a_ref, b1_ref, s1_ref, c1_ref, b2_ref, c2_ref, o_ref):
    # relu((patches @ W1) * s1 + c1) @ W2 + c2   (final 3x3 conv+BN+ReLU + 1x1 conv)
    y = jnp.dot(a_ref[...], b1_ref[...], preferred_element_type=jnp.float32)
    y = jnp.maximum(y * s1_ref[...] + c1_ref[...], 0.0)
    # TODO(synk): Dropout2d(0.1) is a train-time RNG op -> identity (eval).
    z = jnp.dot(y.astype(jnp.bfloat16), b2_ref[...],
                preferred_element_type=jnp.float32)
    o_ref[...] = (z + c2_ref[...]).astype(o_ref.dtype)


def _dwconv_kernel(p_ref, w_ref, s_ref, c_ref, o_ref, *, taps, act):
    w = w_ref[...]                                   # preload [T, tc] once
    acc = jnp.zeros(o_ref.shape, jnp.float32)
    for t in range(taps):                            # static unroll (VPU)
        acc = acc + p_ref[t].astype(jnp.float32) * w[t:t + 1, :]
    y = acc * s_ref[...] + c_ref[...]
    o_ref[...] = _apply_act(y, act).astype(o_ref.dtype)


# ----------------------------------------------------------------------------
# Tiling helpers
# ----------------------------------------------------------------------------
def _round_up(x, m):
    return (x + m - 1) // m * m


def _pick_m_block(M, cap):
    """Row (sublane) blocking: full-dim if it fits, else a divisor, else pad."""
    if M <= cap:
        return M, M
    t = cap
    while t >= 16:
        if M % t == 0:
            return t, M
        t //= 2
    Mp = _round_up(M, 16)
    t = cap
    while t >= 16:
        if Mp % t == 0:
            return t, Mp
        t //= 2
    return 16, Mp


def _pick_lane_block(N, cap):
    """Lane blocking: pad to a multiple of 128 (lane-dense stores), block <= cap."""
    Np = _round_up(N, 128)
    if Np <= cap:
        return Np, Np
    t = cap - cap % 128
    while t >= 128:
        if Np % t == 0:
            return t, Np
        t -= 128
    return 128, Np


def _halve_lane_block(Np, tn):
    """Largest multiple-of-128 divisor of Np that is <= tn // 2 (or tn)."""
    t = (tn // 2) - ((tn // 2) % 128)
    while t >= 128:
        if Np % t == 0:
            return t
        t -= 128
    return tn


def _pick_c_block_dw(C, cap):
    if C <= cap:
        return C, C
    Cp = _round_up(C, 128)
    t = cap - cap % 128
    while t >= 128:
        if Cp % t == 0:
            return t, Cp
        t -= 128
    return 128, Cp


# ----------------------------------------------------------------------------
# Pallas wrappers
# ----------------------------------------------------------------------------
def fused_matmul(a, b, scale, bias, *, act, scale2=None, bias2=None,
                 residual=None, out_dtype=jnp.bfloat16):
    """out = [act((a @ b) * scale + bias) (* scale2 + bias2)] (+ residual)."""
    M, K = a.shape
    Kb, N = b.shape
    assert Kb == K, (Kb, K)
    has_aff2 = scale2 is not None
    has_res = residual is not None
    if has_res:
        assert residual.shape == (M, N), (residual.shape, (M, N))

    res_outer = None
    if has_res and K > _K_FULL_MAX:        # defensive: split-K path has no res input
        res_outer = residual
        residual = None
        has_res = False

    tm, Mp = _pick_m_block(M, 1024)
    tn, Np = _pick_lane_block(N, 2048)
    if K <= _K_FULL_MAX:
        tk, Kp = K, K
    else:
        tk, Kp = 512, _round_up(K, 512)

    out_bytes = jnp.dtype(out_dtype).itemsize
    nvec = 4 if has_aff2 else 2

    def _blk_bytes(tm_, tn_, tk_):
        byt = 2 * (tm_ * tk_ * 2 + tk_ * tn_ * 2 + nvec * tn_ * 4)
        if has_res:
            byt += 2 * tm_ * tn_ * 2
        byt += 2 * tm_ * tn_ * out_bytes
        if Kp // tk_ > 1:
            byt += tm_ * tn_ * 4           # f32 accumulator scratch
        return byt

    # joint VMEM budget (double-buffered) — shrink lane block first, rows second
    while _blk_bytes(tm, tn, tk) > _BLOCK_BUDGET:
        tn2 = _halve_lane_block(Np, tn)
        if tn2 < tn:
            tn = tn2
            continue
        if tm > 16 and tm % 2 == 0 and (tm // 2) % 8 == 0 and Mp % (tm // 2) == 0:
            tm //= 2
            continue
        break

    # if the parallel grid collapsed to (1,1), split so the 2nd TC (v7x) has work
    if Mp // tm == 1 and Np // tn == 1:
        tn2 = _halve_lane_block(Np, tn)
        if tn2 < tn:
            tn = tn2
        elif tm % 16 == 0:
            tm //= 2

    a = a.astype(jnp.bfloat16)
    b = b.astype(jnp.bfloat16)
    if (Mp, Kp) != (M, K):
        a = jnp.pad(a, ((0, Mp - M), (0, Kp - K)))
    if (Kp, Np) != (K, N):
        b = jnp.pad(b, ((0, Kp - K), (0, Np - N)))

    def _vec(v):
        v = v.astype(jnp.float32)
        if Np != N:
            v = jnp.pad(v, (0, Np - N))
        return v.reshape(1, Np)

    operands = [a, b, _vec(scale), _vec(bias)]
    if has_aff2:
        operands += [_vec(scale2), _vec(bias2)]
    if has_res:
        r = residual.astype(jnp.bfloat16)
        if (Mp, Np) != (M, N):
            r = jnp.pad(r, ((0, Mp - M), (0, Np - N)))
        operands.append(r)

    nk = Kp // tk
    if nk == 1:
        in_specs = [
            pl.BlockSpec((tm, tk), lambda i, j: (i, 0)),
            pl.BlockSpec((tk, tn), lambda i, j: (0, j)),
        ]
        vec_spec = pl.BlockSpec((1, tn), lambda i, j: (0, j))
        in_specs += [vec_spec, vec_spec]
        if has_aff2:
            in_specs += [vec_spec, vec_spec]
        if has_res:
            in_specs.append(pl.BlockSpec((tm, tn), lambda i, j: (i, j)))
        out = pl.pallas_call(
            functools.partial(_mm_single_kernel, act=act,
                              has_aff2=has_aff2, has_res=has_res),
            out_shape=jax.ShapeDtypeStruct((Mp, Np), out_dtype),
            grid_spec=pltpu.PrefetchScalarGridSpec(
                num_scalar_prefetch=0,
                grid=(Mp // tm, Np // tn),
                in_specs=in_specs,
                out_specs=pl.BlockSpec((tm, tn), lambda i, j: (i, j))),
            compiler_params=pltpu.CompilerParams(
                dimension_semantics=("parallel", "parallel"),
                vmem_limit_bytes=_VMEM_LIMIT),
        )(*operands)
    else:
        in_specs = [
            pl.BlockSpec((tm, tk), lambda i, j, k: (i, k)),
            pl.BlockSpec((tk, tn), lambda i, j, k: (k, j)),
        ]
        vec_spec = pl.BlockSpec((1, tn), lambda i, j, k: (0, j))
        in_specs += [vec_spec, vec_spec]
        if has_aff2:
            in_specs += [vec_spec, vec_spec]
        out = pl.pallas_call(
            functools.partial(_mm_acc_kernel, act=act, has_aff2=has_aff2),
            out_shape=jax.ShapeDtypeStruct((Mp, Np), out_dtype),
            grid_spec=pltpu.PrefetchScalarGridSpec(
                num_scalar_prefetch=0,
                grid=(Mp // tm, Np // tn, nk),
                in_specs=in_specs,
                out_specs=pl.BlockSpec((tm, tn), lambda i, j, k: (i, j)),
                scratch_shapes=[pltpu.VMEM((tm, tn), jnp.float32)]),
            compiler_params=pltpu.CompilerParams(
                dimension_semantics=("parallel", "parallel", "arbitrary"),
                vmem_limit_bytes=_VMEM_LIMIT),
        )(*operands)

    if (Mp, Np) != (M, N):
        out = out[:M, :N]
    if res_outer is not None:
        out = out + res_outer.astype(out.dtype)
    return out


def fused_dwconv(p, w, scale, bias, *, act):
    """Depthwise conv as tap accumulation.
    p:[T,M,C] shifted views, w:[T,C], out = act((sum_t p[t]*w[t])*scale + bias)."""
    T, M, C = p.shape
    tm, Mp = _pick_m_block(M, 1024)
    tc, Cp = _pick_c_block_dw(C, 2048)

    def _blk_bytes(tm_, tc_):
        return (2 * (T * tm_ * tc_ * 2 + T * tc_ * 4 + 2 * tc_ * 4)
                + 2 * tm_ * tc_ * 2)

    while _blk_bytes(tm, tc) > _BLOCK_BUDGET:
        if tm > 16 and tm % 2 == 0 and (tm // 2) % 8 == 0 and Mp % (tm // 2) == 0:
            tm //= 2
            continue
        break

    if Mp // tm == 1 and Cp // tc == 1 and tm % 16 == 0:
        tm //= 2            # keep both TensorCores busy on v7x

    p = p.astype(jnp.bfloat16)
    if (Mp, Cp) != (M, C):
        p = jnp.pad(p, ((0, 0), (0, Mp - M), (0, Cp - C)))
    w = w.astype(jnp.float32)
    s = scale.astype(jnp.float32)
    c = bias.astype(jnp.float32)
    if Cp != C:
        w = jnp.pad(w, ((0, 0), (0, Cp - C)))
        s = jnp.pad(s, (0, Cp - C))
        c = jnp.pad(c, (0, Cp - C))
    s = s.reshape(1, Cp)
    c = c.reshape(1, Cp)

    out = pl.pallas_call(
        functools.partial(_dwconv_kernel, taps=T, act=act),
        out_shape=jax.ShapeDtypeStruct((Mp, Cp), jnp.bfloat16),
        grid_spec=pltpu.PrefetchScalarGridSpec(
            num_scalar_prefetch=0,
            grid=(Mp // tm, Cp // tc),
            in_specs=[
                pl.BlockSpec((T, tm, tc), lambda i, j: (0, i, j)),
                pl.BlockSpec((T, tc), lambda i, j: (0, j)),
                pl.BlockSpec((1, tc), lambda i, j: (0, j)),
                pl.BlockSpec((1, tc), lambda i, j: (0, j)),
            ],
            out_specs=pl.BlockSpec((tm, tc), lambda i, j: (i, j))),
        compiler_params=pltpu.CompilerParams(
            dimension_semantics=("parallel", "parallel"),
            vmem_limit_bytes=_VMEM_LIMIT),
    )(p, w, s, c)
    if (Mp, Cp) != (M, C):
        out = out[:M, :C]
    return out


def fused_final_head(a, b1, s1, c1, b2, c2, n_out):
    """relu(BN(a @ b1)) @ b2 + c2, with a lane-dense (128-padded) f32 output."""
    M, K1 = a.shape
    N1 = b1.shape[1]
    N2p = b2.shape[1]
    tm, Mp = _pick_m_block(M, 1024)
    if Mp // tm == 1 and tm % 16 == 0:
        tm //= 2
    a = a.astype(jnp.bfloat16)
    if Mp != M:
        a = jnp.pad(a, ((0, Mp - M), (0, 0)))

    out = pl.pallas_call(
        _final_head_kernel,
        out_shape=jax.ShapeDtypeStruct((Mp, N2p), jnp.float32),
        grid_spec=pltpu.PrefetchScalarGridSpec(
            num_scalar_prefetch=0,
            grid=(Mp // tm,),
            in_specs=[
                pl.BlockSpec((tm, K1), lambda i: (i, 0)),
                pl.BlockSpec((K1, N1), lambda i: (0, 0)),
                pl.BlockSpec((1, N1), lambda i: (0, 0)),
                pl.BlockSpec((1, N1), lambda i: (0, 0)),
                pl.BlockSpec((N1, N2p), lambda i: (0, 0)),
                pl.BlockSpec((1, N2p), lambda i: (0, 0)),
            ],
            out_specs=pl.BlockSpec((tm, N2p), lambda i: (i, 0))),
        compiler_params=pltpu.CompilerParams(
            dimension_semantics=("parallel",),
            vmem_limit_bytes=_VMEM_LIMIT),
    )(a, b1.astype(jnp.bfloat16),
      s1.astype(jnp.float32).reshape(1, N1),
      c1.astype(jnp.float32).reshape(1, N1),
      b2.astype(jnp.bfloat16),
      c2.astype(jnp.float32).reshape(1, N2p))
    return out[:M, :n_out]


# ----------------------------------------------------------------------------
# Layer helpers (glue: im2col slicing / reshape / transpose in plain JAX)
# ----------------------------------------------------------------------------
def _im2col(x, kh, kw, stride, pad):
    # x: [N, H, W, C] -> patches [N*Ho*Wo, kh*kw*C]
    N, H, W, C = x.shape
    Ho = (H + 2 * pad - kh) // stride + 1
    Wo = (W + 2 * pad - kw) // stride + 1
    if kh == 1 and kw == 1 and stride == 1 and pad == 0:
        return x.reshape(N * H * W, C), (N, Ho, Wo)
    xp = jnp.pad(x, ((0, 0), (pad, pad), (pad, pad), (0, 0)))
    cols = []
    for dy in range(kh):
        for dx in range(kw):
            cols.append(xp[:, dy:dy + stride * Ho:stride,
                           dx:dx + stride * Wo:stride, :])
    patches = jnp.stack(cols, axis=3)                 # [N, Ho, Wo, T, C]
    return patches.reshape(N * Ho * Wo, kh * kw * C), (N, Ho, Wo)


@functools.partial(jax.jit, static_argnames=("kh", "kw", "stride", "pad", "act"))
def _conv_bn_act_impl(xs, w2, scale, bias, scale2, bias2, residual, *,
                      kh, kw, stride, pad, act):
    if isinstance(xs, (tuple, list)):
        # decoder skip concat fused into the im2col patch gather by XLA
        x = jnp.concatenate([t.astype(jnp.bfloat16) for t in xs], axis=-1)
    else:
        x = xs
    patches, (N, Ho, Wo) = _im2col(x, kh, kw, stride, pad)
    if patches.shape[1] < w2.shape[0]:                # weight K was pre-padded
        patches = jnp.pad(patches, ((0, 0), (0, w2.shape[0] - patches.shape[1])))
    res2d = None
    if residual is not None:
        res2d = residual.reshape(N * Ho * Wo, residual.shape[-1])
    out = fused_matmul(patches, w2, scale, bias, act=act,
                       scale2=scale2, bias2=bias2, residual=res2d)
    return out.reshape(N, Ho, Wo, -1)


def conv_bn_act(x, cw, stride, pad, scale, bias, act, *,
                scale2=None, bias2=None, residual=None):
    return _conv_bn_act_impl(x, cw["w"], scale, bias, scale2, bias2, residual,
                             kh=cw["kh"], kw=cw["kw"], stride=stride, pad=pad,
                             act=act)


@functools.partial(jax.jit, static_argnames=("kh", "kw", "stride", "pad", "act"))
def _dwconv_bn_act_impl(x, wt, scale, bias, *, kh, kw, stride, pad, act):
    N, H, W, C = x.shape
    xp = jnp.pad(x, ((0, 0), (pad, pad), (pad, pad), (0, 0)))
    Ho = (H + 2 * pad - kh) // stride + 1
    Wo = (W + 2 * pad - kw) // stride + 1
    taps = []
    for dy in range(kh):
        for dx in range(kw):
            taps.append(xp[:, dy:dy + stride * Ho:stride,
                           dx:dx + stride * Wo:stride, :].reshape(N * Ho * Wo, C))
    p = jnp.stack(taps, axis=0).astype(jnp.bfloat16)  # [T, M, C]
    out = fused_dwconv(p, wt, scale, bias, act=act)
    return out.reshape(N, Ho, Wo, C)


def dwconv_bn_act(x, dw, stride, pad, scale, bias, act):
    return _dwconv_bn_act_impl(x, dw["w"], scale, bias, kh=dw["kh"], kw=dw["kw"],
                               stride=stride, pad=pad, act=act)


def _bilinear_up2x(x):
    # torch.nn.Upsample(scale_factor=2, mode='bilinear', align_corners=True)
    N, H, W, C = x.shape

    def coords(size_in, size_out):
        if size_in == 1:
            i0 = jnp.zeros((size_out,), jnp.int32)
            return i0, i0, jnp.zeros((size_out,), jnp.float32)
        pos = jnp.arange(size_out, dtype=jnp.float32) * (size_in - 1) / (size_out - 1)
        i0 = jnp.floor(pos).astype(jnp.int32)
        i1 = jnp.minimum(i0 + 1, size_in - 1)
        return i0, i1, pos - i0.astype(jnp.float32)

    i0, i1, fy = coords(H, 2 * H)
    j0, j1, fx = coords(W, 2 * W)
    xf = x.astype(jnp.float32)
    top = (xf[:, i0, :, :] * (1.0 - fy)[None, :, None, None]
           + xf[:, i1, :, :] * fy[None, :, None, None])
    out = (top[:, :, j0, :] * (1.0 - fx)[None, None, :, None]
           + top[:, :, j1, :] * fx[None, None, :, None])
    return out


@jax.jit
def upsample2x_relu(x):
    # ReLU2 stays after the upsample (matches the reference op order); the
    # BN2 affine was hoisted below the upsample into the conv1 epilogue.
    return jnp.maximum(_bilinear_up2x(x), 0.0).astype(jnp.bfloat16)


@jax.jit
def _se_impl(x, w1, b1, w2, b2):
    # Squeeze-excite: M = batch (tiny) -> plain jnp so XLA fuses it; no Pallas.
    xf = x.astype(jnp.float32)
    pooled = jnp.mean(xf, axis=(1, 2))
    h = jax.nn.silu(pooled @ w1 + b1)
    s = jax.nn.sigmoid(h @ w2 + b2)
    return (xf * s[:, None, None, :]).astype(x.dtype)


# ----------------------------------------------------------------------------
# Parameter construction (deterministic, PRNGKey-based)
# ----------------------------------------------------------------------------
def _make_divisible(v, divisor=8):
    new_v = max(divisor, int(v + divisor / 2) // divisor * divisor)
    if new_v < 0.9 * v:
        new_v += divisor
    return new_v


class ParamInit:
    def __init__(self, seed=0):
        self._key = jax.random.PRNGKey(seed)

    def _next(self):
        self._key, k = jax.random.split(self._key)
        return k

    def conv(self, cout, cin, kh, kw):
        fan_in = cin * kh * kw
        return jax.random.normal(self._next(), (cout, cin, kh, kw),
                                 jnp.float32) * (1.0 / math.sqrt(fan_in))

    def bn(self, c, eps=1e-5):
        gamma = 1.0 + 0.1 * jax.random.normal(self._next(), (c,), jnp.float32)
        beta = 0.05 * jax.random.normal(self._next(), (c,), jnp.float32)
        mean = 0.05 * jax.random.normal(self._next(), (c,), jnp.float32)
        var = 1.0 + 0.1 * jnp.abs(jax.random.normal(self._next(), (c,), jnp.float32))
        scale = gamma / jnp.sqrt(var + eps)
        bias = beta - mean * scale
        return scale, bias

    def linear(self, cin, cout):
        w = jax.random.normal(self._next(), (cin, cout), jnp.float32) / math.sqrt(cin)
        b = 0.01 * jax.random.normal(self._next(), (cout,), jnp.float32)
        return w, b


def _prep_conv(w):
    """PyTorch [Cout,Cin,kh,kw] -> im2col weight matrix [kh*kw*Cin, Cout] (bf16),
    with K pre-padded to a 512 multiple for the split-K (huge-K) decoder convs."""
    cout, cin, kh, kw = w.shape
    w2 = jnp.transpose(w, (2, 3, 1, 0)).reshape(kh * kw * cin, cout)
    K = w2.shape[0]
    if K > _K_FULL_MAX and K % 512 != 0:
        w2 = jnp.pad(w2, ((0, _round_up(K, 512) - K), (0, 0)))
    return {"w": w2.astype(jnp.bfloat16), "kh": kh, "kw": kw}


def _prep_dwconv(w):
    """PyTorch depthwise [C,1,kh,kw] -> tap matrix [kh*kw, C] (f32)."""
    c, _, kh, kw = w.shape
    wt = jnp.transpose(w[:, 0, :, :], (1, 2, 0)).reshape(kh * kw, c)
    return {"w": wt.astype(jnp.float32), "kh": kh, "kw": kw}


# EfficientNet-B3 inverted-residual stages (width 1.2 / depth 1.4 applied):
# (expand_ratio, kernel, stride, in_ch, out_ch, num_layers)
B3_STAGES = [
    (1, 3, 1, 40, 24, 2),
    (6, 3, 2, 24, 32, 3),
    (6, 5, 2, 32, 48, 3),
    (6, 3, 2, 48, 96, 5),
    (6, 5, 1, 96, 136, 5),
    (6, 5, 2, 136, 232, 6),
    (6, 3, 1, 232, 384, 2),
]


def make_mbconv(init, in_ch, out_ch, expand, k, stride):
    exp_ch = in_ch if expand == 1 else _make_divisible(in_ch * expand, 8)
    sq = max(1, in_ch // 4)
    p = {"cfg": (in_ch, out_ch, expand, k, stride, exp_ch)}
    if expand != 1:
        p["expand_w"] = _prep_conv(init.conv(exp_ch, in_ch, 1, 1))
        p["expand_bn"] = init.bn(exp_ch, eps=1e-3)
    p["dw_w"] = _prep_dwconv(init.conv(exp_ch, 1, k, k))
    p["dw_bn"] = init.bn(exp_ch, eps=1e-3)
    p["se_w1"], p["se_b1"] = init.linear(exp_ch, sq)
    p["se_w2"], p["se_b2"] = init.linear(sq, exp_ch)
    p["proj_w"] = _prep_conv(init.conv(out_ch, exp_ch, 1, 1))
    p["proj_bn"] = init.bn(out_ch, eps=1e-3)
    return p


def mbconv_fwd(x, p):
    in_ch, out_ch, expand, k, stride, exp_ch = p["cfg"]
    h = x
    if expand != 1:
        sc, bi = p["expand_bn"]
        h = conv_bn_act(h, p["expand_w"], 1, 0, sc, bi, "silu")
    sc, bi = p["dw_bn"]
    h = dwconv_bn_act(h, p["dw_w"], stride, (k - 1) // 2, sc, bi, "silu")
    h = _se_impl(h, p["se_w1"], p["se_b1"], p["se_w2"], p["se_b2"])
    sc, bi = p["proj_bn"]
    use_res = (stride == 1 and in_ch == out_ch)
    # residual add fused into the projection matmul epilogue; stochastic depth = identity (eval)
    h = conv_bn_act(h, p["proj_w"], 1, 0, sc, bi, "none",
                    residual=x if use_res else None)
    return h


def make_decoder(init, in_ch, n_filters, kernel_size=3):
    mid = in_ch // 4
    return {
        "conv1": _prep_conv(init.conv(mid, in_ch, 3, 3)), "bn1": init.bn(mid),
        "bn2": init.bn(mid),
        "conv3": _prep_conv(init.conv(n_filters, mid, kernel_size, kernel_size)),
        "bn3": init.bn(n_filters),
        "k": kernel_size,
    }


def decoder_fwd(xs, p):
    # conv1 -> bn1 -> relu1 -> [bn2 hoisted: commutes with bilinear interp]
    # -> upsample -> relu2 -> conv3 -> bn3 -> relu3
    sc1, bi1 = p["bn1"]
    sc2, bi2 = p["bn2"]
    h = conv_bn_act(xs, p["conv1"], 1, 1, sc1, bi1, "relu",
                    scale2=sc2, bias2=bi2)
    h = upsample2x_relu(h)
    pad = 1 if p["k"] == 3 else 0
    sc3, bi3 = p["bn3"]
    h = conv_bn_act(h, p["conv3"], 1, pad, sc3, bi3, "relu")
    return h


def build_params(seed, num_classes, num_channels=6):
    init = ParamInit(seed)
    P = {"num_classes": num_classes}
    P["firstconv"] = _prep_conv(init.conv(40, num_channels, 7, 7))
    P["firstbn"] = init.bn(40, eps=1e-3)
    stages = []
    for (expand, k, s, cin, cout, nlayers) in B3_STAGES:
        blocks = []
        for li in range(nlayers):
            bi = cin if li == 0 else cout
            bs = s if li == 0 else 1
            blocks.append(make_mbconv(init, bi, cout, expand, k, bs))
        stages.append(blocks)
    P["stages"] = stages
    P["head_w"] = _prep_conv(init.conv(1536, 384, 1, 1))
    P["head_bn"] = init.bn(1536, eps=1e-3)

    filters = [32, 48, 136, 1536, 40]
    P["center"] = make_decoder(init, filters[3], filters[3])
    P["decoder4"] = make_decoder(init, filters[3] + filters[2], filters[2])
    P["decoder3"] = make_decoder(init, filters[2] + filters[1], filters[1])
    P["decoder2"] = make_decoder(init, filters[1] + filters[0], filters[0])
    P["decoder1"] = make_decoder(init, filters[0] + filters[4], filters[0])

    # final 3x3 conv (no bias) + BN + ReLU + 1x1 conv (bias); fused into one kernel.
    P["final_conv1"] = _prep_conv(init.conv(32, filters[0], 3, 3))
    P["final_bn"] = init.bn(32)
    wf = init.conv(num_classes, 32, 1, 1)
    w2mat = jnp.transpose(wf[:, :, 0, 0], (1, 0))            # [32, num_classes]
    n2p = _round_up(num_classes, 128)                        # lane-dense output
    P["final_conv2_w"] = jnp.pad(w2mat, ((0, 0), (0, n2p - num_classes))
                                 ).astype(jnp.bfloat16)
    bfinal = 0.01 * jax.random.normal(init._next(), (num_classes,), jnp.float32)
    P["final_conv2_b"] = jnp.pad(bfinal, (0, n2p - num_classes))
    return P


@functools.partial(jax.jit, static_argnames=("n_out",))
def _final_head_impl(x, w1, s1, c1, w2, c2, *, n_out):
    patches, (N, Ho, Wo) = _im2col(x, 3, 3, 1, 1)
    out = fused_final_head(patches, w1, s1, c1, w2, c2, n_out)
    return out.reshape(N, Ho, Wo, n_out)


def eb3net_forward(x_nchw, P):
    # NCHW -> NHWC, bf16 activations between layers (f32 accumulation in kernels)
    x = jnp.transpose(x_nchw, (0, 2, 3, 1)).astype(jnp.bfloat16)

    sc, bi = P["firstbn"]
    x = conv_bn_act(x, P["firstconv"], 2, 3, sc, bi, "silu")     # stem conv/bn/silu

    def run(blocks, h):
        for b in blocks:
            h = mbconv_fwd(h, b)
        return h

    st = P["stages"]
    e1 = run(st[1], run(st[0], x))          # encoder1 = features[1:3]
    e2 = run(st[2], e1)                     # encoder2 = features[3:4]
    e3 = run(st[4], run(st[3], e2))         # encoder3 = features[4:6]
    e4 = run(st[6], run(st[5], e3))         # encoder4 = features[6:8]
    sc, bi = P["head_bn"]
    e4 = conv_bn_act(e4, P["head_w"], 1, 0, sc, bi, "silu")      # features[8]

    # decoder skip-concats are done inside the conv1 jit (fused with im2col)
    center = decoder_fwd(e4, P["center"])
    d4 = decoder_fwd((center, e3), P["decoder4"])
    d3 = decoder_fwd((d4, e2), P["decoder3"])
    d2 = decoder_fwd((d3, e1), P["decoder2"])
    d1 = decoder_fwd((d2, x), P["decoder1"])

    f = _final_head_impl(d1, P["final_conv1"]["w"], P["final_bn"][0],
                         P["final_bn"][1], P["final_conv2_w"],
                         P["final_conv2_b"], n_out=P["num_classes"])
    return jnp.transpose(f, (0, 3, 1, 2))   # NHWC -> NCHW, f32 logits


if __name__ == "__main__":
    num_classes = 3
    num_channels = 6
    params = build_params(seed=0, num_classes=num_classes,
                          num_channels=num_channels)

    key = jax.random.PRNGKey(0)
    x = jax.random.normal(key, (2, num_channels, 64, 64), jnp.float32)

    out = eb3net_forward(x, params)
    out = jax.block_until_ready(out)

    assert out.shape == (2, num_classes, 64, 64), out.shape
    assert bool(jnp.all(jnp.isfinite(out)))
    print("KERNEL_OK")
</pallas_src>

<mosaic_0001>
module attributes {stable_mosaic.version = 11 : i64} {
  func.func @_mm_single_kernel(%arg0: i32, %arg1: i32, %arg2: memref<1024x294xbf16, #tpu.memory_space<vmem>>, %arg3: memref<294x128xbf16, #tpu.memory_space<vmem>>, %arg4: memref<1x128xf32, #tpu.memory_space<vmem>>, %arg5: memref<1x128xf32, #tpu.memory_space<vmem>>, %arg6: memref<1024x128xbf16, #tpu.memory_space<vmem>>) attributes {dimension_semantics = [#tpu.dimension_semantics<parallel>, #tpu.dimension_semantics<parallel>], iteration_bounds = array<i64: 2, 1>, scalar_prefetch = 0 : i64, scratch_operands = 0 : i64, tpu.core_type = #tpu.core_type<tc>, window_params = [{transform_indices = @transform_0, window_bounds = array<i64: 1024, 294>}, {transform_indices = @transform_1, window_bounds = array<i64: 294, 128>}, {transform_indices = @transform_2, window_bounds = array<i64: 1, 128>}, {transform_indices = @transform_3, window_bounds = array<i64: 1, 128>}, {transform_indices = @transform_4, window_bounds = array<i64: 1024, 128>}]} {
    %c0 = arith.constant 0 : index
    %c0_0 = arith.constant 0 : index
    %0 = vector.load %arg2[%c0, %c0_0] : memref<1024x294xbf16, #tpu.memory_space<vmem>>, vector<1024x294xbf16>
    %c0_1 = arith.constant 0 : index
    %c0_2 = arith.constant 0 : index
    %1 = vector.load %arg3[%c0_1, %c0_2] : memref<294x128xbf16, #tpu.memory_space<vmem>>, vector<294x128xbf16>
    %cst = arith.constant dense<0.000000e+00> : vector<1024x128xf32>
    %2 = tpu.matmul %0, %1, %cst {dimension_numbers = #tpu.dot_dimension_numbers<[1], [0], [0], [1], [0, 0, 1, 1], [], []>} : vector<1024x294xbf16>, vector<294x128xbf16>, vector<1024x128xf32> -> vector<1024x128xf32>
    %c0_3 = arith.constant 0 : index
    %c0_4 = arith.constant 0 : index
    %3 = vector.load %arg4[%c0_3, %c0_4] : memref<1x128xf32, #tpu.memory_space<vmem>>, vector<1x128xf32>
    %4 = vector.broadcast %3 : vector<1x128xf32> to vector<1024x128xf32>
    %5 = arith.mulf %2, %4 : vector<1024x128xf32>
    %c0_5 = arith.constant 0 : index
    %c0_6 = arith.constant 0 : index
    %6 = vector.load %arg5[%c0_5, %c0_6] : memref<1x128xf32, #tpu.memory_space<vmem>>, vector<1x128xf32>
    %7 = vector.broadcast %6 : vector<1x128xf32> to vector<1024x128xf32>
    %8 = arith.addf %5, %7 : vector<1024x128xf32>
    %cst_7 = arith.constant 0.000000e+00 : f32
    %9 = vector.broadcast %cst_7 : f32 to vector<1024x128xf32>
    %10 = arith.subf %9, %8 : vector<1024x128xf32>
    %11 = math.exp %10 : vector<1024x128xf32>
    %cst_8 = arith.constant 1.000000e+00 : f32
    %12 = vector.broadcast %cst_8 : f32 to vector<1024x128xf32>
    %13 = arith.addf %12, %11 : vector<1024x128xf32>
    %14 = tpu.reciprocal %13 {approx = true} : vector<1024x128xf32> -> vector<1024x128xf32>
    %15 = arith.mulf %8, %14 : vector<1024x128xf32>
    %16 = arith.truncf %15 : vector<1024x128xf32> to vector<1024x128xbf16>
    %c0_9 = arith.constant 0 : index
    %c0_10 = arith.constant 0 : index
    %17 = vector.load %arg6[%c0_9, %c0_10] : memref<1024x128xbf16, #tpu.memory_space<vmem>>, vector<1024x128xbf16>
    tpu.vector_store %arg6[%c0_9, %c0_10], %16 {strides = array<i32>} : memref<1024x128xbf16, #tpu.memory_space<vmem>>, vector<1024x128xbf16>,
    return
  }
  func.func @transform_0(%arg0: i32, %arg1: i32) -> (i32, i32) {
    %c0_i32 = arith.constant 0 : i32
    %c0_i32_0 = arith.constant 0 : i32
    return %arg0, %c0_i32 : i32, i32
  }
  func.func @transform_1(%arg0: i32, %arg1: i32) -> (i32, i32) {
    %c0_i32 = arith.constant 0 : i32
    %c0_i32_0 = arith.constant 0 : i32
    return %c0_i32, %arg1 : i32, i32
  }
  func.func @transform_2(%arg0: i32, %arg1: i32) -> (i32, i32) {
    %c0_i32 = arith.constant 0 : i32
    %c0_i32_0 = arith.constant 0 : i32
    return %c0_i32, %arg1 : i32, i32
  }
  func.func @transform_3(%arg0: i32, %arg1: i32) -> (i32, i32) {
    %c0_i32 = arith.constant 0 : i32
    %c0_i32_0 = arith.constant 0 : i32
    return %c0_i32, %arg1 : i32, i32
  }
  func.func @transform_4(%arg0: i32, %arg1: i32) -> (i32, i32) {
    %c0_i32 = arith.constant 0 : i32
    return %arg0, %arg1 : i32, i32
  }
}

</mosaic_0001>

<bundles_post_ra>
// kernel: _conv_bn_act_impl.1
= control target key start
LH: loop header
LB: loop body
LE: loop exit
PB: predicated region body
PF: predicated region fallthrough
CT: control target
= control target key end

     0   :  { %9 = vsyncpa [#allocation3], 0  ;;  %s8725_s0 = inlined_call_operand.vmem [shape: bf16[2048,294], index: 0, kind: input, shape index: {}]   ;;  %s8726_s1 = inlined_call_operand.vmem [shape: bf16[294,128], index: 1, kind: input, shape index: {}]   ;;  %s8727_s2 = inlined_call_operand.vmem [shape: f32[1,128], index: 2, kind: input, shape index: {}]   ;;  %s8728_s3 = inlined_call_operand.vmem [shape: f32[1,128], index: 3, kind: input, shape index: {}]   ;;  %s8729_s4 = inlined_call_operand.hbm [shape: bf16[2048,128], index: 4, kind: output, shape index: {}]  }
   0x1   :  { %11 = vsyncpa [#allocation3 + $0x1], 0  ;;  %s6843_s15 = smov 0   ;;  %s6845_s16 = smov 0  }
   0x2   :  { %s6847_s17 = smov 0   ;;  %s6849_s18 = smov 0  }
   0x3   :  { %s6851_s19 = smov 0   ;;  %s6853_s20 = smov 0  }
   0x4 LB: > { %s4717_s21 = sadd.s32 4294967295, %s6812_s20   ;;  %s4718_s22 = sadd.s32 4294967294, %s6812_s20   ;;  %s6812_s20 = sphi %s6853_s20, %s17_s20   ;;  %s6808_s19 = sphi %s6851_s19, %s8810_s19   ;;  %s6804_s18 = sphi %s6849_s18, %s8809_s18   ;;  %s6800_s17 = sphi %s6847_s17, %s8808_s17   ;;  %s6796_s16 = sphi %s6845_s16, %s8807_s16   ;;  %s6792_s15 = sphi %s6843_s15, %s8806_s15  }
   0x5   : > { %s29_s23 = sadd.s32 1, %s6808_s19  ;;  %s142_s24 = sadd.s32 1, %s6800_s17 }
   0x6   : > { %p31_p0 = scmp.ge.s32.totalorder %s29_s23, 2  ;;  %p152_p1 = scmp.ne.s32.totalorder %s6800_s17, %s6796_s16 }
   0x7   : > { %p153_p2 = scmp.eq.s32.totalorder %s4717_s21, 1  ;;  %p158_p3 = scmp.ne.s32.totalorder %s6796_s16, %s6792_s15 }
   0x8   : > { %s8812_s23 = smov (%p31_p0, %s29_s23), 0  ;;  %p159_p5 = scmp.eq.s32.totalorder %s4718_s22, 1 }
   0x9   : > { %p6883_p4 = por %p153_p2, %p152_p1  ;;  %s137_s26 = ssub.s32 %s6808_s19, %s8812_s23 }
   0xa   : > { %p4724_p6 = scmp.ge.s32.totalorder %s6812_s20, 1  ;;  %p140_p7 = scmp.eq.s32.totalorder %s137_s26, 0 }
   0xb   : > { %p6890_p8 = por %p159_p5, %p158_p3  ;;  %p206_p9 = scmp.lt.s32.totalorder %s6812_s20, 3 }
   0xc   : > { %s6896_s28 = scalar_select %p140_p7, %s6800_s17, %s142_s24  }
   0xd   : > { %p207_p10 = pnand %p4724_p6, %p206_p9 }
   0xf   : > { %210 = sbr.rel (%p207_p10) target bundleno = 768 (0x300), region = 36 }
  0x14   : > { %v5943_v0 = vld [vmem:[%s8726_s1 + $0x38] sm:$0xff]   ;;  %v6814_v1 = vmov 0   ;;  %s4726_s5 = sshll.u32 %s6804_s18, 7  ;;  %v5944_v2 = vld [vmem:[%s8726_s1 + $0x30] sm:$0xff]   ;;  %v5945_v3 = vld [vmem:[%s8726_s1 + $0x28] sm:$0xff]   ;;  %vm1819_vm0 = vcmask 1042432  }
  0x15   : > { %1823 = vmatprep.subr.bf16.mxu0 %v6814_v1  ;;  %5851 = vmatprep.subr.bf16.mxu1 %v6814_v1  ;;  %p244_p11 = scmp.lt.s32.totalorder %s4726_s5, 255  ;;  %v5946_v4 = vld [vmem:[%s8726_s1 + $0x20] sm:$0xff]   ;;  %v5947_v5 = vld [vmem:[%s8726_s1 + $0x18] sm:$0xff]   ;;  %v5948_v7 = vld [vmem:[%s8726_s1 + $0x10] sm:$0xff]   ;;  %vm1626_vm1 = vcmask 310272   ;;  %s240_s30 = sand.u32 1, %s6796_s16  }
  0x16   : > { %1824 = vmatpush1.bf16.msra.mxu0 %v5943_v0  ;;  %5867 = vmatpush1.bf16.msra.mxu1 %v5943_v0  ;;  %v5949_v9 = vld [vmem:[%s8726_s1 + $0x8] sm:$0xff]   ;;  %v5950_v10 = vld [vmem:[%s8726_s1] sm:$0xff]   ;;  %v5951_v11 = vld [vmem:[%s8726_s1 + $0x78] sm:$0xff]   ;;  %s5266_s29 = sshll.u32 %s6804_s18, 13  ;;  %s8680_s18 = scalar_lea.sflag [#allocation3], %s240_s30 }
  0x17   : > { %1825 = vmatprep.subr.bf16.mxu0 %v6814_v1  ;;  %5852 = vmatprep.subr.bf16.mxu1 %v6814_v1  ;;  %s8814_s5 = smov (!%p244_p11, %s4726_s5), 255  ;;  %v5952_v12 = vld [vmem:[%s8726_s1 + $0x70] sm:$0xff]   ;;  %v5953_v13 = vld [vmem:[%s8726_s1 + $0x68] sm:$0xff]   ;;  %v5954_v14 = vld [vmem:[%s8726_s1 + $0x60] sm:$0xff]   ;;  %s8673_s8 = scalar_lea.hbm %s8729_s4, %s5266_s29 }
  0x18   : > { %s5884_s12 = smul.u32 12, %s8814_s5  ;;  %v5955_v15 = vld [vmem:[%s8726_s1 + $0x58] sm:$0xff]   ;;  %v5956_v16 = vld [vmem:[%s8726_s1 + $0x50] sm:$0xff]   ;;  %v5957_v17 = vld [vmem:[%s8726_s1 + $0x48] sm:$0xff]   ;;  %s7520_s5 = sshll.u32 %s240_s30, 9 }
  0x19   : > { %v5958_v18 = vld [vmem:[%s8726_s1 + $0x40] sm:$0xff]   ;;  %v5965_v19 = vld [vmem:[%s8726_s1 + $0x90] ss:$0 sps:$4 sm:$0x77]   ;;  %v5996_v25 = vld [vmem:[%s8726_s1 + $0x88] sm:$0xff]   ;;  %s7546_s6 = scalar_lea.vmem [#allocation2], %s7520_s5 }
  0x1a   : > { %1826 = vmatpush1.bf16.msra.mxu0 %v5944_v2  ;;  %5868 = vmatpush1.bf16.msra.mxu1 %v5944_v2  ;;  %s6925_s24 = scalar_lea.vmem %s8725_s0, %s5884_s12  ;;  %v1821_v23 = vsel %vm1819_vm0, %v5965_v19, 0  ;;  %v6027_v26 = vld [vmem:[%s8726_s1 + $0x80] sm:$0xff]   ;;  %s4606_s5 = sshll.u32 %s7546_s6, 4  ;;  %s8675_s5 = int_to_ptr.vmem [resolvable:$true] %s4606_s5 }
  0x1b   : > { %1827 = vmatprep.subr.bf16.mxu0 %v6814_v1  ;;  %5853 = vmatprep.subr.bf16.mxu1 %v6814_v1  ;;  %v5961_v6 = vld [vmem:[%s6925_s24 + $0x4] ss:$12 sps:$4 sm:$0xff]   ;;  %v5959_v20 = vld [vmem:[%s6925_s24] ss:$12 sps:$4 sm:$0xff]   ;;  %v5966_v22 = vld [vmem:[%s6925_s24 + $0x1c] ss:$12 sps:$4 sm:$0xff]  }
  0x1c   : > { %v5964_v8 = vld [vmem:[%s6925_s24 + $0x484] ss:$12 sps:$4 sm:$0xff]   ;;  %1855 = vmatprep.mubr.bf16.mxu0 %v5961_v6  ;;  %v5962_v21 = vld [vmem:[%s6925_s24 + $0x480] ss:$12 sps:$4 sm:$0xff]   ;;  %v5968_v24 = vld [vmem:[%s6925_s24 + $0x49c] ss:$12 sps:$4 sm:$0xff]  }
  0x1d   : > { %2239 = vmatprep.mubr.bf16.mxu1 %v5964_v8  ;;  %v5970_v27 = vld [vmem:[%s6925_s24 + $0x18] ss:$12 sps:$4 sm:$0xff]   ;;  %v5972_v29 = vld [vmem:[%s6925_s24 + $0x34] ss:$12 sps:$4 sm:$0xff]   ;;  %v5976_v31 = vld [vmem:[%s6925_s24 + $0x30] ss:$12 sps:$4 sm:$0xff]  }
  0x1e   : > { %1828 = vmatpush1.bf16.msra.mxu0 %v5945_v3  ;;  %5869 = vmatpush1.bf16.msra.mxu1 %v5945_v3  ;;  %v5971_v28 = vld [vmem:[%s6925_s24 + $0x498] ss:$12 sps:$4 sm:$0xff]   ;;  %v5974_v30 = vld [vmem:[%s6925_s24 + $0x4b4] ss:$12 sps:$4 sm:$0xff]   ;;  %v5977_v32 = vld [vmem:[%s6925_s24 + $0x4b0] ss:$12 sps:$4 sm:$0xff]  }
  0x1f   : > { %1829 = vmatprep.subr.bf16.mxu0 %v6814_v1  ;;  %5854 = vmatprep.subr.bf16.mxu1 %v6814_v1  ;;  %v5978_v33 = vld [vmem:[%s6925_s24 + $0x4c] ss:$12 sps:$4 sm:$0xff]   ;;  %v5982_v35 = vld [vmem:[%s6925_s24 + $0x48] ss:$12 sps:$4 sm:$0xff]   ;;  %v5984_v37 = vld [vmem:[%s6925_s24 + $0x64] ss:$12 sps:$4 sm:$0xff]  }
  0x20   : > { %v5980_v34 = vld [vmem:[%s6925_s24 + $0x4cc] ss:$12 sps:$4 sm:$0xff]   ;;  %v5983_v36 = vld [vmem:[%s6925_s24 + $0x4c8] ss:$12 sps:$4 sm:$0xff]   ;;  %v5986_v38 = vld [vmem:[%s6925_s24 + $0x4e4] ss:$12 sps:$4 sm:$0xff]  }
  0x21   : > { %v5988_v39 = vld [vmem:[%s6925_s24 + $0x60] ss:$12 sps:$4 sm:$0xff]   ;;  %v5990_v41 = vld [vmem:[%s6925_s24 + $0x7c] ss:$12 sps:$4 sm:$0xff]   ;;  %v5994_v43 = vld [vmem:[%s6925_s24 + $0x78] ss:$12 sps:$4 sm:$0xff]  }
  0x22   : > { %1830 = vmatpush1.bf16.msra.mxu0 %v5946_v4  ;;  %5870 = vmatpush1.bf16.msra.mxu1 %v5946_v4  ;;  %v5989_v40 = vld [vmem:[%s6925_s24 + $0x4e0] ss:$12 sps:$4 sm:$0xff]   ;;  %v5992_v42 = vld [vmem:[%s6925_s24 + $0x4fc] ss:$12 sps:$4 sm:$0xff]   ;;  %v5995_v44 = vld [vmem:[%s6925_s24 + $0x4f8] ss:$12 sps:$4 sm:$0xff]  }
  0x23   : > { %1831 = vmatprep.subr.bf16.mxu0 %v6814_v1  ;;  %5855 = vmatprep.subr.bf16.mxu1 %v6814_v1  ;;  %v5997_v45 = vld [vmem:[%s6925_s24 + $0x94] ss:$12 sps:$4 sm:$0xff]   ;;  %v6001_v47 = vld [vmem:[%s6925_s24 + $0x90] ss:$12 sps:$4 sm:$0xff]   ;;  %v6003_v49 = vld [vmem:[%s6925_s24 + $0xac] ss:$12 sps:$4 sm:$0xff]  }
  0x24   : > { %v5999_v46 = vld [vmem:[%s6925_s24 + $0x514] ss:$12 sps:$4 sm:$0xff]   ;;  %v6002_v48 = vld [vmem:[%s6925_s24 + $0x510] ss:$12 sps:$4 sm:$0xff]   ;;  %v6005_v50 = vld [vmem:[%s6925_s24 + $0x52c] ss:$12 sps:$4 sm:$0xff]  }
  0x25   : > { %v6007_v51 = vld [vmem:[%s6925_s24 + $0xa8] ss:$12 sps:$4 sm:$0xff]   ;;  %v6009_v53 = vld [vmem:[%s6925_s24 + $0xc4] ss:$12 sps:$4 sm:$0xff]   ;;  %v6013_v55 = vld [vmem:[%s6925_s24 + $0xc0] ss:$12 sps:$4 sm:$0xff]  }
  0x26   : > { %1832 = vmatpush1.bf16.msra.mxu0 %v5947_v5  ;;  %5871 = vmatpush1.bf16.msra.mxu1 %v5947_v5  ;;  %v6008_v52 = vld [vmem:[%s6925_s24 + $0x528] ss:$12 sps:$4 sm:$0xff]   ;;  %v6011_v54 = vld [vmem:[%s6925_s24 + $0x544] ss:$12 sps:$4 sm:$0xff]   ;;  %v6014_v56 = vld [vmem:[%s6925_s24 + $0x540] ss:$12 sps:$4 sm:$0xff]  }
  0x27   : > { %1833 = vmatprep.subr.bf16.mxu0 %v6814_v1  ;;  %5856 = vmatprep.subr.bf16.mxu1 %v6814_v1  ;;  %v6015_v57 = vld [vmem:[%s6925_s24 + $0xdc] ss:$12 sps:$4 sm:$0xff]   ;;  %v6019_v59 = vld [vmem:[%s6925_s24 + $0xd8] ss:$12 sps:$4 sm:$0xff]   ;;  %v6021_v61 = vld [vmem:[%s6925_s24 + $0xf4] ss:$12 sps:$4 sm:$0xff]  }
  0x28   : > { %v6017_v58 = vld [vmem:[%s6925_s24 + $0x55c] ss:$12 sps:$4 sm:$0xff]   ;;  %v6020_v60 = vld [vmem:[%s6925_s24 + $0x558] ss:$12 sps:$4 sm:$0xff]   ;;  %v6023_v62 = vld [vmem:[%s6925_s24 + $0x574] ss:$12 sps:$4 sm:$0xff]  }
  0x29   : > { %v6025_v63 = vld [vmem:[%s6925_s24 + $0xf0] ss:$12 sps:$4 sm:$0xff]   ;;  %v6030_v2 = vld [vmem:[%s6925_s24 + $0x58c] ss:$12 sps:$4 sm:$0xff]   ;;  %v6032_v3 = vld [vmem:[%s6925_s24 + $0x108] ss:$12 sps:$4 sm:$0xff]  }
  0x2a   : > { %1834 = vmatpush1.bf16.msra.mxu0 %v5948_v7  ;;  %5872 = vmatpush1.bf16.msra.mxu1 %v5948_v7  ;;  %v6026_v0 = vld [vmem:[%s6925_s24 + $0x570] ss:$12 sps:$4 sm:$0xff]   ;;  %v6033_v4 = vld [vmem:[%s6925_s24 + $0x588] ss:$12 sps:$4 sm:$0xff]   ;;  %v6038_v7 = vld [vmem:[%s6925_s24 + $0x120] ss:$12 sps:$4 sm:$0xff]  }
  0x2b   : > { %1835 = vmatprep.subr.bf16.mxu0 %v6814_v1  ;;  %5857 = vmatprep.subr.bf16.mxu1 %v6814_v1  ;;  %v6034_v5 = vld [vmem:[%s6925_s24 + $0x124] ss:$12 sps:$4 sm:$0xff]   ;;  %v6039_v8 = vld [vmem:[%s6925_s24 + $0x5a0] ss:$12 sps:$4 sm:$0xff]   ;;  %s6736_s9 = scalar_lea.vmem %s8675_s5, 8192  ;;  %s6815_s10 = smov [#allocation2]  }
  0x2c   : > { %v6036_v6 = vld [vmem:[%s6925_s24 + $0x5a4] ss:$12 sps:$4 sm:$0xff]   ;;  %p6737_p12 = scmp.ne.s32.totalorder %s8675_s5, %s6736_s9  ;;  %s6740_s11 = sshll.u32 %s6815_s10, 4  ;;  %s6741_s11 = int_to_ptr.vmem [resolvable:$false] %s6740_s11 }
  0x2d   : > { %s6742_s12 = scalar_lea.vmem %s6741_s11, 16384  ;;  %p6743_p1 = scmp.lt.s32.totalorder %s8675_s5, %s6741_s11 }
  0x2e   : > { %1836 = vmatpush1.bf16.msra.mxu0 %v5949_v9  ;;  %5873 = vmatpush1.bf16.msra.mxu1 %v5949_v9  ;;  %v6040_v9 = vld [vmem:[%s6925_s24 + $0x13c] ss:$12 sps:$4 sm:$0xff]   ;;  %p6738_p13 = pnand %p6737_p12, %p6883_p4  ;;  %p6744_p2 = scmp.lt.s32.totalorder %s6742_s12, %s6736_s9 }
  0x2f   : > { %1837 = vmatprep.subr.bf16.mxu0 %v6814_v1  ;;  %5858 = vmatprep.subr.bf16.mxu1 %v6814_v1 }
  0x30   : > { %p6739_p0 = pneg %p6738_p13  ;;  %p6745_p3 = por %p6744_p2, %p6743_p1 }
  0x32   : > { %1838 = vmatpush1.bf16.msra.mxu0 %v5950_v10  ;;  %5874 = vmatpush1.bf16.msra.mxu1 %v5950_v10  ;;  %v6042_v10 = vld [vmem:[%s6925_s24 + $0x5bc] ss:$12 sps:$4 sm:$0xff]   ;;  %p6746_p5 = pnand %p6745_p3, %p6739_p0 }
  0x33   : > { %1839 = vmatprep.subr.bf16.mxu0 %v6814_v1  ;;  %5859 = vmatprep.subr.bf16.mxu1 %v6814_v1 }
  0x36   : > { %1840 = vmatpush2.bf16.msra.mxu0 %v5951_v11  ;;  %5875 = vmatpush2.bf16.msra.mxu1 %v5951_v11  ;;  %v6044_v11 = vld [vmem:[%s6925_s24 + $0x138] ss:$12 sps:$4 sm:$0xff]  }
  0x37   : > { %1841 = vmatprep.subr.bf16.mxu0 %v6814_v1  ;;  %5860 = vmatprep.subr.bf16.mxu1 %v6814_v1 }
  0x3a   : > { %1842 = vmatpush2.bf16.msra.mxu0 %v5952_v12  ;;  %5876 = vmatpush2.bf16.msra.mxu1 %v5952_v12  ;;  %v6045_v12 = vld [vmem:[%s6925_s24 + $0x5b8] ss:$12 sps:$4 sm:$0xff]  }
  0x3b   : > { %1843 = vmatprep.subr.bf16.mxu0 %v6814_v1  ;;  %5861 = vmatprep.subr.bf16.mxu1 %v6814_v1 }
  0x3e   : > { %1844 = vmatpush2.bf16.msra.mxu0 %v5953_v13  ;;  %5877 = vmatpush2.bf16.msra.mxu1 %v5953_v13  ;;  %v6046_v13 = vld [vmem:[%s6925_s24 + $0x154] ss:$12 sps:$4 sm:$0xff]  }
  0x3f   : > { %1845 = vmatprep.subr.bf16.mxu0 %v6814_v1  ;;  %5862 = vmatprep.subr.bf16.mxu1 %v6814_v1 }
  0x42   : > { %1846 = vmatpush2.bf16.msra.mxu0 %v5954_v14  ;;  %5878 = vmatpush2.bf16.msra.mxu1 %v5954_v14  ;;  %v6048_v14 = vld [vmem:[%s6925_s24 + $0x5d4] ss:$12 sps:$4 sm:$0xff]  }
  0x43   : > { %1847 = vmatprep.subr.bf16.mxu0 %v6814_v1  ;;  %5863 = vmatprep.subr.bf16.mxu1 %v6814_v1 }
  0x46   : > { %1848 = vmatpush2.bf16.msra.mxu0 %v5955_v15  ;;  %5879 = vmatpush2.bf16.msra.mxu1 %v5955_v15  ;;  %v6050_v15 = vld [vmem:[%s6925_s24 + $0x150] ss:$12 sps:$4 sm:$0xff]  }
  0x47   : > { %1849 = vmatprep.subr.bf16.mxu0 %v6814_v1  ;;  %5864 = vmatprep.subr.bf16.mxu1 %v6814_v1 }
  0x4a   : > { %1850 = vmatpush2.bf16.msra.mxu0 %v5956_v16  ;;  %5880 = vmatpush2.bf16.msra.mxu1 %v5956_v16  ;;  %v6051_v16 = vld [vmem:[%s6925_s24 + $0x5d0] ss:$12 sps:$4 sm:$0xff]  }
  0x4b   : > { %1851 = vmatprep.subr.bf16.mxu0 %v6814_v1  ;;  %5865 = vmatprep.subr.bf16.mxu1 %v6814_v1 }
  0x4e   : > { %1852 = vmatpush2.bf16.msra.mxu0 %v5957_v17  ;;  %5881 = vmatpush2.bf16.msra.mxu1 %v5957_v17  ;;  %v6052_v17 = vld [vmem:[%s6925_s24 + $0x16c] ss:$12 sps:$4 sm:$0xff]  }
  0x4f   : > { %1853 = vmatprep.subr.bf16.mxu0 %v6814_v1  ;;  %5866 = vmatprep.subr.bf16.mxu1 %v6814_v1  ;;  %v6028_v1 = vld [vmem:[%s6925_s24 + $0x10c] ss:$12 sps:$4 sm:$0xff]  }
  0x52   : > { %1854 = vmatpush2.bf16.msra.mxu0 %v5958_v18  ;;  %5882 = vmatpush2.bf16.msra.mxu1 %v5958_v18  ;;  %v6054_v18 = vld [vmem:[%s6925_s24 + $0x5ec] ss:$12 sps:$4 sm:$0xff]  }
  0x53   : > { %5883 = vmatprep.subr.msk.bf16.mxu1 %vm1819_vm0, %v5965_v19  ;;  %v6056_v19 = vld [vmem:[%s6925_s24 + $0x168] ss:$12 sps:$4 sm:$0xff]  }
  0x55   : > { %1856 = vmatmul.mubr.bf16.vlgmr.msra.gmra.mxu0 %v5959_v20  ;;  %2240 = vmatmul.mubr.bf16.vlgmr.msra.gmra.mxu1 %v5962_v21  ;;  %v6057_v20 = vld [vmem:[%s6925_s24 + $0x5e8] ss:$12 sps:$4 sm:$0xff]   ;;  %v6058_v21 = vld [vmem:[%s6925_s24 + $0x184] ss:$12 sps:$4 sm:$0xff]  }
  0x56   : > { %5718 = vmatpush3.bf16.msra.mxu1 %v1821_v23  ;;  %1863 = vmatprep.mubr.bf16.mxu0 %v5966_v22  ;;  %v6060_v22 = vld [vmem:[%s6925_s24 + $0x8] ss:$12 sps:$4 sm:$0xff]   ;;  %v6061_v23 = vld [vmem:[%s6925_s24 + $0x180] ss:$12 sps:$4 sm:$0xff]  }
  0x57   : > { %2247 = vmatprep.mubr.bf16.mxu1 %v5968_v24  ;;  %5719 = vmatprep.subr.bf16.mxu1 %v5996_v25  ;;  %v6062_v24 = vld [vmem:[%s6925_s24 + $0x20] ss:$12 sps:$4 sm:$0xff]  }
  0x5a   : > { %5720 = vmatpush3.bf16.msra.mxu1 %v5996_v25  ;;  %v6063_v25 = vld [vmem:[%s6925_s24 + $0x19c] ss:$12 sps:$4 sm:$0xff]  }
  0x5b   : > { %5721 = vmatprep.subr.bf16.mxu1 %v6027_v26 }
  0x5d   : > { %1864 = vmatmul.mubr.bf16.gmra.mxu0 %v5970_v27  ;;  %2248 = vmatmul.mubr.bf16.gmra.mxu1 %v5971_v28  ;;  %v6066_v27 = vld [vmem:[%s6925_s24 + $0x198] ss:$12 sps:$4 sm:$0xff]   ;;  %v6067_v28 = vld [vmem:[%s6925_s24 + $0x50] ss:$12 sps:$4 sm:$0xff]  }
  0x5e   : > { %1871 = vmatprep.mubr.bf16.mxu0 %v5972_v29  ;;  %2255 = vmatprep.mubr.bf16.mxu1 %v5974_v30  ;;  %v6068_v29 = vld [vmem:[%s6925_s24 + $0x1b4] ss:$12 sps:$4 sm:$0xff]  }
  0x5f   : > { %5722 = vmatpush3.bf16.msra.mxu1 %v6027_v26  ;;  %v6065_v26 = vld [vmem:[%s6925_s24 + $0x38] ss:$12 sps:$4 sm:$0xff]   ;;  %v6070_v30 = vld [vmem:[%s6925_s24 + $0x68] ss:$12 sps:$4 sm:$0xff]  }
  0x65   : > { %1872 = vmatmul.mubr.bf16.gmra.mxu0 %v5976_v31  ;;  %2256 = vmatmul.mubr.bf16.gmra.mxu1 %v5977_v32  ;;  %v6071_v31 = vld [vmem:[%s6925_s24 + $0x1b0] ss:$12 sps:$4 sm:$0xff]   ;;  %v6072_v32 = vld [vmem:[%s6925_s24 + $0x80] ss:$12 sps:$4 sm:$0xff]  }
  0x66   : > { %1879 = vmatprep.mubr.bf16.mxu0 %v5978_v33  ;;  %2263 = vmatprep.mubr.bf16.mxu1 %v5980_v34  ;;  %v6073_v33 = vld [vmem:[%s6925_s24 + $0x1cc] ss:$12 sps:$4 sm:$0xff]  }
  0x67   : > { %v6075_v34 = vld [vmem:[%s6925_s24 + $0x98] ss:$12 sps:$4 sm:$0xff]  }
  0x6d   : > { %1880 = vmatmul.mubr.bf16.gmra.mxu0 %v5982_v35  ;;  %2264 = vmatmul.mubr.bf16.gmra.mxu1 %v5983_v36  ;;  %v6076_v35 = vld [vmem:[%s6925_s24 + $0x1c8] ss:$12 sps:$4 sm:$0xff]   ;;  %v6077_v36 = vld [vmem:[%s6925_s24 + $0xb0] ss:$12 sps:$4 sm:$0xff]  }
  0x6e   : > { %1887 = vmatprep.mubr.bf16.mxu0 %v5984_v37  ;;  %2271 = vmatprep.mubr.bf16.mxu1 %v5986_v38  ;;  %v6078_v37 = vld [vmem:[%s6925_s24 + $0x1e4] ss:$12 sps:$4 sm:$0xff]   ;;  %v6080_v38 = vld [vmem:[%s6925_s24 + $0xc8] ss:$12 sps:$4 sm:$0xff]  }
  0x75   : > { %1888 = vmatmul.mubr.bf16.gmra.mxu0 %v5988_v39  ;;  %2272 = vmatmul.mubr.bf16.gmra.mxu1 %v5989_v40  ;;  %v6081_v39 = vld [vmem:[%s6925_s24 + $0x1e0] ss:$12 sps:$4 sm:$0xff]  }
  0x76   : > { %1895 = vmatprep.mubr.bf16.mxu0 %v5990_v41  ;;  %2279 = vmatprep.mubr.bf16.mxu1 %v5992_v42  ;;  %v6082_v40 = vld [vmem:[%s6925_s24 + $0xe0] ss:$12 sps:$4 sm:$0xff]   ;;  %v6083_v41 = vld [vmem:[%s6925_s24 + $0x1fc] ss:$12 sps:$4 sm:$0xff]   ;;  %v6085_v42 = vld [vmem:[%s6925_s24 + $0xf8] ss:$12 sps:$4 sm:$0xff]  }
  0x7d   : > { %1896 = vmatmul.mubr.bf16.gmra.mxu0 %v5994_v43  ;;  %2280 = vmatmul.mubr.bf16.gmra.mxu1 %v5995_v44  ;;  %v6086_v43 = vld [vmem:[%s6925_s24 + $0x1f8] ss:$12 sps:$4 sm:$0xff]   ;;  %v6087_v44 = vld [vmem:[%s6925_s24 + $0x110] ss:$12 sps:$4 sm:$0xff]  }
  0x7e   : > { %1903 = vmatprep.mubr.bf16.mxu0 %v5997_v45  ;;  %2287 = vmatprep.mubr.bf16.mxu1 %v5999_v46  ;;  %v6088_v45 = vld [vmem:[%s6925_s24 + $0x214] ss:$12 sps:$4 sm:$0xff]  }
  0x7f   : > { %v6090_v46 = vld [vmem:[%s6925_s24 + $0x128] ss:$12 sps:$4 sm:$0xff]  }
  0x85   : > { %1904 = vmatmul.mubr.bf16.gmra.mxu0 %v6001_v47  ;;  %2288 = vmatmul.mubr.bf16.gmra.mxu1 %v6002_v48  ;;  %v6091_v47 = vld [vmem:[%s6925_s24 + $0x210] ss:$12 sps:$4 sm:$0xff]   ;;  %v6092_v48 = vld [vmem:[%s6925_s24 + $0x140] ss:$12 sps:$4 sm:$0xff]  }
  0x86   : > { %1911 = vmatprep.mubr.bf16.mxu0 %v6003_v49  ;;  %2295 = vmatprep.mubr.bf16.mxu1 %v6005_v50  ;;  %v6093_v49 = vld [vmem:[%s6925_s24 + $0x22c] ss:$12 sps:$4 sm:$0xff]  }
  0x87   : > { %v6095_v50 = vld [vmem:[%s6925_s24 + $0x158] ss:$12 sps:$4 sm:$0xff]  }
  0x8d   : > { %1912 = vmatmul.mubr.bf16.gmra.mxu0 %v6007_v51  ;;  %2296 = vmatmul.mubr.bf16.gmra.mxu1 %v6008_v52  ;;  %v6096_v51 = vld [vmem:[%s6925_s24 + $0x228] ss:$12 sps:$4 sm:$0xff]   ;;  %v6097_v52 = vld [vmem:[%s6925_s24 + $0x170] ss:$12 sps:$4 sm:$0xff]  }
  0x8e   : > { %1919 = vmatprep.mubr.bf16.mxu0 %v6009_v53  ;;  %2303 = vmatprep.mubr.bf16.mxu1 %v6011_v54  ;;  %v6098_v53 = vld [vmem:[%s6925_s24 + $0x244] ss:$12 sps:$4 sm:$0xff]   ;;  %v6100_v54 = vld [vmem:[%s6925_s24 + $0x188] ss:$12 sps:$4 sm:$0xff]  }
  0x95   : > { %1920 = vmatmul.mubr.bf16.gmra.mxu0 %v6013_v55  ;;  %2304 = vmatmul.mubr.bf16.gmra.mxu1 %v6014_v56  ;;  %v6101_v55 = vld [vmem:[%s6925_s24 + $0x240] ss:$12 sps:$4 sm:$0xff]  }
  0x96   : > { %1927 = vmatprep.mubr.bf16.mxu0 %v6015_v57  ;;  %2311 = vmatprep.mubr.bf16.mxu1 %v6017_v58  ;;  %v6102_v56 = vld [vmem:[%s6925_s24 + $0x1a0] ss:$12 sps:$4 sm:$0xff]   ;;  %v6103_v57 = vld [vmem:[%s6925_s24 + $0x25c] ss:$12 sps:$4 sm:$0xff]   ;;  %v6105_v58 = vld [vmem:[%s6925_s24 + $0x1b8] ss:$12 sps:$4 sm:$0xff]  }
  0x9d   : > { %1928 = vmatmul.mubr.bf16.gmra.mxu0 %v6019_v59  ;;  %2312 = vmatmul.mubr.bf16.gmra.mxu1 %v6020_v60 }
  0x9e   : > { %1935 = vmatprep.mubr.bf16.mxu0 %v6021_v61  ;;  %2319 = vmatprep.mubr.bf16.mxu1 %v6023_v62 }
  0xa5   : > { %1936 = vmatmul.mubr.bf16.gmra.mxu0 %v6025_v63  ;;  %2320 = vmatmul.mubr.bf16.gmra.mxu1 %v6026_v0 }
  0xa6   : > { %1943 = vmatprep.mubr.bf16.mxu0 %v6028_v1  ;;  %2327 = vmatprep.mubr.bf16.mxu1 %v6030_v2  ;;  %v6106_v1 = vld [vmem:[%s6925_s24 + $0x258] ss:$12 sps:$4 sm:$0xff]   ;;  %v6107_v2 = vld [vmem:[%s6925_s24 + $0x1d0] ss:$12 sps:$4 sm:$0xff]  }
  0xad   : > { %1944 = vmatmul.mubr.bf16.gmra.mxu0 %v6032_v3  ;;  %2328 = vmatmul.mubr.bf16.gmra.mxu1 %v6033_v4  ;;  %v6108_v3 = vld [vmem:[%s6925_s24 + $0x274] ss:$12 sps:$4 sm:$0xff]  }
  0xae   : > { %1951 = vmatprep.mubr.bf16.mxu0 %v6034_v5  ;;  %2335 = vmatprep.mubr.bf16.mxu1 %v6036_v6  ;;  %v6110_v4 = vld [vmem:[%s6925_s24 + $0x1e8] ss:$12 sps:$4 sm:$0xff]  }
  0xb5   : > { %1952 = vmatmul.mubr.bf16.gmra.mxu0 %v6038_v7  ;;  %2336 = vmatmul.mubr.bf16.gmra.mxu1 %v6039_v8 }
  0xb6   : > { %1959 = vmatprep.mubr.bf16.mxu0 %v6040_v9  ;;  %2343 = vmatprep.mubr.bf16.mxu1 %v6042_v10 }
  0xbd   : > { %1960 = vmatmul.mubr.bf16.gmra.mxu0 %v6044_v11  ;;  %2344 = vmatmul.mubr.bf16.gmra.mxu1 %v6045_v12 }
  0xbe   : > { %1967 = vmatprep.mubr.bf16.mxu0 %v6046_v13  ;;  %2351 = vmatprep.mubr.bf16.mxu1 %v6048_v14  ;;  %v6111_v13 = vld [vmem:[%s6925_s24 + $0x270] ss:$12 sps:$4 sm:$0xff]   ;;  %v6112_v14 = vld [vmem:[%s6925_s24 + $0x200] ss:$12 sps:$4 sm:$0xff]  }
  0xc5   : > { %1968 = vmatmul.mubr.bf16.gmra.mxu0 %v6050_v15  ;;  %2352 = vmatmul.mubr.bf16.gmra.mxu1 %v6051_v16  ;;  %v6113_v15 = vld [vmem:[%s6925_s24 + $0x28c] ss:$12 sps:$4 sm:$0xff]  }
  0xc6   : > { %1975 = vmatprep.mubr.bf16.mxu0 %v6052_v17  ;;  %2359 = vmatprep.mubr.bf16.mxu1 %v6054_v18  ;;  %v6115_v16 = vld [vmem:[%s6925_s24 + $0x218] ss:$12 sps:$4 sm:$0xff]  }
  0xcd   : > { %1976 = vmatmul.mubr.bf16.gmra.mxu0 %v6056_v19  ;;  %2360 = vmatmul.mubr.bf16.gmra.mxu1 %v6057_v20 }
  0xce   : > { %1983 = vmatprep.mubr.bf16.mxu0 %v6058_v21  ;;  %5723 = vmatprep.mubr.msk.bf16.mxu1 %vm1626_vm1, %v6060_v22 }
  0xd5   : > { %1984 = vmatmul.mubr.bf16.gmra.mxu0 %v6061_v23  ;;  %5724 = vmatmul.mubr.msk.bf16.vlgmr.msra.gmra.mxu1 %vm1626_vm1, %v6062_v24 }
  0xd6   : > { %1991 = vmatprep.mubr.bf16.mxu0 %v6063_v25  ;;  %5727 = vmatprep.mubr.msk.bf16.mxu1 %vm1626_vm1, %v6065_v26  ;;  %v6116_v25 = vld [vmem:[%s6925_s24 + $0x288] ss:$12 sps:$4 sm:$0xff]   ;;  %v6117_v26 = vld [vmem:[%s6925_s24 + $0x230] ss:$12 sps:$4 sm:$0xff]  }
  0xdd   : > { %1992 = vmatmul.mubr.bf16.gmra.mxu0 %v6066_v27  ;;  %5728 = vmatmul.mubr.msk.bf16.gmra.mxu1 %vm1626_vm1, %v6067_v28  ;;  %v6120_v27 = vld [vmem:[%s6925_s24 + $0x2a4] ss:$12 sps:$4 sm:$0xff]   ;;  %v6121_v28 = vld [vmem:[%s6925_s24 + $0x248] ss:$12 sps:$4 sm:$0xff]  }
  0xde   : > { %1999 = vmatprep.mubr.bf16.mxu0 %v6068_v29  ;;  %5731 = vmatprep.mubr.msk.bf16.mxu1 %vm1626_vm1, %v6070_v30 }
  0xe5   : > { %2000 = vmatmul.mubr.bf16.gmra.mxu0 %v6071_v31  ;;  %5732 = vmatmul.mubr.msk.bf16.gmra.mxu1 %vm1626_vm1, %v6072_v32 }
  0xe6   : > { %2007 = vmatprep.mubr.bf16.mxu0 %v6073_v33  ;;  %5735 = vmatprep.mubr.msk.bf16.mxu1 %vm1626_vm1, %v6075_v34 }
  0xed   : > { %2008 = vmatmul.mubr.bf16.gmra.mxu0 %v6076_v35  ;;  %5736 = vmatmul.mubr.msk.bf16.gmra.mxu1 %vm1626_vm1, %v6077_v36 }
  0xee   : > { %2015 = vmatprep.mubr.bf16.mxu0 %v6078_v37  ;;  %5739 = vmatprep.mubr.msk.bf16.mxu1 %vm1626_vm1, %v6080_v38  ;;  %v6118_v37 = vld [vmem:[%s6925_s24 + $0x2a0] ss:$12 sps:$4 sm:$0xff]  }
  0xef   : > { %v6122_v38 = vld [vmem:[%s6925_s24 + $0x260] ss:$12 sps:$4 sm:$0xff]  }
  0xf5   : > { %2016 = vmatmul.mubr.bf16.gmra.mxu0 %v6081_v39  ;;  %5740 = vmatmul.mubr.msk.bf16.gmra.mxu1 %vm1626_vm1, %v6082_v40  ;;  %v6125_v39 = vld [vmem:[%s6925_s24 + $0x2bc] ss:$12 sps:$4 sm:$0xff]   ;;  %v6126_v40 = vld [vmem:[%s6925_s24 + $0x278] ss:$12 sps:$4 sm:$0xff]  }
  0xf6   : > { %2023 = vmatprep.mubr.bf16.mxu0 %v6083_v41  ;;  %5743 = vmatprep.mubr.msk.bf16.mxu1 %vm1626_vm1, %v6085_v42 }
  0xfd   : > { %2024 = vmatmul.mubr.bf16.gmra.mxu0 %v6086_v43  ;;  %5744 = vmatmul.mubr.msk.bf16.gmra.mxu1 %vm1626_vm1, %v6087_v44 }
  0xfe   : > { %2031 = vmatprep.mubr.bf16.mxu0 %v6088_v45  ;;  %5747 = vmatprep.mubr.msk.bf16.mxu1 %vm1626_vm1, %v6090_v46 }
 0x105   : > { %2032 = vmatmul.mubr.bf16.gmra.mxu0 %v6091_v47  ;;  %5748 = vmatmul.mubr.msk.bf16.gmra.mxu1 %vm1626_vm1, %v6092_v48 }
 0x106   : > { %2039 = vmatprep.mubr.bf16.mxu0 %v6093_v49  ;;  %5751 = vmatprep.mubr.msk.bf16.mxu1 %vm1626_vm1, %v6095_v50  ;;  %v6123_v49 = vld [vmem:[%s6925_s24 + $0x2b8] ss:$12 sps:$4 sm:$0xff]   ;;  %v6127_v50 = vld [vmem:[%s6925_s24 + $0x290] ss:$12 sps:$4 sm:$0xff]  }
 0x10d   : > { %2040 = vmatmul.mubr.bf16.gmra.mxu0 %v6096_v51  ;;  %5752 = vmatmul.mubr.msk.bf16.gmra.mxu1 %vm1626_vm1, %v6097_v52  ;;  %v6130_v51 = vld [vmem:[%s6925_s24 + $0x2d4] ss:$12 sps:$4 sm:$0xff]  }
 0x10e   : > { %2047 = vmatprep.mubr.bf16.mxu0 %v6098_v53  ;;  %5755 = vmatprep.mubr.msk.bf16.mxu1 %vm1626_vm1, %v6100_v54  ;;  %v6131_v52 = vld [vmem:[%s6925_s24 + $0x2a8] ss:$12 sps:$4 sm:$0xff]  }
 0x115   : > { %v7112_v59 = vpop.f32.mrf.mxu0  ;;  %2048 = vmatmul.mubr.bf16.gmra.mxu0 %v6101_v55  ;;  %v7114_v60 = vpop.f32.mrf.mxu1  ;;  %5756 = vmatmul.mubr.msk.bf16.gmra.mxu1 %vm1626_vm1, %v6102_v56 }
 0x116   : > { %8732 = vst [vmem:[#allocation5_spill] sm:$0xff] %v7114_v60  ;;  %2055 = vmatprep.mubr.bf16.mxu0 %v6103_v57  ;;  %5759 = vmatprep.mubr.msk.bf16.mxu1 %vm1626_vm1, %v6105_v58 }
 0x117   : > { %v1859_v61 = vpop.f32.mrf.mxu0  ;;  %v2243_v62 = vpop.f32.mrf.mxu1 }
 0x119   : > { %v7118_v63 = vpop.f32.mrf.mxu0  ;;  %v7120_v0 = vpop.f32.mrf.mxu1 }
 0x11a   : > { %8733 = vst [vmem:[#allocation6_spill] sm:$0xff] %v7120_v0 }
 0x11b   : > { %v1862_v5 = vpop.f32.mrf.mxu0  ;;  %v2246_v6 = vpop.f32.mrf.mxu1 }
 0x11d   : > { %v7126_v7 = vpop.f32.mrf.mxu0  ;;  %2056 = vmatmul.mubr.bf16.gmra.mxu0 %v6106_v1  ;;  %v7128_v8 = vpop.f32.mrf.mxu1  ;;  %5760 = vmatmul.mubr.msk.bf16.gmra.mxu1 %vm1626_vm1, %v6107_v2  ;;  %v6128_v1 = vld [vmem:[%s6925_s24 + $0x2d0] ss:$12 sps:$4 sm:$0xff]   ;;  %v6132_v2 = vld [vmem:[%s6925_s24 + $0x2c0] ss:$12 sps:$4 sm:$0xff]  }
 0x11e   : > { %8734 = vst [vmem:[#allocation7_spill] sm:$0xff] %v7128_v8  ;;  %2063 = vmatprep.mubr.bf16.mxu0 %v6108_v3  ;;  %5763 = vmatprep.mubr.msk.bf16.mxu1 %vm1626_vm1, %v6110_v4  ;;  %v6135_v3 = vld [vmem:[%s6925_s24 + $0x2ec] ss:$12 sps:$4 sm:$0xff]  }
 0x11f   : > { %v1867_v9 = vpop.f32.mrf.mxu0  ;;  %v2251_v10 = vpop.f32.mrf.mxu1  ;;  %v6136_v4 = vld [vmem:[%s6925_s24 + $0x2d8] ss:$12 sps:$4 sm:$0xff]  }
 0x121   : > { %v7132_v11 = vpop.f32.mrf.mxu0  ;;  %v7134_v12 = vpop.f32.mrf.mxu1 }
 0x122   : > { %8735 = vst [vmem:[#allocation8_spill] sm:$0xff] %v7134_v12 }
 0x123   : > { %v1870_v17 = vpop.f32.mrf.mxu0  ;;  %v2254_v18 = vpop.f32.mrf.mxu1 }
 0x124   : > { %v6133_v17 = vld [vmem:[%s6925_s24 + $0x2e8] ss:$12 sps:$4 sm:$0xff]   ;;  %v6137_v18 = vld [vmem:[%s6925_s24 + $0x2f0] ss:$12 sps:$4 sm:$0xff]  }
 0x125   : > { %v7140_v19 = vpop.f32.mrf.mxu0  ;;  %2064 = vmatmul.mubr.bf16.gmra.mxu0 %v6111_v13  ;;  %v7142_v20 = vpop.f32.mrf.mxu1  ;;  %5764 = vmatmul.mubr.msk.bf16.gmra.mxu1 %vm1626_vm1, %v6112_v14 }
 0x126   : > { %8736 = vst [vmem:[#allocation9_spill] sm:$0xff] %v7142_v20  ;;  %2071 = vmatprep.mubr.bf16.mxu0 %v6113_v15  ;;  %5767 = vmatprep.mubr.msk.bf16.mxu1 %vm1626_vm1, %v6115_v16 }
 0x127   : > { %v1875_v21 = vpop.f32.mrf.mxu0  ;;  %v2259_v22 = vpop.f32.mrf.mxu1 }
 0x128   : > { %v6140_v21 = vld [vmem:[%s6925_s24 + $0x304] ss:$12 sps:$4 sm:$0xff]   ;;  %v6141_v22 = vld [vmem:[%s6925_s24 + $0x308] ss:$12 sps:$4 sm:$0xff]  }
 0x129   : > { %v7146_v23 = vpop.f32.mrf.mxu0  ;;  %v7148_v24 = vpop.f32.mrf.mxu1 }
 0x12a   : > { %8737 = vst [vmem:[#allocation10_spill] sm:$0xff] %v7148_v24 }
 0x12b   : > { %v1878_v29 = vpop.f32.mrf.mxu0  ;;  %v2262_v30 = vpop.f32.mrf.mxu1 }
 0x12d   : > { %v7154_v31 = vpop.f32.mrf.mxu0  ;;  %2072 = vmatmul.mubr.bf16.gmra.mxu0 %v6116_v25  ;;  %v7156_v32 = vpop.f32.mrf.mxu1  ;;  %5768 = vmatmul.mubr.msk.bf16.gmra.mxu1 %vm1626_vm1, %v6117_v26 }
 0x12e   : > { %8738 = vst [vmem:[#allocation11_spill] sm:$0xff] %v7156_v32  ;;  %2079 = vmatprep.mubr.bf16.mxu0 %v6120_v27  ;;  %5771 = vmatprep.mubr.msk.bf16.mxu1 %vm1626_vm1, %v6121_v28 }
 0x12f   : > { %v1883_v33 = vpop.f32.mrf.mxu0  ;;  %v2267_v34 = vpop.f32.mrf.mxu1 }
 0x131   : > { %v7160_v35 = vpop.f32.mrf.mxu0  ;;  %v7162_v36 = vpop.f32.mrf.mxu1 }
 0x132   : > { %8739 = vst [vmem:[#allocation12_spill] sm:$0xff] %v7162_v36 }
 0x133   : > { %v1886_v41 = vpop.f32.mrf.mxu0  ;;  %v2270_v42 = vpop.f32.mrf.mxu1 }
 0x135   : > { %v7168_v43 = vpop.f32.mrf.mxu0  ;;  %2080 = vmatmul.mubr.bf16.gmra.mxu0 %v6118_v37  ;;  %v7170_v44 = vpop.f32.mrf.mxu1  ;;  %5772 = vmatmul.mubr.msk.bf16.gmra.mxu1 %vm1626_vm1, %v6122_v38  ;;  %v6138_v37 = vld [vmem:[%s6925_s24 + $0x300] ss:$12 sps:$4 sm:$0xff]  }
 0x136   : > { %8740 = vst [vmem:[#allocation13_spill] sm:$0xff] %v7170_v44  ;;  %2087 = vmatprep.mubr.bf16.mxu0 %v6125_v39  ;;  %5775 = vmatprep.mubr.msk.bf16.mxu1 %vm1626_vm1, %v6126_v40  ;;  %v6142_v38 = vld [vmem:[%s6925_s24 + $0x320] ss:$12 sps:$4 sm:$0xff]   ;;  %v6145_v39 = vld [vmem:[%s6925_s24 + $0x31c] ss:$12 sps:$4 sm:$0xff]  }
 0x137   : > { %v1891_v45 = vpop.f32.mrf.mxu0  ;;  %v2275_v46 = vpop.f32.mrf.mxu1  ;;  %v6146_v40 = vld [vmem:[%s6925_s24 + $0x338] ss:$12 sps:$4 sm:$0xff]  }
 0x139   : > { %v7174_v47 = vpop.f32.mrf.mxu0  ;;  %v7176_v48 = vpop.f32.mrf.mxu1 }
 0x13a   : > { %8741 = vst [vmem:[#allocation14_spill] sm:$0xff] %v7176_v48 }
 0x13b   : > { %v1894_v53 = vpop.f32.mrf.mxu0  ;;  %v2278_v54 = vpop.f32.mrf.mxu1 }
 0x13c   : > { %v6143_v53 = vld [vmem:[%s6925_s24 + $0x318] ss:$12 sps:$4 sm:$0xff]   ;;  %v6147_v54 = vld [vmem:[%s6925_s24 + $0x350] ss:$12 sps:$4 sm:$0xff]  }
 0x13d   : > { %v7182_v55 = vpop.f32.mrf.mxu0  ;;  %2088 = vmatmul.mubr.bf16.gmra.mxu0 %v6123_v49  ;;  %v7184_v56 = vpop.f32.mrf.mxu1  ;;  %5776 = vmatmul.mubr.msk.bf16.gmra.mxu1 %vm1626_vm1, %v6127_v50 }
 0x13e   : > { %8742 = vst [vmem:[#allocation15_spill] sm:$0xff] %v7184_v56  ;;  %2095 = vmatprep.mubr.bf16.mxu0 %v6130_v51  ;;  %5779 = vmatprep.mubr.msk.bf16.mxu1 %vm1626_vm1, %v6131_v52  ;;  %v6201_v56 = vld [vmem:[%s6925_s24 + $0x548] ss:$12 sps:$4 sm:$0xff]  }
 0x13f   : > { %v1899_v57 = vpop.f32.mrf.mxu0  ;;  %v2283_v58 = vpop.f32.mrf.mxu1 }
 0x140   : > { %v6150_v57 = vld [vmem:[%s6925_s24 + $0x334] ss:$12 sps:$4 sm:$0xff]  }
 0x141   : > { %v7188_v61 = vpop.f32.mrf.mxu0  ;;  %v7190_v62 = vpop.f32.mrf.mxu1  ;;  %v6151_v58 = vld [vmem:[%s6925_s24 + $0x368] ss:$12 sps:$4 sm:$0xff]  }
 0x142   : > { %8743 = vst [vmem:[#allocation16_spill] sm:$0xff] %v7190_v62 }
 0x143   : > { %v1902_v5 = vpop.f32.mrf.mxu0  ;;  %v2286_v6 = vpop.f32.mrf.mxu1 }
 0x145   : > { %v7196_v9 = vpop.f32.mrf.mxu0  ;;  %2096 = vmatmul.mubr.bf16.gmra.mxu0 %v6128_v1  ;;  %v7198_v10 = vpop.f32.mrf.mxu1  ;;  %5780 = vmatmul.mubr.msk.bf16.gmra.mxu1 %vm1626_vm1, %v6132_v2 }
 0x146   : > { %8744 = vst [vmem:[#allocation17_spill] sm:$0xff] %v7198_v10  ;;  %2103 = vmatprep.mubr.bf16.mxu0 %v6135_v3  ;;  %5783 = vmatprep.mubr.msk.bf16.mxu1 %vm1626_vm1, %v6136_v4 }
 0x147   : > { %v1907_v13 = vpop.f32.mrf.mxu0  ;;  %v2291_v14 = vpop.f32.mrf.mxu1 }
 0x149   : > { %v7202_v15 = vpop.f32.mrf.mxu0  ;;  %v7204_v16 = vpop.f32.mrf.mxu1 }
 0x14a   : > { %8745 = vst [vmem:[#allocation18_spill] sm:$0xff] %v7204_v16 }
 0x14b   : > { %v1910_v25 = vpop.f32.mrf.mxu0  ;;  %v2294_v26 = vpop.f32.mrf.mxu1 }
 0x14d   : > { %v7210_v27 = vpop.f32.mrf.mxu0  ;;  %2104 = vmatmul.mubr.bf16.gmra.mxu0 %v6133_v17  ;;  %v7212_v28 = vpop.f32.mrf.mxu1  ;;  %5784 = vmatmul.mubr.msk.bf16.gmra.mxu1 %vm1626_vm1, %v6137_v18  ;;  %v6148_v17 = vld [vmem:[%s6925_s24 + $0x330] ss:$12 sps:$4 sm:$0xff]   ;;  %v6152_v18 = vld [vmem:[%s6925_s24 + $0x380] ss:$12 sps:$4 sm:$0xff]  }
 0x14e   : > { %8746 = vst [vmem:[#allocation19_spill] sm:$0xff] %v7212_v28  ;;  %2111 = vmatprep.mubr.bf16.mxu0 %v6140_v21  ;;  %5787 = vmatprep.mubr.msk.bf16.mxu1 %vm1626_vm1, %v6141_v22  ;;  %v6155_v21 = vld [vmem:[%s6925_s24 + $0x34c] ss:$12 sps:$4 sm:$0xff]  }
 0x14f   : > { %v1915_v29 = vpop.f32.mrf.mxu0  ;;  %v2299_v30 = vpop.f32.mrf.mxu1  ;;  %v6156_v22 = vld [vmem:[%s6925_s24 + $0x398] ss:$12 sps:$4 sm:$0xff]   ;;  %v6192_v28 = vld [vmem:[%s6925_s24 + $0x500] ss:$12 sps:$4 sm:$0xff]  }
 0x151   : > { %v7216_v33 = vpop.f32.mrf.mxu0  ;;  %v7218_v34 = vpop.f32.mrf.mxu1 }
 0x152   : > { %8747 = vst [vmem:[#allocation20_spill] sm:$0xff] %v7218_v34 }
 0x153   : > { %v1918_v41 = vpop.f32.mrf.mxu0  ;;  %v2302_v42 = vpop.f32.mrf.mxu1 }
 0x154   : > { %v6153_v41 = vld [vmem:[%s6925_s24 + $0x348] ss:$12 sps:$4 sm:$0xff]   ;;  %v6157_v42 = vld [vmem:[%s6925_s24 + $0x3b0] ss:$12 sps:$4 sm:$0xff]  }
 0x155   : > { %v7224_v45 = vpop.f32.mrf.mxu0  ;;  %2112 = vmatmul.mubr.bf16.gmra.mxu0 %v6138_v37  ;;  %v7226_v46 = vpop.f32.mrf.mxu1  ;;  %5788 = vmatmul.mubr.msk.bf16.gmra.mxu1 %vm1626_vm1, %v6142_v38 }
 0x156   : > { %8748 = vst [vmem:[#allocation21_spill] sm:$0xff] %v7226_v46  ;;  %2119 = vmatprep.mubr.bf16.mxu0 %v6145_v39  ;;  %5791 = vmatprep.mubr.msk.bf16.mxu1 %vm1626_vm1, %v6146_v40  ;;  %v6190_v46 = vld [vmem:[%s6925_s24 + $0x3f4] ss:$12 sps:$4 sm:$0xff]  }
 0x157   : > { %v1923_v49 = vpop.f32.mrf.mxu0  ;;  %v2307_v50 = vpop.f32.mrf.mxu1 }
 0x158   : > { %v6160_v49 = vld [vmem:[%s6925_s24 + $0x364] ss:$12 sps:$4 sm:$0xff]   ;;  %v6161_v50 = vld [vmem:[%s6925_s24 + $0x3c8] ss:$12 sps:$4 sm:$0xff]  }
 0x159   : > { %v7230_v51 = vpop.f32.mrf.mxu0  ;;  %v7232_v52 = vpop.f32.mrf.mxu1 }
 0x15a   : > { %8749 = vst [vmem:[#allocation22_spill] sm:$0xff] %v7232_v52 }
 0x15b   : > { %v1926_v1 = vpop.f32.mrf.mxu0  ;;  %v2310_v2 = vpop.f32.mrf.mxu1 }
 0x15d   : > { %v7238_v3 = vpop.f32.mrf.mxu0  ;;  %2120 = vmatmul.mubr.bf16.gmra.mxu0 %v6143_v53  ;;  %v7240_v4 = vpop.f32.mrf.mxu1  ;;  %5792 = vmatmul.mubr.msk.bf16.gmra.mxu1 %vm1626_vm1, %v6147_v54 }
 0x15e   : > { %8750 = vst [vmem:[#allocation23_spill] sm:$0xff] %v7240_v4  ;;  %2127 = vmatprep.mubr.bf16.mxu0 %v6150_v57  ;;  %5795 = vmatprep.mubr.msk.bf16.mxu1 %vm1626_vm1, %v6151_v58  ;;  %v6191_v4 = vld [vmem:[%s6925_s24 + $0x4e8] ss:$12 sps:$4 sm:$0xff]  }
 0x15f   : > { %v1931_v5 = vpop.f32.mrf.mxu0  ;;  %v2315_v6 = vpop.f32.mrf.mxu1 }
 0x161   : > { %v7244_v13 = vpop.f32.mrf.mxu0  ;;  %v7246_v14 = vpop.f32.mrf.mxu1 }
 0x162   : > { %8751 = vst [vmem:[#allocation24_spill] sm:$0xff] %v7246_v14 }
 0x163   : > { %v1934_v25 = vpop.f32.mrf.mxu0  ;;  %v2318_v26 = vpop.f32.mrf.mxu1 }
 0x165   : > { %v7252_v29 = vpop.f32.mrf.mxu0  ;;  %2128 = vmatmul.mubr.bf16.gmra.mxu0 %v6148_v17  ;;  %v7254_v30 = vpop.f32.mrf.mxu1  ;;  %5796 = vmatmul.mubr.msk.bf16.gmra.mxu1 %vm1626_vm1, %v6152_v18  ;;  %v6158_v17 = vld [vmem:[%s6925_s24 + $0x360] ss:$12 sps:$4 sm:$0xff]  }
 0x166   : > { %8752 = vst [vmem:[#allocation25_spill] sm:$0xff] %v7254_v30  ;;  %2135 = vmatprep.mubr.bf16.mxu0 %v6155_v21  ;;  %5799 = vmatprep.mubr.msk.bf16.mxu1 %vm1626_vm1, %v6156_v22  ;;  %v6162_v18 = vld [vmem:[%s6925_s24 + $0x3e0] ss:$12 sps:$4 sm:$0xff]   ;;  %v6165_v21 = vld [vmem:[%s6925_s24 + $0x37c] ss:$12 sps:$4 sm:$0xff]  }
 0x167   : > { %v1939_v37 = vpop.f32.mrf.mxu0  ;;  %v2323_v38 = vpop.f32.mrf.mxu1  ;;  %v6166_v22 = vld [vmem:[%s6925_s24 + $0x3f8] ss:$12 sps:$4 sm:$0xff]   ;;  %v6178_v30 = vld [vmem:[%s6925_s24 + $0x3c0] ss:$12 sps:$4 sm:$0xff]  }
 0x169   : > { %v7258_v39 = vpop.f32.mrf.mxu0  ;;  %v7260_v40 = vpop.f32.mrf.mxu1 }
 0x16a   : > { %8753 = vst [vmem:[#allocation26_spill] sm:$0xff] %v7260_v40  ;;  %v6173_v40 = vld [vmem:[%s6925_s24 + $0x3a8] ss:$12 sps:$4 sm:$0xff]  }
 0x16b   : > { %v1942_v53 = vpop.f32.mrf.mxu0  ;;  %v2326_v54 = vpop.f32.mrf.mxu1 }
 0x16c   : > { %v6163_v53 = vld [vmem:[%s6925_s24 + $0x378] ss:$12 sps:$4 sm:$0xff]   ;;  %v6167_v54 = vld [vmem:[%s6925_s24 + $0x410] ss:$12 sps:$4 sm:$0xff]  }
 0x16d   : > { %v7266_v57 = vpop.f32.mrf.mxu0  ;;  %2136 = vmatmul.mubr.bf16.gmra.mxu0 %v6153_v41  ;;  %v7268_v58 = vpop.f32.mrf.mxu1  ;;  %5800 = vmatmul.mubr.msk.bf16.gmra.mxu1 %vm1626_vm1, %v6157_v42 }
 0x16e   : > { %8754 = vst [vmem:[#allocation27_spill] sm:$0xff] %v7268_v58  ;;  %2143 = vmatprep.mubr.bf16.mxu0 %v6160_v49  ;;  %5803 = vmatprep.mubr.msk.bf16.mxu1 %vm1626_vm1, %v6161_v50  ;;  %v6182_v58 = vld [vmem:[%s6925_s24 + $0x4a0] ss:$12 sps:$4 sm:$0xff]  }
 0x16f   : > { %v1947_v1 = vpop.f32.mrf.mxu0  ;;  %v2331_v2 = vpop.f32.mrf.mxu1 }
 0x170   : > { %v6170_v1 = vld [vmem:[%s6925_s24 + $0x394] ss:$12 sps:$4 sm:$0xff]  }
 0x171   : > { %v7272_v5 = vpop.f32.mrf.mxu0  ;;  %v7274_v6 = vpop.f32.mrf.mxu1  ;;  %v6171_v2 = vld [vmem:[%s6925_s24 + $0x428] ss:$12 sps:$4 sm:$0xff]  }
 0x172   : > { %8755 = vst [vmem:[#allocation28_spill] sm:$0xff] %v7274_v6 }
 0x173   : > { %v1950_v25 = vpop.f32.mrf.mxu0  ;;  %v2334_v26 = vpop.f32.mrf.mxu1 }
 0x175   : > { %v7280_v37 = vpop.f32.mrf.mxu0  ;;  %2144 = vmatmul.mubr.bf16.gmra.mxu0 %v6158_v17  ;;  %v7282_v38 = vpop.f32.mrf.mxu1  ;;  %5804 = vmatmul.mubr.msk.bf16.gmra.mxu1 %vm1626_vm1, %v6162_v18 }
 0x176   : > { %8756 = vst [vmem:[#allocation29_spill] sm:$0xff] %v7282_v38  ;;  %2151 = vmatprep.mubr.bf16.mxu0 %v6165_v21  ;;  %5807 = vmatprep.mubr.msk.bf16.mxu1 %vm1626_vm1, %v6166_v22 }
 0x177   : > { %v1955_v41 = vpop.f32.mrf.mxu0  ;;  %v2339_v42 = vpop.f32.mrf.mxu1 }
 0x179   : > { %v7286_v49 = vpop.f32.mrf.mxu0  ;;  %v7288_v50 = vpop.f32.mrf.mxu1 }
 0x17a   : > { %8757 = vst [vmem:[#allocation30_spill] sm:$0xff] %v7288_v50  ;;  %v6168_v50 = vld [vmem:[%s6925_s24 + $0x390] ss:$12 sps:$4 sm:$0xff]  }
 0x17b   : > { %v1958_v17 = vpop.f32.mrf.mxu0  ;;  %v2342_v25 = vpop.f32.mrf.mxu1 }
 0x17c   : > { %v6172_v17 = vld [vmem:[%s6925_s24 + $0x440] ss:$12 sps:$4 sm:$0xff]  }
 0x17d   : > { %v7294_v18 = vpop.f32.mrf.mxu0  ;;  %2152 = vmatmul.mubr.bf16.gmra.mxu0 %v6163_v53  ;;  %v7296_v21 = vpop.f32.mrf.mxu1  ;;  %5808 = vmatmul.mubr.msk.bf16.gmra.mxu1 %vm1626_vm1, %v6167_v54  ;;  %v6175_v25 = vld [vmem:[%s6925_s24 + $0x3ac] ss:$12 sps:$4 sm:$0xff]  }
 0x17e   : > { %8758 = vst [vmem:[#allocation31_spill] sm:$0xff] %v7296_v21  ;;  %2159 = vmatprep.mubr.bf16.mxu0 %v6170_v1  ;;  %5811 = vmatprep.mubr.msk.bf16.mxu1 %vm1626_vm1, %v6171_v2  ;;  %v6176_v53 = vld [vmem:[%s6925_s24 + $0x458] ss:$12 sps:$4 sm:$0xff]  }
 0x17f   : > { %v1963_v22 = vpop.f32.mrf.mxu0  ;;  %v2347_v26 = vpop.f32.mrf.mxu1 }
 0x181   : > { %v7300_v41 = vpop.f32.mrf.mxu0  ;;  %v7302_v42 = vpop.f32.mrf.mxu1 }
 0x182   : > { %8759 = vst [vmem:[#allocation32_spill] sm:$0xff] %v7302_v42 }
 0x183   : > { %v1966_v38 = vpop.f32.mrf.mxu0  ;;  %v2350_v21 = vpop.f32.mrf.mxu1 }
 0x184   : > { %v6177_v38 = vld [vmem:[%s6925_s24 + $0x470] ss:$12 sps:$4 sm:$0xff]  }
 0x185   : > { %v7308_v54 = vpop.f32.mrf.mxu0  ;;  %2160 = vmatmul.mubr.bf16.gmra.mxu0 %v6168_v50  ;;  %v7310_v1 = vpop.f32.mrf.mxu1  ;;  %5812 = vmatmul.mubr.msk.bf16.gmra.mxu1 %vm1626_vm1, %v6172_v17  ;;  %v6180_v21 = vld [vmem:[%s6925_s24 + $0x3c4] ss:$12 sps:$4 sm:$0xff]   ;;  %v6181_v50 = vld [vmem:[%s6925_s24 + $0x488] ss:$12 sps:$4 sm:$0xff]  }
 0x186   : > { %8760 = vst [vmem:[#allocation33_spill] sm:$0xff] %v7310_v1  ;;  %2167 = vmatprep.mubr.bf16.mxu0 %v6175_v25  ;;  %5815 = vmatprep.mubr.msk.bf16.mxu1 %vm1626_vm1, %v6176_v53 }
 0x187   : > { %v1971_v2 = vpop.f32.mrf.mxu0  ;;  %v2355_v22 = vpop.f32.mrf.mxu1 }
 0x189   : > { %v7314_v26 = vpop.f32.mrf.mxu0  ;;  %v7316_v42 = vpop.f32.mrf.mxu1 }
 0x18a   : > { %8761 = vst [vmem:[#allocation34_spill] sm:$0xff] %v7316_v42 }
 0x18b   : > { %v1974_v1 = vpop.f32.mrf.mxu0  ;;  %v2358_v6 = vpop.f32.mrf.mxu1 }
 0x18c   : > { %v6185_v1 = vld [vmem:[%s6925_s24 + $0x3dc] ss:$12 sps:$4 sm:$0xff]   ;;  %v6186_v6 = vld [vmem:[%s6925_s24 + $0x4b8] ss:$12 sps:$4 sm:$0xff]  }
 0x18d   : > { %v7322_v17 = vpop.f32.mrf.mxu0  ;;  %2168 = vmatmul.mubr.bf16.gmra.mxu0 %v6173_v40  ;;  %v7324_v25 = vpop.f32.mrf.mxu1  ;;  %5816 = vmatmul.mubr.msk.bf16.gmra.mxu1 %vm1626_vm1, %v6177_v38 }
 0x18e   : > { %8762 = vst [vmem:[#allocation35_spill] sm:$0xff] %v7324_v25  ;;  %2175 = vmatprep.mubr.bf16.mxu0 %v6180_v21  ;;  %5819 = vmatprep.mubr.msk.bf16.mxu1 %vm1626_vm1, %v6181_v50  ;;  %v7341_v21 = vld [vmem:[%s8727_s2] ss:$0 sm:$0xff]  ;;  %v6183_v25 = vld [vmem:[%s6925_s24 + $0x3d8] ss:$12 sps:$4 sm:$0xff]  }
 0x18f   : > { %v1979_v53 = vpop.f32.mrf.mxu0  ;;  %v2363_v2 = vpop.f32.mrf.mxu1 }
 0x191   : > { %v7328_v22 = vpop.f32.mrf.mxu0  ;;  %v7330_v42 = vpop.f32.mrf.mxu1 }
 0x192   : > { %8763 = vst [vmem:[#allocation36_spill] sm:$0xff] %v7330_v42 }
 0x193   : > { %v1982_v52 = vpop.f32.mrf.mxu0  ;;  %v2366_v14 = vpop.f32.mrf.mxu1 }
 0x194   : > { %v7349_v52 = vld [vmem:[%s8728_s3] ss:$0 sm:$0xff] }
 0x195   : > { %v7336_v40 = vpop.f32.mrf.mxu0  ;;  %2176 = vmatmul.mubr.bf16.gmra.mxu0 %v6178_v30  ;;  %v5725_v38 = vpop.f32.mrf.mxu1  ;;  %5820 = vmatmul.mubr.msk.bf16.gmra.mxu1 %vm1626_vm1, %v6182_v58 }
 0x196   : > { %v2411_v50 = vadd.f32 %v5725_v38, %v7126_v7  ;;  %2183 = vmatprep.mubr.bf16.mxu0 %v6185_v1  ;;  %5823 = vmatprep.mubr.msk.bf16.mxu1 %vm1626_vm1, %v6186_v6  ;;  %v6187_v7 = vld [vmem:[%s6925_s24 + $0x4d0] ss:$12 sps:$4 sm:$0xff]  }
 0x197   : > { %v1987_v14 = vpop.f32.mrf.mxu0  ;;  %v2402_v30 = vpop.f32.mrf.mxu1 }
 0x198   : > { %v2922_v53 = vmul.f32 %v7341_v21, %v2411_v50  ;;  %v2403_v2 = vadd.f32 %v2402_v30, %v7112_v59 }
 0x199   : > { %v7353_v42 = vpop.f32.mrf.mxu0  ;;  %v5726_v58 = vpop.f32.mrf.mxu1 }
 0x19a   : > { %v7358_v1 = vadd.f32 %v7349_v52, %v2922_v53  ;;  %v2920_v6 = vmul.f32 %v7341_v21, %v2403_v2  ;;  %v2414_v38 = vadd.f32 %v5726_v58, %v7132_v11 }
 0x19b   : > { %v1990_v14 = vpop.f32.mrf.mxu0  ;;  %v2405_v16 = vpop.f32.mrf.mxu1 }
 0x19c   : > { %v3185_v50 = vsub.f32 0.0, %v7358_v1  ;;  %v7366_v59 = vadd.f32 %v7349_v52, %v2920_v6  ;;  %v2923_v30 = vmul.f32 %v7341_v21, %v2414_v38  ;;  %v2406_v34 = vadd.f32 %v2405_v16, %v7118_v63 }
 0x19d   : > { %v7370_v10 = vpop.f32.mrf.mxu0  ;;  %2184 = vmatmul.mubr.bf16.gmra.mxu0 %v6183_v25  ;;  %v5729_v53 = vpop.f32.mrf.mxu1  ;;  %5824 = vmatmul.mubr.msk.bf16.gmra.mxu1 %vm1626_vm1, %v6187_v7 }
 0x19e   : > { %v3315_v11 = vmul.f32 1.442695, %v3185_v50  ;;  %v3183_v2 = vsub.f32 0.0, %v7366_v59  ;;  %v7375_v58 = vadd.f32 %v7349_v52, %v2923_v30  ;;  %v2921_v6 = vmul.f32 %v7341_v21, %v2406_v34  ;;  %2191 = vmatprep.mubr.bf16.mxu0 %v6190_v46  ;;  %5827 = vmatprep.mubr.msk.bf16.mxu1 %vm1626_vm1, %v6191_v4  ;;  %v6188_v4 = vld [vmem:[%s6925_s24 + $0x3f0] ss:$12 sps:$4 sm:$0xff]  }
 0x19f   : > { %v2427_v63 = vadd.f32 %v5729_v53, %v7154_v31  ;;  %v1995_v16 = vpop.f32.mrf.mxu0  ;;  %v2418_v25 = vpop.f32.mrf.mxu1  ;;  %v6195_v31 = vld [vmem:[%s6925_s24 + $0x40c] ss:$12 sps:$4 sm:$0xff]  }
 0x1a0   : > { %6218 = vpow2.f32 %v3315_v11  ;;  %v3311_v7 = vmul.f32 1.442695, %v3183_v2  ;;  %v3186_v38 = vsub.f32 0.0, %v7375_v58  ;;  %v7382_v14 = vadd.f32 %v7349_v52, %v2921_v6  ;;  %v6196_v16 = vld [vmem:[%s6925_s24 + $0x518] ss:$12 sps:$4 sm:$0xff]  }
 0x1a1   : > { %v2926_v50 = vmul.f32 %v7341_v21, %v2427_v63  ;;  %v2419_v34 = vadd.f32 %v2418_v25, %v7140_v19  ;;  %v7386_v30 = vpop.f32.mrf.mxu0  ;;  %v5730_v46 = vpop.f32.mrf.mxu1 }
 0x1a2   : > { %6220 = vpow2.f32 %v3311_v7  ;;  %v3317_v53 = vmul.f32 1.442695, %v3186_v38  ;;  %v3184_v11 = vsub.f32 0.0, %v7382_v14  ;;  %v2430_v2 = vadd.f32 %v5730_v46, %v7160_v35 }
 0x1a3   : > { %v7395_v6 = vadd.f32 %v7349_v52, %v2926_v50  ;;  %v2924_v63 = vmul.f32 %v7341_v21, %v2419_v34  ;;  %v1998_v48 = vpop.f32.mrf.mxu0  ;;  %v2421_v19 = vpop.f32.mrf.mxu1 }
 0x1a4   : > { %6222 = vpow2.f32 %v3317_v53  ;;  %v3313_v25 = vmul.f32 1.442695, %v3184_v11  ;;  %v2927_v62 = vmul.f32 %v7341_v21, %v2430_v2  ;;  %v2422_v44 = vadd.f32 %v2421_v19, %v7146_v23  ;;  %v6193_v2 = vld [vmem:[%s6925_s24 + $0x408] ss:$12 sps:$4 sm:$0xff]   ;;  %v6197_v19 = vld [vmem:[%s6925_s24 + $0x530] ss:$12 sps:$4 sm:$0xff]  }
 0x1a5   : > { %v3189_v7 = vsub.f32 0.0, %v7395_v6  ;;  %v7402_v38 = vadd.f32 %v7349_v52, %v2924_v63  ;;  %v7404_v35 = vpop.f32.mrf.mxu0  ;;  %2192 = vmatmul.mubr.bf16.gmra.mxu0 %v6188_v4  ;;  %v5733_v50 = vpop.f32.mrf.mxu1  ;;  %5828 = vmatmul.mubr.msk.bf16.gmra.mxu1 %vm1626_vm1, %v6192_v28 }
 0x1a6   : > { %6224 = vpow2.f32 %v3313_v25  ;;  %v7408_v48 = vadd.f32 %v7349_v52, %v2927_v62  ;;  %v2925_v34 = vmul.f32 %v7341_v21, %v2422_v44  ;;  %v2443_v23 = vadd.f32 %v5733_v50, %v7182_v55  ;;  %2199 = vmatprep.mubr.bf16.mxu0 %v6195_v31  ;;  %5831 = vmatprep.mubr.msk.bf16.mxu1 %vm1626_vm1, %v6196_v16  ;;  %v6200_v25 = vld [vmem:[%s6925_s24 + $0x424] ss:$12 sps:$4 sm:$0xff]  }
 0x1a7   : > { %v3323_v46 = vmul.f32 1.442695, %v3189_v7  ;;  %v3187_v4 = vsub.f32 0.0, %v7402_v38  ;;  %v2003_v53 = vpop.f32.mrf.mxu0  ;;  %v2434_v11 = vpop.f32.mrf.mxu1 }
 0x1a8   : > { %v3190_v28 = vsub.f32 0.0, %v7408_v48  ;;  %v7416_v62 = vadd.f32 %v7349_v52, %v2925_v34  ;;  %v2930_v44 = vmul.f32 %v7341_v21, %v2443_v23  ;;  %v2435_v55 = vadd.f32 %v2434_v11, %v7168_v43 }
 0x1a9   : > { %6226 = vpow2.f32 %v3323_v46  ;;  %v3319_v31 = vmul.f32 1.442695, %v3187_v4  ;;  %v7421_v63 = vpop.f32.mrf.mxu0  ;;  %v5734_v16 = vpop.f32.mrf.mxu1 }
 0x1aa   : > { %8764 = vst [vmem:[#allocation37_spill] sm:$0xff] %v7421_v63  ;;  %v3325_v7 = vmul.f32 1.442695, %v3190_v28  ;;  %v3188_v50 = vsub.f32 0.0, %v7416_v62  ;;  %v7427_v53 = vadd.f32 %v7349_v52, %v2930_v44  ;;  %v2928_v34 = vmul.f32 %v7341_v21, %v2435_v55 }
 0x1ab   : > { %6228 = vpow2.f32 %v3319_v31  ;;  %v2446_v43 = vadd.f32 %v5734_v16, %v7188_v61  ;;  %v2006_v23 = vpop.f32.mrf.mxu0  ;;  %v2437_v46 = vpop.f32.mrf.mxu1 }
 0x1ac   : > { %6230 = vpow2.f32 %v3325_v7  ;;  %v3321_v4 = vmul.f32 1.442695, %v3188_v50  ;;  %v3193_v11 = vsub.f32 0.0, %v7427_v53  ;;  %v7434_v24 = vadd.f32 %v7349_v52, %v2928_v34 }
 0x1ad   : > { %v6219_v28 = vpop.eup %6218  ;;  %v2931_v36 = vmul.f32 %v7341_v21, %v2446_v43  ;;  %v2438_v44 = vadd.f32 %v2437_v46, %v7174_v47  ;;  %v7438_v20 = vpop.f32.mrf.mxu0  ;;  %2200 = vmatmul.mubr.bf16.gmra.mxu0 %v6193_v2  ;;  %5832 = vmatmul.mubr.msk.bf16.gmra.mxu1 %vm1626_vm1, %v6197_v19 }
 0x1ae   : > { %v5737_v55 = vpop.f32.mrf.mxu1  ;;  %v3569_v61 = vadd.f32 1.0, %v6219_v28  ;;  %6232 = vpow2.f32 %v3321_v4  ;;  %v3331_v31 = vmul.f32 1.442695, %v3193_v11  ;;  %v3191_v16 = vsub.f32 0.0, %v7434_v24  ;;  %2207 = vmatprep.mubr.bf16.mxu0 %v6200_v25  ;;  %5835 = vmatprep.mubr.msk.bf16.mxu1 %vm1626_vm1, %v6201_v56  ;;  %v6198_v28 = vld [vmem:[%s6925_s24 + $0x420] ss:$12 sps:$4 sm:$0xff]  }
 0x1af   : > { %v6221_v7 = vpop.eup %6220  ;;  %v7444_v50 = vadd.f32 %v7349_v52, %v2931_v36  ;;  %v2929_v47 = vmul.f32 %v7341_v21, %v2438_v44  ;;  %v2459_v2 = vadd.f32 %v5737_v55, %v7210_v27  ;;  %v2011_v34 = vpop.f32.mrf.mxu0  ;;  %v6202_v44 = vld [vmem:[%s6925_s24 + $0x560] ss:$12 sps:$4 sm:$0xff]  }
 0x1b0   : > { %v2450_v19 = vpop.f32.mrf.mxu1  ;;  %6234 = vrcp.f32 %v3569_v61  ;;  %v3567_v43 = vadd.f32 1.0, %v6221_v7  ;;  %v3327_v23 = vmul.f32 1.442695, %v3191_v16  ;;  %v6205_v16 = vld [vmem:[%s6925_s24 + $0x43c] ss:$12 sps:$4 sm:$0xff]  }
 0x1b1   : > { %v2451_v25 = vadd.f32 %v2450_v19, %v7196_v9  ;;  %v6223_v56 = vpop.eup %6222  ;;  %6236 = vpow2.f32 %v3331_v31  ;;  %v3194_v36 = vsub.f32 0.0, %v7444_v50  ;;  %v7451_v46 = vadd.f32 %v7349_v52, %v2929_v47  ;;  %v7454_v11 = vpop.f32.mrf.mxu0  ;;  %v6206_v31 = vld [vmem:[%s6925_s24 + $0x578] ss:$12 sps:$4 sm:$0xff]  }
 0x1b2   : > { %v2934_v4 = vmul.f32 %v7341_v21, %v2459_v2  ;;  %v5738_v27 = vpop.f32.mrf.mxu1  ;;  %6238 = vrcp.f32 %v3567_v43  ;;  %v3570_v55 = vadd.f32 1.0, %v6223_v56 }
 0x1b3   : > { %v2932_v61 = vmul.f32 %v7341_v21, %v2451_v25  ;;  %v2462_v9 = vadd.f32 %v5738_v27, %v7216_v33  ;;  %v6225_v7 = vpop.eup %6224  ;;  %6240 = vpow2.f32 %v3327_v23  ;;  %v3333_v34 = vmul.f32 1.442695, %v3194_v36  ;;  %v2014_v19 = vpop.f32.mrf.mxu0 }
 0x1b4   : > { %v3192_v47 = vsub.f32 0.0, %v7451_v46  ;;  %v7464_v2 = vadd.f32 %v7349_v52, %v2934_v4  ;;  %v2453_v32 = vpop.f32.mrf.mxu1  ;;  %6242 = vrcp.f32 %v3570_v55  ;;  %v3568_v0 = vadd.f32 1.0, %v6225_v7 }
 0x1b5   : > { %v7467_v43 = vadd.f32 %v7349_v52, %v2932_v61  ;;  %v2935_v25 = vmul.f32 %v7341_v21, %v2462_v9  ;;  %6244 = vpow2.f32 %v3333_v34  ;;  %v2454_v23 = vadd.f32 %v2453_v32, %v7202_v15  ;;  %v7472_v36 = vpop.f32.mrf.mxu0  ;;  %2208 = vmatmul.mubr.bf16.gmra.mxu0 %v6198_v28  ;;  %5836 = vmatmul.mubr.msk.bf16.gmra.mxu1 %vm1626_vm1, %v6202_v44 }
 0x1b6   : > { %v3329_v33 = vmul.f32 1.442695, %v3192_v47  ;;  %v3197_v56 = vsub.f32 0.0, %v7464_v2  ;;  %8765 = vst [vmem:[#allocation38_spill] sm:$0xff] %v7472_v36  ;;  %v5741_v4 = vpop.f32.mrf.mxu1  ;;  %v6227_v27 = vpop.eup %6226  ;;  %6246 = vrcp.f32 %v3568_v0  ;;  %2215 = vmatprep.mubr.bf16.mxu0 %v6205_v16  ;;  %5839 = vmatprep.mubr.msk.bf16.mxu1 %vm1626_vm1, %v6206_v31  ;;  %v6207_v16 = vld [vmem:[%s6925_s24 + $0x590] ss:$12 sps:$4 sm:$0xff]  }
 0x1b7   : > { %v3195_v55 = vsub.f32 0.0, %v7467_v43  ;;  %v7477_v61 = vadd.f32 %v7349_v52, %v2935_v25  ;;  %v2475_v9 = vadd.f32 %v5741_v4, %v7238_v3  ;;  %v3573_v32 = vadd.f32 1.0, %v6227_v27  ;;  %v2019_v44 = vpop.f32.mrf.mxu0  ;;  %v6203_v3 = vld [vmem:[%s6925_s24 + $0x438] ss:$12 sps:$4 sm:$0xff]   ;;  %v6210_v27 = vld [vmem:[%s6925_s24 + $0x454] ss:$12 sps:$4 sm:$0xff]  }
 0x1b8   : > { %6248 = vpow2.f32 %v3329_v33  ;;  %v3339_v15 = vmul.f32 1.442695, %v3197_v56  ;;  %v2933_v28 = vmul.f32 %v7341_v21, %v2454_v23  ;;  %v2466_v0 = vpop.f32.mrf.mxu1  ;;  %v6229_v7 = vpop.eup %6228 }
 0x1b9   : > { %v3198_v34 = vsub.f32 0.0, %v7477_v61  ;;  %v2938_v47 = vmul.f32 %v7341_v21, %v2475_v9  ;;  %v2467_v19 = vadd.f32 %v2466_v0, %v7224_v45  ;;  %v6231_v25 = vpop.eup %6230  ;;  %6250 = vrcp.f32 %v3573_v32  ;;  %v7490_v23 = vpop.f32.mrf.mxu0  ;;  %v6211_v45 = vld [vmem:[%s6925_s24 + $0x5a8] ss:$12 sps:$4 sm:$0xff]  }
 0x1ba   : > { %v3571_v31 = vadd.f32 1.0, %v6229_v7  ;;  %v3335_v33 = vmul.f32 1.442695, %v3195_v55  ;;  %v7488_v56 = vadd.f32 %v7349_v52, %v2933_v28  ;;  %8766 = vst [vmem:[#allocation39_spill] sm:$0xff] %v7490_v23  ;;  %v5742_v4 = vpop.f32.mrf.mxu1  ;;  %v3574_v44 = vadd.f32 1.0, %v6231_v25 }
 0x1bb   : > { %6252 = vpow2.f32 %v3339_v15  ;;  %v3341_v9 = vmul.f32 1.442695, %v3198_v34  ;;  %v7494_v12 = vadd.f32 %v7349_v52, %v2938_v47  ;;  %v6233_v0 = vpop.eup %6232  ;;  %v2936_v55 = vmul.f32 %v7341_v21, %v2467_v19  ;;  %v2022_v7 = vpop.f32.mrf.mxu0 }
 0x1bc   : > { %6254 = vrcp.f32 %v3571_v31  ;;  %v3196_v32 = vsub.f32 0.0, %v7488_v56  ;;  %v2478_v28 = vadd.f32 %v5742_v4, %v7244_v13  ;;  %v2469_v60 = vpop.f32.mrf.mxu1  ;;  %v3572_v8 = vadd.f32 1.0, %v6233_v0 }
 0x1bd   : > { %6256 = vrcp.f32 %v3574_v44  ;;  %v3201_v15 = vsub.f32 0.0, %v7494_v12  ;;  %v2470_v34 = vadd.f32 %v2469_v60, %v7230_v51  ;;  %v6235_v25 = vpop.eup %6234  ;;  %v7504_v31 = vadd.f32 %v7349_v52, %v2936_v55  ;;  %v7507_v19 = vpop.f32.mrf.mxu0  ;;  %2216 = vmatmul.mubr.bf16.gmra.mxu0 %v6203_v3  ;;  %5840 = vmatmul.mubr.msk.bf16.gmra.mxu1 %vm1626_vm1, %v6207_v16 }
 0x1be   : > { %6258 = vpow2.f32 %v3335_v33  ;;  %v3337_v47 = vmul.f32 1.442695, %v3196_v32  ;;  %v2939_v23 = vmul.f32 %v7341_v21, %v2478_v28  ;;  %8767 = vst [vmem:[#allocation40_spill] sm:$0xff] %v7507_v19  ;;  %v5745_v13 = vpop.f32.mrf.mxu1  ;;  %v6237_v4 = vpop.eup %6236  ;;  %v3825_v44 = vmul.f32 %v6235_v25, %v7358_v1  ;;  %2223 = vmatprep.mubr.bf16.mxu0 %v6210_v27  ;;  %5843 = vmatprep.mubr.msk.bf16.mxu1 %vm1626_vm1, %v6211_v45  ;;  %v6208_v45 = vld [vmem:[%s6925_s24 + $0x450] ss:$12 sps:$4 sm:$0xff]  }
 0x1bf   : > { %6260 = vrcp.f32 %v3572_v8  ;;  %v3347_v60 = vmul.f32 1.442695, %v3201_v15  ;;  %v2937_v51 = vmul.f32 %v7341_v21, %v2470_v34  ;;  %v6239_v33 = vpop.eup %6238  ;;  %v3577_v0 = vadd.f32 1.0, %v6237_v4  ;;  %v2027_v16 = vpop.f32.mrf.mxu0  ;;  %v6212_v25 = vld [vmem:[%s6925_s24 + $0x5c0] ss:$12 sps:$4 sm:$0xff]  }
 0x1c0   : > { %6262 = vpow2.f32 %v3341_v9  ;;  %v3199_v3 = vsub.f32 0.0, %v7504_v31  ;;  %v7515_v32 = vadd.f32 %v7349_v52, %v2939_v23  ;;  %v2482_v55 = vpop.f32.mrf.mxu1  ;;  %v6241_v1 = vpop.eup %6240  ;;  %v3823_v8 = vmul.f32 %v6239_v33, %v7366_v59  ;;  %v6216_v33 = vld [vmem:[%s6925_s24 + $0x5d8] ss:$12 sps:$4 sm:$0xff]  }
 0x1c1   : > { %6264 = vpow2.f32 %v3337_v47  ;;  %v7523_v27 = vadd.f32 %v7349_v52, %v2937_v51  ;;  %v2491_v9 = vadd.f32 %v5745_v13, %v7266_v57  ;;  %v6243_v23 = vpop.eup %6242  ;;  %v3575_v28 = vadd.f32 1.0, %v6241_v1  ;;  %v7528_v34 = vpop.f32.mrf.mxu0  ;;  %v6215_v13 = vld [vmem:[%s6925_s24 + $0x46c] ss:$12 sps:$4 sm:$0xff]  }
 0x1c2   : > { %6266 = vrcp.f32 %v3577_v0  ;;  %v3343_v7 = vmul.f32 1.442695, %v3199_v3  ;;  %v3202_v15 = vsub.f32 0.0, %v7515_v32  ;;  %8768 = vst [vmem:[#allocation41_spill] sm:$0xff] %v7528_v34  ;;  %v5746_v59 = vpop.f32.mrf.mxu1  ;;  %v6245_v4 = vpop.eup %6244  ;;  %v3826_v47 = vmul.f32 %v6243_v23, %v7375_v58 }
 0x1c3   : > { %6268 = vpow2.f32 %v3347_v60  ;;  %v3200_v51 = vsub.f32 0.0, %v7523_v27  ;;  %v2942_v57 = vmul.f32 %v7341_v21, %v2491_v9  ;;  %v6247_v16 = vpop.eup %6246  ;;  %v3578_v0 = vadd.f32 1.0, %v6245_v4  ;;  %v2030_v36 = vpop.f32.mrf.mxu0 }
 0x1c4   : > { %6270 = vrcp.f32 %v3575_v28  ;;  %v3349_v3 = vmul.f32 1.442695, %v3202_v15  ;;  %v2483_v1 = vadd.f32 %v2482_v55, %v7252_v29  ;;  %v2485_v34 = vpop.f32.mrf.mxu1  ;;  %v5275_v63 = vpack.c.bf16 %v3826_v47, %v3825_v44 }
 0x1c5   : > { %v6249_v19 = vpop.eup %6248  ;;  %v3824_v58 = vmul.f32 %v6247_v16, %v7382_v14  ;;  %6272 = vpow2.f32 %v3343_v7  ;;  %v3345_v60 = vmul.f32 1.442695, %v3200_v51  ;;  %v7539_v9 = vadd.f32 %v7349_v52, %v2942_v57  ;;  %v7542_v4 = vpop.f32.mrf.mxu0  ;;  %2224 = vmatmul.mubr.bf16.gmra.mxu0 %v6208_v45  ;;  %5844 = vmatmul.mubr.msk.bf16.gmra.mxu1 %vm1626_vm1, %v6212_v25 }
 0x1c6   : > { %6274 = vrcp.f32 %v3578_v0  ;;  %v3576_v23 = vadd.f32 1.0, %v6249_v19  ;;  %v2940_v28 = vmul.f32 %v7341_v21, %v2483_v1  ;;  %v5749_v29 = vpop.f32.mrf.mxu1  ;;  %v6251_v36 = vpop.eup %6250  ;;  %5587 = vst [vmem:[%s7546_s6 + $0x8] sm:$0xff] %v5275_v63   ;;  %v2494_v19 = vadd.f32 %v5746_v59, %v7272_v5  ;;  %2231 = vmatprep.mubr.bf16.mxu0 %v6215_v13  ;;  %5847 = vmatprep.mubr.msk.bf16.mxu1 %vm1626_vm1, %v6216_v33  ;;  %v6213_v59 = vld [vmem:[%s6925_s24 + $0x468] ss:$12 sps:$4 sm:$0xff]   ;;  %v6217_v0 = vld [vmem:[%s6925_s24 + $0x5f0] ss:$12 sps:$4 sm:$0xff]  }
 0x1c7   : > { %v5270_v14 = vpack.c.bf16 %v3824_v58, %v3823_v8  ;;  %6276 = vpow2.f32 %v3349_v3  ;;  %v2486_v44 = vadd.f32 %v2485_v34, %v7258_v39  ;;  %v3829_v45 = vmul.f32 %v6251_v36, %v7395_v6  ;;  %v2035_v63 = vpop.f32.mrf.mxu0 }
 0x1c8   : > { %v6253_v55 = vpop.eup %6252  ;;  %6278 = vrcp.f32 %v3576_v23  ;;  %v3205_v7 = vsub.f32 0.0, %v7539_v9  ;;  %v7555_v15 = vadd.f32 %v7349_v52, %v2940_v28  ;;  %v2498_v8 = vpop.f32.mrf.mxu1  ;;  %v2943_v39 = vmul.f32 %v7341_v21, %v2494_v19 }
 0x1c9   : > { %v6255_v25 = vpop.eup %6254  ;;  %5271 = vst [vmem:[%s7546_s6] sm:$0xff] %v5270_v14   ;;  %v3581_v5 = vadd.f32 1.0, %v6253_v55  ;;  %6280 = vpow2.f32 %v3345_v60  ;;  %v2941_v34 = vmul.f32 %v7341_v21, %v2486_v44  ;;  %v2507_v13 = vadd.f32 %v5749_v29, %v7294_v18  ;;  %v7564_v33 = vpop.f32.mrf.mxu0 }
 0x1ca   : > { %v6257_v47 = vpop.eup %6256  ;;  %v3827_v6 = vmul.f32 %v6255_v25, %v7402_v38  ;;  %v3355_v51 = vmul.f32 1.442695, %v3205_v7  ;;  %v3203_v57 = vsub.f32 0.0, %v7555_v15  ;;  %v5750_v16 = vpop.f32.mrf.mxu1  ;;  %v7569_v58 = vadd.f32 %v7349_v52, %v2943_v39 }
 0x1cb   : > { %v6259_v3 = vpop.eup %6258  ;;  %v3830_v1 = vmul.f32 %v6257_v47, %v7408_v48  ;;  %6282 = vrcp.f32 %v3581_v5  ;;  %v7572_v60 = vadd.f32 %v7349_v52, %v2941_v34  ;;  %v2946_v18 = vmul.f32 %v7341_v21, %v2507_v13  ;;  %v2038_v29 = vpop.f32.mrf.mxu0 }
 0x1cc   : > { %v6261_v38 = vpop.eup %6260  ;;  %v3579_v23 = vadd.f32 1.0, %v6259_v3  ;;  %6284 = vpow2.f32 %v3355_v51  ;;  %v3351_v28 = vmul.f32 1.442695, %v3203_v57  ;;  %v2501_v36 = vpop.f32.mrf.mxu1  ;;  %v3206_v44 = vsub.f32 0.0, %v7569_v58 }
 0x1cd   : > { %v6263_v14 = vpop.eup %6262  ;;  %v5285_v19 = vpack.c.bf16 %v3830_v1, %v3829_v45  ;;  %v3828_v48 = vmul.f32 %v6261_v38, %v7416_v62  ;;  %v3204_v55 = vsub.f32 0.0, %v7572_v60  ;;  %v7579_v25 = vadd.f32 %v7349_v52, %v2946_v18  ;;  %v7582_v39 = vpop.f32.mrf.mxu0  ;;  %2232 = vmatmul.mubr.bf16.gmra.mxu0 %v6213_v59  ;;  %5848 = vmatmul.mubr.msk.bf16.gmra.mxu1 %vm1626_vm1, %v6217_v0 }
 0x1ce   : > { %v6265_v7 = vpop.eup %6264  ;;  %6286 = vrcp.f32 %v3579_v23  ;;  %v3582_v63 = vadd.f32 1.0, %v6263_v14  ;;  %v2499_v5 = vadd.f32 %v2498_v8, %v7280_v37  ;;  %v5753_v34 = vpop.f32.mrf.mxu1  ;;  %v3357_v51 = vmul.f32 1.442695, %v3206_v44 }
 0x1cf   : > { %v6267_v62 = vpop.eup %6266  ;;  %5589 = vst [vmem:[%s7546_s6 + $0x18] sm:$0xff] %v5285_v19   ;;  %v5280_v45 = vpack.c.bf16 %v3828_v48, %v3827_v6  ;;  %v3580_v47 = vadd.f32 1.0, %v6265_v7  ;;  %6288 = vpow2.f32 %v3351_v28  ;;  %v3353_v3 = vmul.f32 1.442695, %v3204_v55  ;;  %v2043_v8 = vpop.f32.mrf.mxu0 }
 0x1d0   : > { %v6269_v57 = vpop.eup %6268  ;;  %v3833_v13 = vmul.f32 %v6267_v62, %v7427_v53  ;;  %6290 = vrcp.f32 %v3582_v63  ;;  %v3209_v37 = vsub.f32 0.0, %v7579_v25  ;;  %v2514_v1 = vpop.f32.mrf.mxu1  ;;  %v2944_v0 = vmul.f32 %v7341_v21, %v2499_v5 }
 0x1d1   : > { %v6271_v59 = vpop.eup %6270  ;;  %5588 = vst [vmem:[%s7546_s6 + $0x10] sm:$0xff] %v5280_v45   ;;  %6292 = vrcp.f32 %v3580_v47  ;;  %v3585_v38 = vadd.f32 1.0, %v6269_v57  ;;  %v2510_v6 = vadd.f32 %v5750_v16, %v7300_v41  ;;  %v2502_v53 = vadd.f32 %v2501_v36, %v7286_v49  ;;  %v7593_v29 = vpop.f32.mrf.mxu0 }
 0x1d2   : > { %v6273_v23 = vpop.eup %6272  ;;  %v3831_v28 = vmul.f32 %v6271_v59, %v7434_v24  ;;  %6294 = vpow2.f32 %v3357_v51  ;;  %v3363_v18 = vmul.f32 1.442695, %v3209_v37  ;;  %v5754_v14 = vpop.f32.mrf.mxu1  ;;  %v7596_v44 = vadd.f32 %v7349_v52, %v2944_v0 }
 0x1d3   : > { %v6275_v19 = vpop.eup %6274  ;;  %6296 = vrcp.f32 %v3585_v38  ;;  %v3583_v48 = vadd.f32 1.0, %v6273_v23  ;;  %v2947_v55 = vmul.f32 %v7341_v21, %v2510_v6  ;;  %v2945_v24 = vmul.f32 %v7341_v21, %v2502_v53  ;;  %v2046_v49 = vpop.f32.mrf.mxu0 }
 0x1d4   : > { %v6277_v7 = vpop.eup %6276  ;;  %v3834_v41 = vmul.f32 %v6275_v19, %v7444_v50  ;;  %6298 = vpow2.f32 %v3353_v3  ;;  %v2523_v16 = vadd.f32 %v5753_v34, %v7322_v17  ;;  %v2517_v36 = vpop.f32.mrf.mxu1  ;;  %v3207_v62 = vsub.f32 0.0, %v7596_v44 }
 0x1d5   : > { %v6279_v63 = vpop.eup %6278  ;;  %6300 = vrcp.f32 %v3583_v48  ;;  %v3586_v5 = vadd.f32 1.0, %v6277_v7  ;;  %v7604_v45 = vadd.f32 %v7349_v52, %v2947_v55  ;;  %v7608_v57 = vadd.f32 %v7349_v52, %v2945_v24  ;;  %v7610_v17 = vpop.f32.mrf.mxu0 }
 0x1d6   : > { %v6281_v47 = vpop.eup %6280  ;;  %v5295_v51 = vpack.c.bf16 %v3834_v41, %v3833_v13  ;;  %v3832_v50 = vmul.f32 %v6279_v63, %v7451_v46  ;;  %6302 = vpow2.f32 %v3363_v18  ;;  %v5757_v34 = vpop.f32.mrf.mxu1  ;;  %v3359_v37 = vmul.f32 1.442695, %v3207_v62 }
 0x1d7   : > { %6304 = vrcp.f32 %v3586_v5  ;;  %v3584_v3 = vadd.f32 1.0, %v6281_v47  ;;  %v3210_v8 = vsub.f32 0.0, %v7604_v45  ;;  %v3208_v13 = vsub.f32 0.0, %v7608_v57  ;;  %v2051_v6 = vpop.f32.mrf.mxu0 }
 0x1d8   : > { %v6283_v59 = vpop.eup %6282  ;;  %5591 = vst [vmem:[%s7546_s6 + $0x28] sm:$0xff] %v5295_v51   ;;  %v5290_v38 = vpack.c.bf16 %v3832_v50, %v3831_v28  ;;  %v2950_v46 = vmul.f32 %v7341_v21, %v2523_v16  ;;  %v2515_v0 = vadd.f32 %v2514_v1, %v7308_v54  ;;  %v7617_v23 = vpop.f32.mrf.mxu1  ;;  %v2526_v48 = vadd.f32 %v5754_v14, %v7328_v22 }
 0x1d9   : > { %v6285_v18 = vpop.eup %6284  ;;  %v3837_v53 = vmul.f32 %v6283_v59, %v7464_v2  ;;  %6306 = vrcp.f32 %v3584_v3  ;;  %v3365_v19 = vmul.f32 1.442695, %v3210_v8  ;;  %v3361_v28 = vmul.f32 1.442695, %v3208_v13  ;;  %v7625_v41 = vpop.f32.mrf.mxu0 }
 0x1da   : > { %5590 = vst [vmem:[%s7546_s6 + $0x20] sm:$0xff] %v5290_v38   ;;  %v3589_v55 = vadd.f32 1.0, %v6285_v18  ;;  %6308 = vpow2.f32 %v3359_v37  ;;  %v7623_v7 = vadd.f32 %v7349_v52, %v2950_v46  ;;  %v5758_v54 = vpop.f32.mrf.mxu1  ;;  %v2948_v24 = vmul.f32 %v7341_v21, %v2515_v0 }
 0x1db   : > { %v6287_v1 = vpop.eup %6286  ;;  %6310 = vpow2.f32 %v3365_v19  ;;  %v2951_v2 = vmul.f32 %v7341_v21, %v2526_v48  ;;  %v2518_v16 = vadd.f32 %v2517_v36, %v7314_v26  ;;  %v2539_v63 = vadd.f32 %v5757_v34, %v7370_v10  ;;  %v2054_v5 = vpop.f32.mrf.mxu0 }
 0x1dc   : > { %v6289_v49 = vpop.eup %6288  ;;  %v3835_v22 = vmul.f32 %v6287_v1, %v7467_v43  ;;  %6312 = vrcp.f32 %v3589_v55  ;;  %v3213_v14 = vsub.f32 0.0, %v7623_v7  ;;  %v2533_v62 = vpop.f32.mrf.mxu1  ;;  %v7634_v50 = vadd.f32 %v7349_v52, %v2948_v24 }
 0x1dd   : > { %v6291_v47 = vpop.eup %6290  ;;  %v3587_v51 = vadd.f32 1.0, %v6289_v49  ;;  %6314 = vpow2.f32 %v3361_v28  ;;  %v7637_v3 = vadd.f32 %v7349_v52, %v2951_v2  ;;  %v2949_v37 = vmul.f32 %v7341_v21, %v2518_v16  ;;  %v7642_v10 = vpop.f32.mrf.mxu0 }
 0x1de   : > { %v6293_v26 = vpop.eup %6292  ;;  %v3838_v36 = vmul.f32 %v6291_v47, %v7477_v61  ;;  %v3371_v43 = vmul.f32 1.442695, %v3213_v14  ;;  %v2954_v8 = vmul.f32 %v7341_v21, %v2539_v63  ;;  %v5761_v34 = vpop.f32.mrf.mxu1  ;;  %v3211_v13 = vsub.f32 0.0, %v7634_v50 }
 0x1df   : > { %v6295_v59 = vpop.eup %6294  ;;  %v3836_v38 = vmul.f32 %v6293_v26, %v7488_v56  ;;  %6316 = vrcp.f32 %v3587_v51  ;;  %v3214_v46 = vsub.f32 0.0, %v7637_v3  ;;  %v7648_v18 = vadd.f32 %v7349_v52, %v2949_v37  ;;  %v2059_v19 = vpop.f32.mrf.mxu0 }
 0x1e0   : > { %v6297_v0 = vpop.eup %6296  ;;  %v5305_v6 = vpack.c.bf16 %v3838_v36, %v3837_v53  ;;  %v3590_v61 = vadd.f32 1.0, %v6295_v59  ;;  %6318 = vpow2.f32 %v3371_v43  ;;  %v7650_v48 = vpop.f32.mrf.mxu1  ;;  %v3367_v1 = vmul.f32 1.442695, %v3211_v13 }
 0x1e1   : > { %v6299_v55 = vpop.eup %6298  ;;  %v5300_v28 = vpack.c.bf16 %v3836_v38, %v3835_v22  ;;  %v3841_v56 = vmul.f32 %v6297_v0, %v7494_v12  ;;  %v3373_v24 = vmul.f32 1.442695, %v3214_v46  ;;  %v3212_v53 = vsub.f32 0.0, %v7648_v18  ;;  %v7658_v14 = vpop.f32.mrf.mxu0 }
 0x1e2   : > { %v6301_v2 = vpop.eup %6300  ;;  %5593 = vst [vmem:[%s7546_s6 + $0x38] sm:$0xff] %v5305_v6   ;;  %6320 = vrcp.f32 %v3590_v61  ;;  %v3588_v16 = vadd.f32 1.0, %v6299_v55  ;;  %v7656_v49 = vadd.f32 %v7349_v52, %v2954_v8  ;;  %v5762_v63 = vpop.f32.mrf.mxu1  ;;  %v2531_v12 = vadd.f32 %v7617_v23, %v7336_v40 }
 0x1e3   : > { %v6303_v5 = vpop.eup %6302  ;;  %5592 = vst [vmem:[%s7546_s6 + $0x30] sm:$0xff] %v5300_v28   ;;  %v3839_v22 = vmul.f32 %v6301_v2, %v7504_v31  ;;  %6322 = vpow2.f32 %v3367_v1  ;;  %v2542_v47 = vadd.f32 %v5758_v54, %v7386_v30  ;;  %v3369_v36 = vmul.f32 1.442695, %v3212_v53  ;;  %v2062_v37 = vpop.f32.mrf.mxu0 }
 0x1e4   : > { %v6305_v51 = vpop.eup %6304  ;;  %6324 = vrcp.f32 %v3588_v16  ;;  %v3593_v26 = vadd.f32 1.0, %v6303_v5  ;;  %v3217_v43 = vsub.f32 0.0, %v7656_v49  ;;  %v2549_v8 = vpop.f32.mrf.mxu1  ;;  %v2952_v38 = vmul.f32 %v7341_v21, %v2531_v12 }
 0x1e5   : > { %v3842_v59 = vmul.f32 %v6305_v51, %v7515_v32  ;;  %6326 = vpow2.f32 %v3373_v24  ;;  %v2955_v31 = vmul.f32 %v7341_v21, %v2542_v47  ;;  %v2534_v30 = vadd.f32 %v2533_v62, %v7353_v42  ;;  %v7671_v54 = vpop.f32.mrf.mxu0 }
 0x1e6   : > { %v6307_v13 = vpop.eup %6306  ;;  %6328 = vrcp.f32 %v3593_v26  ;;  %v3379_v40 = vmul.f32 1.442695, %v3217_v43  ;;  %v2555_v23 = vadd.f32 %v5761_v34, %v7438_v20  ;;  %v5765_v46 = vpop.f32.mrf.mxu1  ;;  %v7675_v61 = vadd.f32 %v7349_v52, %v2952_v38 }
 0x1e7   : > { %v6309_v0 = vpop.eup %6308  ;;  %v5315_v6 = vpack.c.bf16 %v3842_v59, %v3841_v56  ;;  %v3840_v32 = vmul.f32 %v6307_v13, %v7523_v27  ;;  %6330 = vpow2.f32 %v3369_v36  ;;  %v7678_v28 = vadd.f32 %v7349_v52, %v2955_v31  ;;  %v2067_v42 = vpop.f32.mrf.mxu0 }
 0x1e8   : > { %v6311_v19 = vpop.eup %6310  ;;  %v3591_v55 = vadd.f32 1.0, %v6309_v0  ;;  %6332 = vpow2.f32 %v3379_v40  ;;  %v2953_v20 = vmul.f32 %v7341_v21, %v2534_v30  ;;  %v7681_v62 = vpop.f32.mrf.mxu1  ;;  %v3215_v1 = vsub.f32 0.0, %v7675_v61 }
 0x1e9   : > { %v6313_v34 = vpop.eup %6312  ;;  %5595 = vst [vmem:[%s7546_s6 + $0x48] sm:$0xff] %v5315_v6   ;;  %v5310_v56 = vpack.c.bf16 %v3840_v32, %v3839_v22  ;;  %v3594_v27 = vadd.f32 1.0, %v6311_v19  ;;  %v2958_v24 = vmul.f32 %v7341_v21, %v2555_v23  ;;  %v3218_v53 = vsub.f32 0.0, %v7678_v28  ;;  %v7691_v12 = vpop.f32.mrf.mxu0 }
 0x1ea   : > { %v6315_v2 = vpop.eup %6314  ;;  %v3845_v16 = vmul.f32 %v6313_v34, %v7539_v9  ;;  %6334 = vrcp.f32 %v3591_v55  ;;  %v7689_v5 = vadd.f32 %v7349_v52, %v2953_v20  ;;  %v7693_v47 = vpop.f32.mrf.mxu1  ;;  %v3375_v51 = vmul.f32 1.442695, %v3215_v1  ;;  %v7722_v20 = vld [vmem:[%s8728_s3] ss:$0 sm:$0xff]  ;;  %v8770_v34 = vld [vmem:[#allocation40_spill] sm:$0xff] }
 0x1eb   : > { %5594 = vst [vmem:[%s7546_s6 + $0x40] sm:$0xff] %v5310_v56   ;;  %6336 = vrcp.f32 %v3594_v27  ;;  %v3592_v22 = vadd.f32 1.0, %v6315_v2  ;;  %v7697_v26 = vadd.f32 %v7349_v52, %v2958_v24  ;;  %v3381_v36 = vmul.f32 1.442695, %v3218_v53  ;;  %v2070_v59 = vpop.f32.mrf.mxu0  ;;  %v8769_v52 = vld [vmem:[#allocation37_spill] sm:$0xff] }
 0x1ec   : > { %v6317_v21 = vpop.eup %6316  ;;  %v3216_v9 = vsub.f32 0.0, %v7689_v5  ;;  %v2547_v43 = vadd.f32 %v7650_v48, %v7404_v35  ;;  %v2558_v37 = vadd.f32 %v5762_v63, %v7454_v11  ;;  %v7703_v38 = vpop.f32.mrf.mxu1  ;;  %v2550_v30 = vadd.f32 %v2549_v8, %v8769_v52  ;;  %v7711_v35 = vld [vmem:[%s8727_s2] ss:$0 sm:$0xff] }
 0x1ed   : > { %v6319_v31 = vpop.eup %6318  ;;  %v3843_v13 = vmul.f32 %v6317_v21, %v7555_v15  ;;  %6338 = vrcp.f32 %v3592_v22  ;;  %v3221_v40 = vsub.f32 0.0, %v7697_v26  ;;  %v7714_v48 = vpop.f32.mrf.mxu0  ;;  %v2571_v56 = vadd.f32 %v5765_v46, %v8770_v34 }
 0x1ee   : > { %v3597_v23 = vadd.f32 1.0, %v6319_v31  ;;  %6340 = vpow2.f32 %v3375_v51  ;;  %v3377_v0 = vmul.f32 1.442695, %v3216_v9  ;;  %v2956_v11 = vmul.f32 %v7711_v35, %v2547_v43  ;;  %v5769_v63 = vpop.f32.mrf.mxu1 }
 0x1ef   : > { %v6321_v6 = vpop.eup %6320  ;;  %6342 = vpow2.f32 %v3381_v36  ;;  %v3387_v15 = vmul.f32 1.442695, %v3221_v40  ;;  %v2959_v32 = vmul.f32 %v7711_v35, %v2558_v37  ;;  %v2957_v8 = vmul.f32 %v7711_v35, %v2550_v30  ;;  %v2075_v27 = vpop.f32.mrf.mxu0 }
 0x1f0   : > { %v6323_v19 = vpop.eup %6322  ;;  %v3846_v55 = vmul.f32 %v6321_v6, %v7569_v58  ;;  %6344 = vrcp.f32 %v3597_v23  ;;  %v7725_v42 = vadd.f32 %v7722_v20, %v2956_v11  ;;  %v7728_v1 = vpop.f32.mrf.mxu1  ;;  %v2962_v30 = vmul.f32 %v7711_v35, %v2571_v56  ;;  %v8772_v27 = vld [vmem:[#allocation41_spill] sm:$0xff] }
 0x1f1   : > { %v6325_v24 = vpop.eup %6324  ;;  %v3595_v2 = vadd.f32 1.0, %v6323_v19  ;;  %6346 = vpow2.f32 %v3377_v0  ;;  %v7731_v58 = vadd.f32 %v7722_v20, %v2959_v32  ;;  %v7734_v53 = vadd.f32 %v7722_v20, %v2957_v8  ;;  %v7738_v36 = vpop.f32.mrf.mxu0 }
 0x1f2   : > { %v6327_v22 = vpop.eup %6326  ;;  %v5325_v51 = vpack.c.bf16 %v3846_v55, %v3845_v16  ;;  %v3844_v21 = vmul.f32 %v6325_v24, %v7572_v60  ;;  %6348 = vpow2.f32 %v3387_v15  ;;  %v3219_v46 = vsub.f32 0.0, %v7725_v42  ;;  %v7740_v9 = vpop.f32.mrf.mxu1 }
 0x1f3   : > { %v6329_v43 = vpop.eup %6328  ;;  %6350 = vrcp.f32 %v3595_v2  ;;  %v3598_v37 = vadd.f32 1.0, %v6327_v22  ;;  %v3222_v59 = vsub.f32 0.0, %v7731_v58  ;;  %v3220_v31 = vsub.f32 0.0, %v7734_v53  ;;  %v2078_v23 = vpop.f32.mrf.mxu0  ;;  %v8773_v2 = vld [vmem:[#allocation39_spill] sm:$0xff] }
 0x1f4   : > { %v6331_v40 = vpop.eup %6330  ;;  %5597 = vst [vmem:[%s7546_s6 + $0x58] sm:$0xff] %v5325_v51   ;;  %v5320_v16 = vpack.c.bf16 %v3844_v21, %v3843_v13  ;;  %v3849_v60 = vmul.f32 %v6329_v43, %v7579_v25  ;;  %v3383_v52 = vmul.f32 1.442695, %v3219_v46  ;;  %v7747_v0 = vpop.f32.mrf.mxu1  ;;  %v7751_v19 = vadd.f32 %v7722_v20, %v2962_v30  ;;  %v8771_v13 = vld [vmem:[#allocation38_spill] sm:$0xff] }
 0x1f5   : > { %v6333_v11 = vpop.eup %6332  ;;  %6352 = vrcp.f32 %v3598_v37  ;;  %v3596_v6 = vadd.f32 1.0, %v6331_v40  ;;  %v3389_v15 = vmul.f32 1.442695, %v3222_v59  ;;  %v3385_v32 = vmul.f32 1.442695, %v3220_v31  ;;  %v7755_v55 = vpop.f32.mrf.mxu0 }
 0x1f6   : > { %5596 = vst [vmem:[%s7546_s6 + $0x50] sm:$0xff] %v5320_v16   ;;  %v3601_v8 = vadd.f32 1.0, %v6333_v11  ;;  %6354 = vpow2.f32 %v3383_v52  ;;  %v2563_v25 = vadd.f32 %v7681_v62, %v8771_v13  ;;  %v7757_v34 = vpop.f32.mrf.mxu1  ;;  %v2574_v24 = vadd.f32 %v7693_v47, %v8772_v27 }
 0x1f7   : > { %v6335_v56 = vpop.eup %6334  ;;  %6356 = vrcp.f32 %v3596_v6  ;;  %v2566_v22 = vadd.f32 %v7703_v38, %v8773_v2  ;;  %v2587_v51 = vadd.f32 %v5769_v63, %v7582_v39  ;;  %v3225_v62 = vsub.f32 0.0, %v7751_v19  ;;  %v2083_v37 = vpop.f32.mrf.mxu0 }
 0x1f8   : > { %v6337_v21 = vpop.eup %6336  ;;  %v3847_v46 = vmul.f32 %v6335_v56, %v7596_v44  ;;  %6358 = vrcp.f32 %v3601_v8  ;;  %v2960_v43 = vmul.f32 %v7711_v35, %v2563_v25  ;;  %v2594_v59 = vpop.f32.mrf.mxu1  ;;  %v2963_v47 = vmul.f32 %v7711_v35, %v2574_v24 }
 0x1f9   : > { %v3850_v31 = vmul.f32 %v6337_v21, %v7604_v45  ;;  %6360 = vpow2.f32 %v3389_v15  ;;  %v2961_v40 = vmul.f32 %v7711_v35, %v2566_v22  ;;  %v3395_v39 = vmul.f32 1.442695, %v3225_v62  ;;  %v7774_v16 = vpop.f32.mrf.mxu0 }
 0x1fa   : > { %v6339_v38 = vpop.eup %6338  ;;  %6362 = vpow2.f32 %v3385_v32  ;;  %v7771_v63 = vadd.f32 %v7722_v20, %v2960_v43  ;;  %v2966_v44 = vmul.f32 %v7711_v35, %v2587_v51  ;;  %v7776_v52 = vpop.f32.mrf.mxu1  ;;  %v7780_v11 = vadd.f32 %v7722_v20, %v2963_v47 }
 0x1fb   : > { %v6341_v30 = vpop.eup %6340  ;;  %v5335_v45 = vpack.c.bf16 %v3850_v31, %v3849_v60  ;;  %v3848_v23 = vmul.f32 %v6339_v38, %v7608_v57  ;;  %v7783_v6 = vadd.f32 %v7722_v20, %v2961_v40  ;;  %6364 = vpow2.f32 %v3395_v39  ;;  %v2086_v25 = vpop.f32.mrf.mxu0 }
 0x1fc   : > { %v6343_v15 = vpop.eup %6342  ;;  %v3599_v32 = vadd.f32 1.0, %v6341_v30  ;;  %v3223_v8 = vsub.f32 0.0, %v7771_v63  ;;  %v7787_v13 = vadd.f32 %v7722_v20, %v2966_v44  ;;  %v7789_v56 = vpop.f32.mrf.mxu1  ;;  %v3226_v24 = vsub.f32 0.0, %v7780_v11 }
 0x1fd   : > { %v6345_v60 = vpop.eup %6344  ;;  %5599 = vst [vmem:[%s7546_s6 + $0x68] sm:$0xff] %v5335_v45   ;;  %v5330_v57 = vpack.c.bf16 %v3848_v23, %v3847_v46  ;;  %v3602_v27 = vadd.f32 1.0, %v6343_v15  ;;  %v3224_v2 = vsub.f32 0.0, %v7783_v6  ;;  %v7796_v43 = vpop.f32.mrf.mxu0  ;;  %v2590_v15 = vadd.f32 %v7740_v9, %v7593_v29 }
 0x1fe   : > { %v6347_v22 = vpop.eup %6346  ;;  %v3853_v51 = vmul.f32 %v6345_v60, %v7623_v7  ;;  %6366 = vrcp.f32 %v3599_v32  ;;  %v3391_v21 = vmul.f32 1.442695, %v3223_v8  ;;  %v3229_v62 = vsub.f32 0.0, %v7787_v13  ;;  %v7798_v37 = vpop.f32.mrf.mxu1 }
 0x1ff   : > { %v6349_v31 = vpop.eup %6348  ;;  %5598 = vst [vmem:[%s7546_s6 + $0x60] sm:$0xff] %v5330_v57   ;;  %6368 = vrcp.f32 %v3602_v27  ;;  %v3600_v46 = vadd.f32 1.0, %v6347_v22  ;;  %v3397_v47 = vmul.f32 1.442695, %v3226_v24  ;;  %v3393_v40 = vmul.f32 1.442695, %v3224_v2  ;;  %v2091_v30 = vpop.f32.mrf.mxu0 }
 0x200   : > { %v6351_v38 = vpop.eup %6350  ;;  %v3605_v39 = vadd.f32 1.0, %v6349_v31  ;;  %6370 = vpow2.f32 %v3391_v21  ;;  %v3403_v44 = vmul.f32 1.442695, %v3229_v62  ;;  %v2579_v7 = vadd.f32 %v7728_v1, %v7542_v4  ;;  %v7803_v45 = vpop.f32.mrf.mxu1 }
 0x201   : > { %v3851_v23 = vmul.f32 %v6351_v38, %v7634_v50  ;;  %6372 = vrcp.f32 %v3600_v46  ;;  %v2582_v32 = vadd.f32 %v7747_v0, %v7564_v33  ;;  %v2603_v60 = vadd.f32 %v7757_v34, %v7642_v10  ;;  %v7814_v1 = vpop.f32.mrf.mxu0 }
 0x202   : > { %v6353_v8 = vpop.eup %6352  ;;  %6374 = vrcp.f32 %v3605_v39  ;;  %v2964_v25 = vmul.f32 %v7711_v35, %v2579_v7  ;;  %v2595_v4 = vadd.f32 %v2594_v59, %v7610_v17  ;;  %v7816_v57 = vpop.f32.mrf.mxu1  ;;  %v2967_v29 = vmul.f32 %v7711_v35, %v2590_v15 }
 0x203   : > { %v6355_v50 = vpop.eup %6354  ;;  %v3854_v27 = vmul.f32 %v6353_v8, %v7637_v3  ;;  %6376 = vpow2.f32 %v3397_v47  ;;  %v2965_v33 = vmul.f32 %v7711_v35, %v2582_v32  ;;  %v2970_v17 = vmul.f32 %v7711_v35, %v2603_v60  ;;  %v2094_v10 = vpop.f32.mrf.mxu0 }
 0x204   : > { %v6357_v9 = vpop.eup %6356  ;;  %v3603_v0 = vadd.f32 1.0, %v6355_v50  ;;  %6378 = vpow2.f32 %v3393_v40  ;;  %v7822_v24 = vadd.f32 %v7722_v20, %v2964_v25  ;;  %v7825_v34 = vpop.f32.mrf.mxu1  ;;  %v7829_v22 = vadd.f32 %v7722_v20, %v2967_v29 }
 0x205   : > { %v6359_v59 = vpop.eup %6358  ;;  %v5345_v2 = vpack.c.bf16 %v3854_v27, %v3853_v51  ;;  %v3852_v3 = vmul.f32 %v6357_v9, %v7648_v18  ;;  %6380 = vpow2.f32 %v3403_v44  ;;  %v7836_v46 = vadd.f32 %v7722_v20, %v2965_v33  ;;  %v7838_v47 = vpop.f32.mrf.mxu0 }
 0x206   : > { %v6361_v21 = vpop.eup %6360  ;;  %v7832_v62 = vmul.f32 %v6359_v59, %v7656_v49  ;;  %6382 = vrcp.f32 %v3603_v0  ;;  %v3227_v31 = vsub.f32 0.0, %v7822_v24  ;;  %v7840_v51 = vpop.f32.mrf.mxu1  ;;  %v3230_v39 = vsub.f32 0.0, %v7829_v22 }
 0x207   : > { %v6363_v18 = vpop.eup %6362  ;;  %5601 = vst [vmem:[%s7546_s6 + $0x78] sm:$0xff] %v5345_v2   ;;  %v5340_v40 = vpack.c.bf16 %v3852_v3, %v3851_v23  ;;  %v3606_v38 = vadd.f32 1.0, %v6361_v21  ;;  %v7845_v49 = vadd.f32 %v7722_v20, %v2970_v17  ;;  %v3228_v30 = vsub.f32 0.0, %v7836_v46  ;;  %v2099_v32 = vpop.f32.mrf.mxu0 }
 0x208   : > { %v3604_v44 = vadd.f32 1.0, %v6363_v18  ;;  %v3399_v7 = vmul.f32 1.442695, %v3227_v31  ;;  %v2968_v15 = vmul.f32 %v7711_v35, %v2595_v4  ;;  %v7849_v8 = vpop.f32.mrf.mxu1  ;;  %v6365_v25 = vpop.eup %6364  ;;  %v3405_v60 = vmul.f32 1.442695, %v3230_v39 }
 0x209   : > { %5600 = vst [vmem:[%s7546_s6 + $0x70] sm:$0xff] %v5340_v40   ;;  %6384 = vrcp.f32 %v3606_v38  ;;  %v3233_v23 = vsub.f32 0.0, %v7845_v49  ;;  %v2606_v50 = vadd.f32 %v7776_v52, %v7658_v14  ;;  %v3609_v27 = vadd.f32 1.0, %v6365_v25  ;;  %v7858_v9 = vpop.f32.mrf.mxu0 }
 0x20a   : > { %6386 = vrcp.f32 %v3604_v44  ;;  %v3401_v29 = vmul.f32 1.442695, %v3228_v30  ;;  %v7856_v33 = vadd.f32 %v7722_v20, %v2968_v15  ;;  %v7860_v4 = vpop.f32.mrf.mxu1  ;;  %v2598_v59 = vadd.f32 %v7789_v56, %v7625_v41 }
 0x20b   : > { %v6367_v0 = vpop.eup %6366  ;;  %6388 = vpow2.f32 %v3399_v7  ;;  %v3411_v17 = vmul.f32 1.442695, %v3233_v23  ;;  %v2971_v10 = vmul.f32 %v7711_v35, %v2606_v50  ;;  %v2619_v3 = vadd.f32 %v7798_v37, %v7714_v48  ;;  %v2102_v21 = vpop.f32.mrf.mxu0 }
 0x20c   : > { %v6369_v2 = vpop.eup %6368  ;;  %v3855_v14 = vmul.f32 %v6367_v0, %v7675_v61  ;;  %6390 = vrcp.f32 %v3609_v27  ;;  %v3231_v52 = vsub.f32 0.0, %v7856_v33  ;;  %v7869_v31 = vpop.f32.mrf.mxu1  ;;  %v2969_v41 = vmul.f32 %v7711_v35, %v2598_v59 }
 0x20d   : > { %v6371_v18 = vpop.eup %6370  ;;  %v3858_v40 = vmul.f32 %v6369_v2, %v7678_v28  ;;  %6392 = vpow2.f32 %v3405_v60  ;;  %v7873_v38 = vadd.f32 %v7722_v20, %v2971_v10  ;;  %v2974_v44 = vmul.f32 %v7711_v35, %v2619_v3  ;;  %v7877_v48 = vpop.f32.mrf.mxu0 }
 0x20e   : > { %v6373_v56 = vpop.eup %6372  ;;  %v3607_v61 = vadd.f32 1.0, %v6371_v18  ;;  %6394 = vpow2.f32 %v3401_v29  ;;  %v3407_v39 = vmul.f32 1.442695, %v3231_v52  ;;  %v7879_v37 = vpop.f32.mrf.mxu1  ;;  %v7888_v60 = vadd.f32 %v7722_v20, %v2969_v41 }
 0x20f   : > { %v6375_v7 = vpop.eup %6374  ;;  %v5355_v28 = vpack.c.bf16 %v3858_v40, %v7832_v62  ;;  %v3856_v30 = vmul.f32 %v6373_v56, %v7689_v5  ;;  %6396 = vpow2.f32 %v3411_v17  ;;  %v3234_v15 = vsub.f32 0.0, %v7873_v38  ;;  %v2107_v50 = vpop.f32.mrf.mxu0 }
 0x210   : > { %v6377_v32 = vpop.eup %6376  ;;  %v7885_v25 = vmul.f32 %v6375_v7, %v7697_v26  ;;  %6398 = vrcp.f32 %v3607_v61  ;;  %v7891_v23 = vadd.f32 %v7722_v20, %v2974_v44  ;;  %v7893_v27 = vpop.f32.mrf.mxu1  ;;  %v3232_v10 = vsub.f32 0.0, %v7888_v60 }
 0x211   : > { %v6379_v62 = vpop.eup %6378  ;;  %5603 = vst [vmem:[%s7546_s6 + $0x88] sm:$0xff] %v5355_v28   ;;  %v5350_v5 = vpack.c.bf16 %v3856_v30, %v3855_v14  ;;  %v3610_v29 = vadd.f32 1.0, %v6377_v32  ;;  %6400 = vpow2.f32 %v3407_v39  ;;  %v3413_v0 = vmul.f32 1.442695, %v3234_v15  ;;  %v7900_v52 = vpop.f32.mrf.mxu0 }
 0x212   : > { %v6381_v17 = vpop.eup %6380  ;;  %v3608_v26 = vadd.f32 1.0, %v6379_v62  ;;  %v3237_v59 = vsub.f32 0.0, %v7891_v23  ;;  %v2611_v2 = vadd.f32 %v7803_v45, %v7671_v54  ;;  %v7902_v3 = vpop.f32.mrf.mxu1  ;;  %v2622_v18 = vadd.f32 %v7816_v57, %v7738_v36 }
 0x213   : > { %v6383_v21 = vpop.eup %6382  ;;  %5602 = vst [vmem:[%s7546_s6 + $0x80] sm:$0xff] %v5350_v5   ;;  %6402 = vrcp.f32 %v3610_v29  ;;  %v3613_v14 = vadd.f32 1.0, %v6381_v17  ;;  %v2614_v40 = vadd.f32 %v7825_v34, %v7691_v12  ;;  %v3409_v56 = vmul.f32 1.442695, %v3232_v10  ;;  %v2110_v54 = vpop.f32.mrf.mxu0 }
 0x214   : > { %v3859_v41 = vmul.f32 %v6383_v21, %v7725_v42  ;;  %6404 = vrcp.f32 %v3608_v26  ;;  %v3419_v61 = vmul.f32 1.442695, %v3237_v59  ;;  %v7910_v45 = vpop.f32.mrf.mxu1  ;;  %v2972_v39 = vmul.f32 %v7711_v35, %v2611_v2 }
 0x215   : > { %6406 = vrcp.f32 %v3613_v14  ;;  %v2975_v44 = vmul.f32 %v7711_v35, %v2622_v18  ;;  %v2973_v7 = vmul.f32 %v7711_v35, %v2614_v40  ;;  %v2635_v12 = vadd.f32 %v7840_v51, %v7796_v43  ;;  %v7921_v57 = vpop.f32.mrf.mxu0 }
 0x216   : > { %v6385_v28 = vpop.eup %6384  ;;  %6408 = vpow2.f32 %v3413_v0  ;;  %v2627_v42 = vadd.f32 %v7849_v8, %v7755_v55  ;;  %v2638_v36 = vadd.f32 %v7860_v4, %v7814_v1  ;;  %v7923_v34 = vpop.f32.mrf.mxu1  ;;  %v7927_v32 = vadd.f32 %v7722_v20, %v2972_v39 }
 0x217   : > { %v6387_v30 = vpop.eup %6386  ;;  %v3862_v15 = vmul.f32 %v6385_v28, %v7731_v58  ;;  %6410 = vpow2.f32 %v3409_v56  ;;  %v7930_v50 = vadd.f32 %v7722_v20, %v2975_v44  ;;  %v7934_v1 = vadd.f32 %v7722_v20, %v2973_v7  ;;  %v2115_v8 = vpop.f32.mrf.mxu0 }
 0x218   : > { %v6389_v43 = vpop.eup %6388  ;;  %v3860_v55 = vmul.f32 %v6387_v30, %v7734_v53  ;;  %6412 = vpow2.f32 %v3419_v61  ;;  %v2978_v51 = vmul.f32 %v7711_v35, %v2635_v12  ;;  %v7937_v4 = vpop.f32.mrf.mxu1  ;;  %v3235_v29 = vsub.f32 0.0, %v7927_v32 }
 0x219   : > { %v6391_v58 = vpop.eup %6390  ;;  %v5365_v62 = vpack.c.bf16 %v3862_v15, %v7885_v25  ;;  %v3611_v5 = vadd.f32 1.0, %v6389_v43  ;;  %v3238_v0 = vsub.f32 0.0, %v7930_v50  ;;  %v3236_v10 = vsub.f32 0.0, %v7934_v1  ;;  %v7949_v2 = vpop.f32.mrf.mxu0 }
 0x21a   : > { %v6393_v53 = vpop.eup %6392  ;;  %v5360_v17 = vpack.c.bf16 %v3860_v55, %v3859_v41  ;;  %v7943_v26 = vmul.f32 %v6391_v58, %v7751_v19  ;;  %v7947_v59 = vadd.f32 %v7722_v20, %v2978_v51  ;;  %v7951_v21 = vpop.f32.mrf.mxu1  ;;  %v3415_v18 = vmul.f32 1.442695, %v3235_v29 }
 0x21b   : > { %v6395_v25 = vpop.eup %6394  ;;  %5605 = vst [vmem:[%s7546_s6 + $0x98] sm:$0xff] %v5365_v62   ;;  %6414 = vrcp.f32 %v3611_v5  ;;  %v3614_v14 = vadd.f32 1.0, %v6393_v53  ;;  %v3421_v40 = vmul.f32 1.442695, %v3238_v0  ;;  %v3417_v19 = vmul.f32 1.442695, %v3236_v10  ;;  %v2118_v39 = vpop.f32.mrf.mxu0 }
 0x21c   : > { %v6397_v56 = vpop.eup %6396  ;;  %5604 = vst [vmem:[%s7546_s6 + $0x90] sm:$0xff] %v5360_v17   ;;  %v3612_v41 = vadd.f32 1.0, %v6395_v25  ;;  %v3241_v61 = vsub.f32 0.0, %v7947_v59  ;;  %v2976_v54 = vmul.f32 %v7711_v35, %v2627_v42  ;;  %v7957_v44 = vpop.f32.mrf.mxu1  ;;  %v2979_v12 = vmul.f32 %v7711_v35, %v2638_v36 }
 0x21d   : > { %v6399_v7 = vpop.eup %6398  ;;  %6416 = vrcp.f32 %v3614_v14  ;;  %v3617_v28 = vadd.f32 1.0, %v6397_v56  ;;  %v2630_v30 = vadd.f32 %v7869_v31, %v7774_v16  ;;  %v7966_v42 = vpop.f32.mrf.mxu0  ;;  %v2651_v31 = vadd.f32 %v7879_v37, %v7877_v48 }
 0x21e   : > { %v6401_v15 = vpop.eup %6400  ;;  %v3863_v43 = vmul.f32 %v6399_v7, %v7771_v63  ;;  %6418 = vrcp.f32 %v3612_v41  ;;  %v3427_v55 = vmul.f32 1.442695, %v3241_v61  ;;  %v7964_v51 = vadd.f32 %v7722_v20, %v2976_v54  ;;  %v7968_v8 = vpop.f32.mrf.mxu1 }
 0x21f   : > { %6420 = vrcp.f32 %v3617_v28  ;;  %v3615_v58 = vadd.f32 1.0, %v6401_v15  ;;  %v7971_v62 = vadd.f32 %v7722_v20, %v2979_v12  ;;  %v2977_v36 = vmul.f32 %v7711_v35, %v2630_v30  ;;  %v2123_v29 = vpop.f32.mrf.mxu0 }
 0x220   : > { %v6403_v16 = vpop.eup %6402  ;;  %6422 = vpow2.f32 %v3415_v18  ;;  %v3239_v63 = vsub.f32 0.0, %v7964_v51  ;;  %v2643_v5 = vadd.f32 %v7893_v27, %v7838_v47  ;;  %v7979_v0 = vpop.f32.mrf.mxu1  ;;  %v2982_v37 = vmul.f32 %v7711_v35, %v2651_v31 }
 0x221   : > { %v6405_v53 = vpop.eup %6404  ;;  %v3866_v17 = vmul.f32 %v6403_v16, %v7780_v11  ;;  %6424 = vrcp.f32 %v3615_v58  ;;  %v3242_v10 = vsub.f32 0.0, %v7971_v62  ;;  %v7984_v25 = vadd.f32 %v7722_v20, %v2977_v36  ;;  %v7988_v47 = vpop.f32.mrf.mxu0 }
 0x222   : > { %v6407_v14 = vpop.eup %6406  ;;  %v3864_v18 = vmul.f32 %v6405_v53, %v7783_v6  ;;  %6426 = vpow2.f32 %v3421_v40  ;;  %v3423_v48 = vmul.f32 1.442695, %v3239_v63  ;;  %v7990_v27 = vpop.f32.mrf.mxu1  ;;  %v2646_v63 = vadd.f32 %v7910_v45, %v7858_v9 }
 0x223   : > { %v6409_v56 = vpop.eup %6408  ;;  %v5375_v11 = vpack.c.bf16 %v3866_v17, %v7943_v26  ;;  %v7994_v41 = vmul.f32 %v6407_v14, %v7787_v13  ;;  %6428 = vpow2.f32 %v3417_v19  ;;  %v3429_v61 = vmul.f32 1.442695, %v3242_v10  ;;  %v2126_v7 = vpop.f32.mrf.mxu0 }
 0x224   : > { %v6411_v54 = vpop.eup %6410  ;;  %v5370_v6 = vpack.c.bf16 %v3864_v18, %v3863_v43  ;;  %v3618_v40 = vadd.f32 1.0, %v6409_v56  ;;  %6430 = vpow2.f32 %v3427_v55  ;;  %v3240_v39 = vsub.f32 0.0, %v7984_v25  ;;  %v7997_v28 = vpop.f32.mrf.mxu1 }
 0x225   : > { %v6413_v12 = vpop.eup %6412  ;;  %5607 = vst [vmem:[%s7546_s6 + $0xa8] sm:$0xff] %v5375_v11   ;;  %v3616_v30 = vadd.f32 1.0, %v6411_v54  ;;  %6432 = vpow2.f32 %v3423_v48  ;;  %v8001_v26 = vadd.f32 %v7722_v20, %v2982_v37  ;;  %v2980_v13 = vmul.f32 %v7711_v35, %v2643_v5  ;;  %v8007_v55 = vpop.f32.mrf.mxu0 }
 0x226   : > { %5606 = vst [vmem:[%s7546_s6 + $0xa0] sm:$0xff] %v5370_v6   ;;  %6434 = vrcp.f32 %v3618_v40  ;;  %v3621_v19 = vadd.f32 1.0, %v6413_v12  ;;  %v3425_v15 = vmul.f32 1.442695, %v3240_v39  ;;  %v2654_v43 = vadd.f32 %v7902_v3, %v7900_v52  ;;  %v8009_v58 = vpop.f32.mrf.mxu1 }
 0x227   : > { %6436 = vrcp.f32 %v3616_v30  ;;  %v3245_v36 = vsub.f32 0.0, %v8001_v26  ;;  %v8013_v16 = vadd.f32 %v7722_v20, %v2980_v13  ;;  %v2659_v52 = vadd.f32 %v7937_v4, %v7921_v57  ;;  %v2131_v29 = vpop.f32.mrf.mxu0 }
 0x228   : > { %v6415_v31 = vpop.eup %6414  ;;  %6438 = vrcp.f32 %v3621_v19  ;;  %v2983_v5 = vmul.f32 %v7711_v35, %v2654_v43  ;;  %v2662_v3 = vadd.f32 %v7957_v44, %v7949_v2  ;;  %v8022_v53 = vpop.f32.mrf.mxu1  ;;  %v2981_v18 = vmul.f32 %v7711_v35, %v2646_v63 }
 0x229   : > { %v3867_v17 = vmul.f32 %v6415_v31, %v7822_v24  ;;  %6440 = vpow2.f32 %v3429_v61  ;;  %v3435_v10 = vmul.f32 1.442695, %v3245_v36  ;;  %v3243_v14 = vsub.f32 0.0, %v8013_v16  ;;  %v2132_v4 = vpop.f32.mrf.mxu0 }
 0x22a   : > { %v6417_v9 = vpop.eup %6416  ;;  %6442 = vpow2.f32 %v3425_v15  ;;  %v8027_v45 = vadd.f32 %v7722_v20, %v2983_v5  ;;  %v2984_v57 = vmul.f32 %v7711_v35, %v2659_v52  ;;  %v8031_v2 = vpop.f32.mrf.mxu1  ;;  %v2985_v37 = vmul.f32 %v7711_v35, %v2662_v3 }
 0x22b   : > { %v6419_v44 = vpop.eup %6418  ;;  %v3870_v48 = vmul.f32 %v6417_v9, %v7829_v22  ;;  %6444 = vpow2.f32 %v3435_v10  ;;  %v3431_v24 = vmul.f32 1.442695, %v3243_v14  ;;  %v8038_v54 = vadd.f32 %v7722_v20, %v2981_v18  ;;  %v2134_v40 = vpop.f32.mrf.mxu0 }
 0x22c   : > { %v6421_v56 = vpop.eup %6420  ;;  %v3868_v11 = vmul.f32 %v6419_v44, %v7836_v46  ;;  %v3246_v61 = vsub.f32 0.0, %v8027_v45  ;;  %v8041_v6 = vadd.f32 %v7722_v20, %v2984_v57  ;;  %v8043_v39 = vpop.f32.mrf.mxu1  ;;  %v8050_v46 = vadd.f32 %v7722_v20, %v2985_v37 }
 0x22d   : > { %v6423_v22 = vpop.eup %6422  ;;  %v5385_v7 = vpack.c.bf16 %v3870_v48, %v7994_v41  ;;  %v8047_v12 = vmul.f32 %v6421_v56, %v7845_v49  ;;  %6446 = vpow2.f32 %v3431_v24  ;;  %v3244_v43 = vsub.f32 0.0, %v8038_v54  ;;  %v8053_v36 = vpop.f32.mrf.mxu0 }
 0x22e   : > { %v6425_v30 = vpop.eup %6424  ;;  %v5380_v13 = vpack.c.bf16 %v3868_v11, %v3867_v17  ;;  %v3619_v19 = vadd.f32 1.0, %v6423_v22  ;;  %v3437_v15 = vmul.f32 1.442695, %v3246_v61  ;;  %v8055_v63 = vpop.f32.mrf.mxu1  ;;  %v3247_v41 = vsub.f32 0.0, %v8041_v6 }
 0x22f   : > { %v6427_v31 = vpop.eup %6426  ;;  %5609 = vst [vmem:[%s7546_s6 + $0xb8] sm:$0xff] %v5385_v7   ;;  %v3871_v49 = vmul.f32 %v6425_v30, %v7856_v33  ;;  %v3248_v5 = vsub.f32 0.0, %v8050_v46  ;;  %v2667_v52 = vadd.f32 %v7923_v34, %v7966_v42  ;;  %v3433_v17 = vmul.f32 1.442695, %v3244_v43  ;;  %v2139_v14 = vpop.f32.mrf.mxu0 }
 0x230   : > { %v6429_v3 = vpop.eup %6428  ;;  %5608 = vst [vmem:[%s7546_s6 + $0xb0] sm:$0xff] %v5380_v13   ;;  %6448 = vrcp.f32 %v3619_v19  ;;  %v3622_v29 = vadd.f32 1.0, %v6427_v31  ;;  %v2670_v10 = vadd.f32 %v7951_v21, %v7988_v47  ;;  %v8066_v9 = vpop.f32.mrf.mxu1  ;;  %v3439_v57 = vmul.f32 1.442695, %v3247_v41 }
 0x231   : > { %v6431_v18 = vpop.eup %6430  ;;  %v3620_v33 = vadd.f32 1.0, %v6429_v3  ;;  %6450 = vpow2.f32 %v3437_v15  ;;  %v3441_v44 = vmul.f32 1.442695, %v3248_v5  ;;  %v2986_v34 = vmul.f32 %v7711_v35, %v2667_v52  ;;  %v2140_v37 = vpop.f32.mrf.mxu0 }
 0x232   : > { %v6433_v48 = vpop.eup %6432  ;;  %6452 = vrcp.f32 %v3622_v29  ;;  %v3625_v24 = vadd.f32 1.0, %v6431_v18  ;;  %v2987_v42 = vmul.f32 %v7711_v35, %v2670_v10  ;;  %v8070_v56 = vpop.f32.mrf.mxu1  ;;  %v2675_v47 = vadd.f32 %v7979_v0, %v8007_v55 }
 0x233   : > { %v6435_v11 = vpop.eup %6434  ;;  %6454 = vrcp.f32 %v3620_v33  ;;  %v3623_v21 = vadd.f32 1.0, %v6433_v48  ;;  %v2678_v61 = vadd.f32 %v7997_v28, %v2132_v4  ;;  %v8077_v7 = vadd.f32 %v7722_v20, %v2986_v34  ;;  %v2142_v13 = vpop.f32.mrf.mxu0 }
 0x234   : > { %v6437_v40 = vpop.eup %6436  ;;  %v3874_v22 = vmul.f32 %v6435_v11, %v7873_v38  ;;  %6456 = vrcp.f32 %v3625_v24  ;;  %v8080_v30 = vadd.f32 %v7722_v20, %v2987_v42  ;;  %v8082_v19 = vpop.f32.mrf.mxu1  ;;  %v2988_v0 = vmul.f32 %v7711_v35, %v2675_v47 }
 0x235   : > { %v6439_v15 = vpop.eup %6438  ;;  %v3872_v43 = vmul.f32 %v6437_v40, %v7888_v60  ;;  %6458 = vrcp.f32 %v3623_v21  ;;  %v2989_v28 = vmul.f32 %v7711_v35, %v2678_v61  ;;  %v3249_v4 = vsub.f32 0.0, %v8077_v7  ;;  %v2145_v31 = vpop.f32.mrf.mxu0 }
 0x236   : > { %v6441_v38 = vpop.eup %6440  ;;  %v5395_v55 = vpack.c.bf16 %v3874_v22, %v8047_v12  ;;  %6460 = vpow2.f32 %v3433_v17  ;;  %v8089_v41 = vpop.f32.mrf.mxu1  ;;  %v3250_v60 = vsub.f32 0.0, %v8080_v30  ;;  %v8094_v12 = vadd.f32 %v7722_v20, %v2988_v0 }
 0x237   : > { %v6443_v5 = vpop.eup %6442  ;;  %v5390_v52 = vpack.c.bf16 %v3872_v43, %v3871_v49  ;;  %v3626_v3 = vadd.f32 1.0, %v6441_v38  ;;  %6462 = vpow2.f32 %v3439_v57  ;;  %v3443_v14 = vmul.f32 1.442695, %v3249_v4  ;;  %v2147_v17 = vpop.f32.mrf.mxu0 }
 0x238   : > { %v6445_v29 = vpop.eup %6444  ;;  %5611 = vst [vmem:[%s7546_s6 + $0xc8] sm:$0xff] %v5395_v55   ;;  %v3624_v10 = vadd.f32 1.0, %v6443_v5  ;;  %6464 = vpow2.f32 %v3441_v44  ;;  %v8096_v18 = vpop.f32.mrf.mxu1  ;;  %v3445_v48 = vmul.f32 1.442695, %v3250_v60  ;;  %v8100_v49 = vadd.f32 %v7722_v20, %v2989_v28 }
 0x239   : > { %5610 = vst [vmem:[%s7546_s6 + $0xc0] sm:$0xff] %v5390_v52   ;;  %6466 = vrcp.f32 %v3626_v3  ;;  %v3629_v33 = vadd.f32 1.0, %v6445_v29  ;;  %v3251_v24 = vsub.f32 0.0, %v8094_v12  ;;  %v2683_v44 = vadd.f32 %v7968_v8, %v8053_v36  ;;  %v2148_v42 = vpop.f32.mrf.mxu0 }
 0x23a   : > { %v6447_v57 = vpop.eup %6446  ;;  %6468 = vrcp.f32 %v3624_v10  ;;  %v2686_v34 = vadd.f32 %v7990_v27, %v2140_v37  ;;  %v8106_v11 = vpop.f32.mrf.mxu1  ;;  %v3877_v21 = vmul.f32 %v6439_v15, %v7891_v23  ;;  %v3252_v47 = vsub.f32 0.0, %v8100_v49 }
 0x23b   : > { %6470 = vrcp.f32 %v3629_v33  ;;  %v2691_v61 = vadd.f32 %v8022_v53, %v2145_v31  ;;  %v3447_v40 = vmul.f32 1.442695, %v3251_v24  ;;  %v2990_v22 = vmul.f32 %v7711_v35, %v2683_v44  ;;  %v2150_v43 = vpop.f32.mrf.mxu0 }
 0x23c   : > { %6472 = vpow2.f32 %v3443_v14  ;;  %v2991_v13 = vmul.f32 %v7711_v35, %v2686_v34  ;;  %v8113_v8 = vpop.f32.mrf.mxu1  ;;  %v3627_v36 = vadd.f32 1.0, %v6447_v57  ;;  %v3449_v37 = vmul.f32 1.442695, %v3252_v47 }
 0x23d   : > { %v6449_v27 = vpop.eup %6448  ;;  %v2992_v0 = vmul.f32 %v7711_v35, %v2691_v61  ;;  %v2694_v23 = vadd.f32 %v8043_v39, %v2148_v42  ;;  %6474 = vpow2.f32 %v3445_v48  ;;  %v8119_v53 = vadd.f32 %v7722_v20, %v2990_v22  ;;  %v2153_v55 = vpop.f32.mrf.mxu0 }
 0x23e   : > { %v6451_v15 = vpop.eup %6450  ;;  %v3875_v28 = vmul.f32 %v6449_v27, %v7927_v32  ;;  %v8122_v38 = vadd.f32 %v7722_v20, %v2991_v13  ;;  %v8124_v4 = vpop.f32.mrf.mxu1  ;;  %6476 = vpow2.f32 %v3447_v40 }
 0x23f   : > { %v6453_v31 = vpop.eup %6452  ;;  %v3630_v5 = vadd.f32 1.0, %v6451_v15  ;;  %v8127_v52 = vadd.f32 %v7722_v20, %v2992_v0  ;;  %v2993_v39 = vmul.f32 %v7711_v35, %v2694_v23  ;;  %6478 = vpow2.f32 %v3449_v37  ;;  %v2155_v10 = vpop.f32.mrf.mxu0 }
 0x240   : > { %v6455_v3 = vpop.eup %6454  ;;  %v3878_v32 = vmul.f32 %v6453_v31, %v7930_v50  ;;  %v3253_v60 = vsub.f32 0.0, %v8119_v53  ;;  %v3254_v29 = vsub.f32 0.0, %v8122_v38  ;;  %v8133_v14 = vpop.f32.mrf.mxu1  ;;  %v8166_v10 = vld [vmem:[%s8728_s3] ss:$0 sm:$0xff] }
 0x241   : > { %v6457_v17 = vpop.eup %6456  ;;  %v3876_v33 = vmul.f32 %v6455_v3, %v7934_v1  ;;  %6480 = vrcp.f32 %v3630_v5  ;;  %v3255_v48 = vsub.f32 0.0, %v8127_v52  ;;  %v8138_v35 = vadd.f32 %v7722_v20, %v2993_v39  ;;  %v2156_v34 = vpop.f32.mrf.mxu0 }
 0x242   : > { %v6459_v57 = vpop.eup %6458  ;;  %v5405_v50 = vpack.c.bf16 %v3878_v32, %v3877_v21  ;;  %v3451_v24 = vmul.f32 1.442695, %v3253_v60  ;;  %v3453_v44 = vmul.f32 1.442695, %v3254_v29  ;;  %v8140_v42 = vpop.f32.mrf.mxu1  ;;  %v3881_v40 = vmul.f32 %v6457_v17, %v7947_v59 }
 0x243   : > { %v6461_v47 = vpop.eup %6460  ;;  %v5400_v61 = vpack.c.bf16 %v3876_v33, %v3875_v28  ;;  %6482 = vrcp.f32 %v3627_v36  ;;  %v3256_v1 = vsub.f32 0.0, %v8138_v35  ;;  %v2699_v20 = vadd.f32 %v8009_v58, %v2153_v55  ;;  %v2158_v43 = vpop.f32.mrf.mxu0  ;;  %v8153_v28 = vld [vmem:[%s8727_s2] ss:$0 sm:$0xff] }
 0x244   : > { %v6463_v22 = vpop.eup %6462  ;;  %5613 = vst [vmem:[%s7546_s6 + $0xd8] sm:$0xff] %v5405_v50   ;;  %v3628_v13 = vadd.f32 1.0, %v6461_v47  ;;  %6484 = vpow2.f32 %v3451_v24  ;;  %v2702_v21 = vadd.f32 %v8031_v2, %v2156_v34  ;;  %v8147_v27 = vpop.f32.mrf.mxu1  ;;  %v3455_v23 = vmul.f32 1.442695, %v3255_v48 }
 0x245   : > { %v6465_v37 = vpop.eup %6464  ;;  %5612 = vst [vmem:[%s7546_s6 + $0xd0] sm:$0xff] %v5400_v61   ;;  %v3631_v0 = vadd.f32 1.0, %v6463_v22  ;;  %6486 = vpow2.f32 %v3453_v44  ;;  %v3457_v59 = vmul.f32 1.442695, %v3256_v1  ;;  %v2994_v58 = vmul.f32 %v8153_v28, %v2699_v20  ;;  %v2161_v55 = vpop.f32.mrf.mxu0 }
 0x246   : > { %v6467_v36 = vpop.eup %6466  ;;  %6488 = vrcp.f32 %v3628_v13  ;;  %v3632_v15 = vadd.f32 1.0, %v6465_v37  ;;  %v2995_v2 = vmul.f32 %v8153_v28, %v2702_v21  ;;  %v8157_v31 = vpop.f32.mrf.mxu1  ;;  %v3879_v39 = vmul.f32 %v6459_v57, %v7964_v51 }
 0x247   : > { %v6469_v5 = vpop.eup %6468  ;;  %v3882_v3 = vmul.f32 %v6467_v36, %v7971_v62  ;;  %6490 = vrcp.f32 %v3631_v0  ;;  %v2707_v32 = vadd.f32 %v8066_v9, %v2161_v55  ;;  %v8169_v17 = vadd.f32 %v8166_v10, %v2994_v58  ;;  %v2163_v62 = vpop.f32.mrf.mxu0 }
 0x248   : > { %v6471_v60 = vpop.eup %6470  ;;  %v3880_v29 = vmul.f32 %v6469_v5, %v7984_v25  ;;  %6492 = vrcp.f32 %v3632_v15  ;;  %v8172_v51 = vadd.f32 %v8166_v10, %v2995_v2  ;;  %v8174_v33 = vpop.f32.mrf.mxu1 }
 0x249   : > { %v6473_v9 = vpop.eup %6472  ;;  %v5415_v48 = vpack.c.bf16 %v3882_v3, %v3881_v40  ;;  %6494 = vpow2.f32 %v3455_v23  ;;  %v2996_v25 = vmul.f32 %v8153_v28, %v2707_v32  ;;  %v3257_v24 = vsub.f32 0.0, %v8169_v17  ;;  %v2164_v44 = vpop.f32.mrf.mxu0 }
 0x24a   : > { %v5410_v57 = vpack.c.bf16 %v3880_v29, %v3879_v39  ;;  %v3633_v50 = vadd.f32 1.0, %v6473_v9  ;;  %6496 = vpow2.f32 %v3457_v59  ;;  %v8178_v34 = vpop.f32.mrf.mxu1  ;;  %v6475_v47 = vpop.eup %6474  ;;  %v3258_v61 = vsub.f32 0.0, %v8172_v51 }
 0x24b   : > { %5615 = vst [vmem:[%s7546_s6 + $0xe8] sm:$0xff] %v5415_v48   ;;  %v8183_v1 = vadd.f32 %v8166_v10, %v2996_v25  ;;  %v2710_v40 = vadd.f32 %v8082_v19, %v2164_v44  ;;  %v6477_v22 = vpop.eup %6476  ;;  %v3634_v13 = vadd.f32 1.0, %v6475_v47  ;;  %v2166_v20 = vpop.f32.mrf.mxu0  ;;  %v3459_v0 = vmul.f32 1.442695, %v3257_v24 }
 0x24c   : > { %5614 = vst [vmem:[%s7546_s6 + $0xe0] sm:$0xff] %v5410_v57   ;;  %6498 = vrcp.f32 %v3633_v50  ;;  %v8187_v21 = vpop.f32.mrf.mxu1  ;;  %v6479_v43 = vpop.eup %6478  ;;  %v3635_v37 = vadd.f32 1.0, %v6477_v22  ;;  %v3885_v15 = vmul.f32 %v6471_v60, %v8001_v26  ;;  %v3461_v19 = vmul.f32 1.442695, %v3258_v61 }
 0x24d   : > { %v3259_v23 = vsub.f32 0.0, %v8183_v1  ;;  %v2997_v59 = vmul.f32 %v8153_v28, %v2710_v40  ;;  %6500 = vrcp.f32 %v3634_v13  ;;  %v3636_v58 = vadd.f32 1.0, %v6479_v43  ;;  %v2169_v2 = vpop.f32.mrf.mxu0 }
 0x24e   : > { %v6481_v36 = vpop.eup %6480  ;;  %v8192_v55 = vpop.f32.mrf.mxu1  ;;  %6502 = vrcp.f32 %v3635_v37  ;;  %v2715_v29 = vadd.f32 %v8055_v63, %v2169_v2 }
 0x24f   : > { %v3886_v5 = vmul.f32 %v6481_v36, %v8027_v45  ;;  %v3463_v39 = vmul.f32 1.442695, %v3259_v23  ;;  %v8196_v3 = vadd.f32 %v8166_v10, %v2997_v59  ;;  %6504 = vrcp.f32 %v3636_v58  ;;  %v2171_v62 = vpop.f32.mrf.mxu0 }
 0x250   : > { %v6483_v32 = vpop.eup %6482  ;;  %v8199_v26 = vpop.f32.mrf.mxu1  ;;  %6506 = vpow2.f32 %v3459_v0  ;;  %v2998_v57 = vmul.f32 %v8153_v28, %v2715_v29 }
 0x251   : > { %v6485_v60 = vpop.eup %6484  ;;  %v5425_v9 = vpack.c.bf16 %v3886_v5, %v3885_v15  ;;  %v3260_v48 = vsub.f32 0.0, %v8196_v3  ;;  %6508 = vpow2.f32 %v3461_v19  ;;  %v2172_v50 = vpop.f32.mrf.mxu0  ;;  %v3883_v22 = vmul.f32 %v6483_v32, %v8013_v16 }
 0x252   : > { %v6487_v25 = vpop.eup %6486  ;;  %v3637_v45 = vadd.f32 1.0, %v6485_v60  ;;  %v8203_v24 = vpop.f32.mrf.mxu1  ;;  %6510 = vpow2.f32 %v3463_v39  ;;  %v2718_v61 = vadd.f32 %v8070_v56, %v2172_v50  ;;  %v8210_v20 = vadd.f32 %v8166_v10, %v2998_v57  ;;  %v8774_v39 = vld [vmem:[#allocation7_spill] sm:$0xff] }
 0x253   : > { %v6489_v44 = vpop.eup %6488  ;;  %5617 = vst [vmem:[%s7546_s6 + $0xf8] sm:$0xff] %v5425_v9   ;;  %v3638_v47 = vadd.f32 1.0, %v6487_v25  ;;  %v3465_v63 = vmul.f32 1.442695, %v3260_v48  ;;  %v2174_v43 = vpop.f32.mrf.mxu0 }
 0x254   : > { %v6491_v40 = vpop.eup %6490  ;;  %v3884_v13 = vmul.f32 %v6489_v44, %v8038_v54  ;;  %6512 = vrcp.f32 %v3637_v45  ;;  %v8212_v37 = vpop.f32.mrf.mxu1  ;;  %v2999_v59 = vmul.f32 %v8153_v28, %v2718_v61  ;;  %v3261_v54 = vsub.f32 0.0, %v8210_v20 }
 0x255   : > { %v6493_v0 = vpop.eup %6492  ;;  %v3887_v23 = vmul.f32 %v6491_v40, %v8041_v6  ;;  %6514 = vrcp.f32 %v3638_v47  ;;  %v2177_v15 = vpop.f32.mrf.mxu0 }
 0x256   : > { %v6495_v56 = vpop.eup %6494  ;;  %v5420_v36 = vpack.c.bf16 %v3884_v13, %v3883_v22  ;;  %v3888_v16 = vmul.f32 %v6493_v0, %v8050_v46  ;;  %6516 = vpow2.f32 %v3465_v63  ;;  %v5821_v58 = vpop.f32.mrf.mxu1  ;;  %v8219_v5 = vadd.f32 %v8166_v10, %v2999_v59  ;;  %v8776_v59 = vld [vmem:[#allocation8_spill] sm:$0xff] }
 0x257   : > { %v6497_v19 = vpop.eup %6496  ;;  %v3639_v2 = vadd.f32 1.0, %v6495_v56  ;;  %v2723_v6 = vadd.f32 %v8096_v18, %v2177_v15  ;;  %v2795_v32 = vadd.f32 %v5821_v58, %v8774_v39  ;;  %v3467_v60 = vmul.f32 1.442695, %v3261_v54  ;;  %v2179_v46 = vpop.f32.mrf.mxu0  ;;  %v8775_v18 = vld [vmem:[#allocation5_spill] sm:$0xff] }
 0x258   : > { %5616 = vst [vmem:[%s7546_s6 + $0xf0] sm:$0xff] %v5420_v36   ;;  %v5430_v29 = vpack.c.bf16 %v3888_v16, %v3887_v23  ;;  %v3640_v62 = vadd.f32 1.0, %v6497_v19  ;;  %v2786_v9 = vpop.f32.mrf.mxu1  ;;  %v3262_v25 = vsub.f32 0.0, %v8219_v5 }
 0x259   : > { %v6499_v48 = vpop.eup %6498  ;;  %6518 = vrcp.f32 %v3639_v2  ;;  %v3000_v45 = vmul.f32 %v8153_v28, %v2723_v6  ;;  %v3018_v57 = vmul.f32 %v8153_v28, %v2795_v32  ;;  %v2787_v44 = vadd.f32 %v2786_v9, %v8775_v18  ;;  %v2180_v47 = vpop.f32.mrf.mxu0 }
 0x25a   : > { %5618 = vst [vmem:[%s7546_s6 + $0x100] sm:$0xff] %v5430_v29   ;;  %v3889_v50 = vmul.f32 %v6499_v48, %v8077_v7  ;;  %6520 = vrcp.f32 %v3640_v62  ;;  %v5822_v63 = vpop.f32.mrf.mxu1  ;;  %v6501_v61 = vpop.eup %6500  ;;  %v3469_v40 = vmul.f32 1.442695, %v3262_v25  ;;  %v2726_v7 = vadd.f32 %v8113_v8, %v2180_v47 }
 0x25b   : > { %6522 = vpow2.f32 %v3467_v60  ;;  %v8231_v22 = vadd.f32 %v8166_v10, %v3000_v45  ;;  %v8234_v13 = vadd.f32 %v8166_v10, %v3018_v57  ;;  %v6503_v43 = vpop.eup %6502  ;;  %v3890_v0 = vmul.f32 %v6501_v61, %v8080_v30  ;;  %v2182_v36 = vpop.f32.mrf.mxu0  ;;  %v8777_v61 = vld [vmem:[#allocation6_spill] sm:$0xff] }
 0x25c   : > { %v3016_v23 = vmul.f32 %v8153_v28, %v2787_v44  ;;  %v2798_v56 = vadd.f32 %v5822_v63, %v8776_v59  ;;  %v2789_v16 = vpop.f32.mrf.mxu1  ;;  %v6505_v54 = vpop.eup %6504  ;;  %v3891_v15 = vmul.f32 %v6503_v43, %v8094_v12  ;;  %6524 = vpow2.f32 %v3469_v40 }
 0x25d   : > { %v3263_v58 = vsub.f32 0.0, %v8231_v22  ;;  %v3281_v19 = vsub.f32 0.0, %v8234_v13  ;;  %v6507_v2 = vpop.eup %6506  ;;  %v5435_v6 = vpack.c.bf16 %v3890_v0, %v3889_v50  ;;  %v3892_v30 = vmul.f32 %v6505_v54, %v8100_v49  ;;  %v2185_v32 = vpop.f32.mrf.mxu0 }
 0x25e   : > { %v8245_v39 = vadd.f32 %v8166_v10, %v3016_v23  ;;  %v3001_v8 = vmul.f32 %v8153_v28, %v2726_v7  ;;  %v5825_v29 = vpop.f32.mrf.mxu1  ;;  %v6509_v62 = vpop.eup %6508  ;;  %v3641_v60 = vadd.f32 1.0, %v6507_v2  ;;  %v3019_v9 = vmul.f32 %v8153_v28, %v2798_v56 }
 0x25f   : > { %v3471_v12 = vmul.f32 1.442695, %v3263_v58  ;;  %v3507_v46 = vmul.f32 1.442695, %v3281_v19  ;;  %v6511_v48 = vpop.eup %6510  ;;  %5619 = vst [vmem:[%s7546_s6 + $0x108] sm:$0xff] %v5435_v6   ;;  %v5440_v25 = vpack.c.bf16 %v3892_v30, %v3891_v15  ;;  %v3642_v45 = vadd.f32 1.0, %v6509_v62  ;;  %v2187_v50 = vpop.f32.mrf.mxu0 }
 0x260   : > { %v3279_v49 = vsub.f32 0.0, %v8245_v39  ;;  %v8252_v57 = vadd.f32 %v8166_v10, %v3001_v8  ;;  %v2802_v18 = vpop.f32.mrf.mxu1  ;;  %6526 = vrcp.f32 %v3641_v60  ;;  %v3643_v47 = vadd.f32 1.0, %v6511_v48 }
 0x261   : > { %v6513_v44 = vpop.eup %6512  ;;  %v8255_v63 = vadd.f32 %v8166_v10, %v3019_v9  ;;  %v2790_v40 = vadd.f32 %v2789_v16, %v8777_v61  ;;  %5620 = vst [vmem:[%s7546_s6 + $0x110] sm:$0xff] %v5440_v25   ;;  %6528 = vrcp.f32 %v3642_v45  ;;  %v2188_v59 = vpop.f32.mrf.mxu0  ;;  %v8778_v9 = vld [vmem:[#allocation11_spill] sm:$0xff]  ;;  %v8779_v25 = vld [vmem:[#allocation9_spill] sm:$0xff] }
 0x262   : > { %v6515_v43 = vpop.eup %6514  ;;  %v3893_v0 = vmul.f32 %v6513_v44, %v8119_v53  ;;  %v3503_v23 = vmul.f32 1.442695, %v3279_v49  ;;  %v3264_v7 = vsub.f32 0.0, %v8252_v57  ;;  %v5826_v56 = vpop.f32.mrf.mxu1  ;;  %6530 = vrcp.f32 %v3643_v47 }
 0x263   : > { %v6517_v36 = vpop.eup %6516  ;;  %v3894_v54 = vmul.f32 %v6515_v43, %v8122_v38  ;;  %v3282_v15 = vsub.f32 0.0, %v8255_v63  ;;  %v3017_v58 = vmul.f32 %v8153_v28, %v2790_v40  ;;  %6532 = vpow2.f32 %v3471_v12  ;;  %v2190_v2 = vpop.f32.mrf.mxu0 }
 0x264   : > { %v3644_v19 = vadd.f32 1.0, %v6517_v36  ;;  %v3473_v16 = vmul.f32 1.442695, %v3264_v7  ;;  %v2731_v53 = vadd.f32 %v8089_v41, %v2185_v32  ;;  %v2805_v6 = vpop.f32.mrf.mxu1  ;;  %6534 = vpow2.f32 %v3507_v46 }
 0x265   : > { %v5445_v30 = vpack.c.bf16 %v3894_v54, %v3893_v0  ;;  %v3509_v8 = vmul.f32 1.442695, %v3282_v15  ;;  %v8266_v62 = vadd.f32 %v8166_v10, %v3017_v58  ;;  %v2811_v48 = vadd.f32 %v5825_v29, %v8778_v9  ;;  %v2193_v45 = vpop.f32.mrf.mxu0  ;;  %v8780_v58 = vld [vmem:[#allocation12_spill] sm:$0xff]  ;;  %v8781_v9 = vld [vmem:[#allocation10_spill] sm:$0xff] }
 0x266   : > { %v6519_v38 = vpop.eup %6518  ;;  %6536 = vrcp.f32 %v3644_v19  ;;  %v3002_v60 = vmul.f32 %v8153_v28, %v2731_v53  ;;  %v2803_v12 = vadd.f32 %v2802_v18, %v8779_v25  ;;  %v8271_v49 = vpop.f32.mrf.mxu1  ;;  %v2734_v50 = vadd.f32 %v8106_v11, %v2188_v59 }
 0x267   : > { %v6521_v41 = vpop.eup %6520  ;;  %5621 = vst [vmem:[%s7546_s6 + $0x118] sm:$0xff] %v5445_v30   ;;  %v3895_v32 = vmul.f32 %v6519_v38, %v8127_v52  ;;  %6538 = vpow2.f32 %v3503_v23  ;;  %v3280_v46 = vsub.f32 0.0, %v8266_v62  ;;  %v3022_v18 = vmul.f32 %v8153_v28, %v2811_v48  ;;  %v2195_v61 = vpop.f32.mrf.mxu0 }
 0x268   : > { %v6523_v44 = vpop.eup %6522  ;;  %v3896_v47 = vmul.f32 %v6521_v41, %v8138_v35  ;;  %6540 = vpow2.f32 %v3473_v16  ;;  %v8279_v29 = vadd.f32 %v8166_v10, %v3002_v60  ;;  %v8282_v40 = vpop.f32.mrf.mxu1  ;;  %v3020_v0 = vmul.f32 %v8153_v28, %v2803_v12 }
 0x269   : > { %v3645_v43 = vadd.f32 1.0, %v6523_v44  ;;  %6542 = vpow2.f32 %v3509_v8  ;;  %v3505_v52 = vmul.f32 1.442695, %v3280_v46  ;;  %v6525_v23 = vpop.eup %6524  ;;  %v8287_v35 = vadd.f32 %v8166_v10, %v3022_v18  ;;  %v8290_v36 = vpop.f32.mrf.mxu0 }
 0x26a   : > { %v5450_v11 = vpack.c.bf16 %v3896_v47, %v3895_v32  ;;  %v3265_v7 = vsub.f32 0.0, %v8279_v29  ;;  %v3003_v59 = vmul.f32 %v8153_v28, %v2734_v50  ;;  %v3646_v54 = vadd.f32 1.0, %v6525_v23  ;;  %v8301_v30 = vpop.f32.mrf.mxu1 }
 0x26b   : > { %6544 = vrcp.f32 %v3645_v43  ;;  %v8293_v15 = vadd.f32 %v8166_v10, %v3020_v0  ;;  %v2814_v19 = vadd.f32 %v5826_v56, %v8780_v58  ;;  %v3285_v53 = vsub.f32 0.0, %v8287_v35  ;;  %v2198_v8 = vpop.f32.mrf.mxu0 }
 0x26c   : > { %5622 = vst [vmem:[%s7546_s6 + $0x120] sm:$0xff] %v5450_v11   ;;  %6546 = vpow2.f32 %v3505_v52  ;;  %v3475_v16 = vmul.f32 1.442695, %v3265_v7  ;;  %v8299_v2 = vadd.f32 %v8166_v10, %v3003_v59  ;;  %v2806_v48 = vadd.f32 %v2805_v6, %v8781_v9  ;;  %v2821_v0 = vpop.f32.mrf.mxu1  ;;  %v8782_v8 = vld [vmem:[#allocation15_spill] sm:$0xff] }
 0x26d   : > { %6548 = vrcp.f32 %v3646_v54  ;;  %v3283_v38 = vsub.f32 0.0, %v8293_v15  ;;  %v3023_v60 = vmul.f32 %v8153_v28, %v2814_v19  ;;  %v6527_v25 = vpop.eup %6526  ;;  %v3515_v56 = vmul.f32 1.442695, %v3285_v53  ;;  %v8308_v32 = vpop.f32.mrf.mxu0 }
 0x26e   : > { %6550 = vpow2.f32 %v3475_v16  ;;  %v3266_v12 = vsub.f32 0.0, %v8299_v2  ;;  %v2739_v41 = vadd.f32 %v8133_v14, %v2193_v45  ;;  %v6529_v46 = vpop.eup %6528  ;;  %v3897_v50 = vmul.f32 %v6527_v25, %v8169_v17  ;;  %v8783_v25 = vld [vmem:[#allocation13_spill] sm:$0xff] }
 0x26f   : > { %v3511_v44 = vmul.f32 1.442695, %v3283_v38  ;;  %v8312_v47 = vadd.f32 %v8166_v10, %v3023_v60  ;;  %v3021_v18 = vmul.f32 %v8153_v28, %v2806_v48  ;;  %v6531_v61 = vpop.eup %6530  ;;  %v3898_v6 = vmul.f32 %v6529_v46, %v8172_v51  ;;  %v2203_v14 = vpop.f32.mrf.mxu0 }
 0x270   : > { %6552 = vpow2.f32 %v3515_v56  ;;  %v3477_v43 = vmul.f32 1.442695, %v3266_v12  ;;  %v3004_v52 = vmul.f32 %v8153_v28, %v2739_v41  ;;  %v6533_v45 = vpop.eup %6532  ;;  %v3899_v23 = vmul.f32 %v6531_v61, %v8183_v1  ;;  %v8335_v12 = vpop.f32.mrf.mxu1 }
 0x271   : > { %6554 = vpow2.f32 %v3511_v44  ;;  %v3286_v17 = vsub.f32 0.0, %v8312_v47  ;;  %v8320_v11 = vadd.f32 %v8166_v10, %v3021_v18  ;;  %v6535_v7 = vpop.eup %6534  ;;  %v5455_v59 = vpack.c.bf16 %v3898_v6, %v3897_v50  ;;  %v8325_v58 = vpop.f32.mrf.mxu0 }
 0x272   : > { %v3647_v54 = vadd.f32 1.0, %v6533_v45  ;;  %6556 = vpow2.f32 %v3477_v43  ;;  %v8323_v51 = vadd.f32 %v8166_v10, %v3004_v52  ;;  %v3665_v16 = vadd.f32 1.0, %v6535_v7  ;;  %v8784_v7 = vld [vmem:[#allocation16_spill] sm:$0xff] }
 0x273   : > { %v6537_v19 = vpop.eup %6536  ;;  %v3517_v53 = vmul.f32 1.442695, %v3286_v17  ;;  %v3284_v1 = vsub.f32 0.0, %v8320_v11  ;;  %v2827_v38 = vadd.f32 %v8271_v49, %v8782_v8  ;;  %5623 = vst [vmem:[%s7546_s6 + $0x128] sm:$0xff] %v5455_v59   ;;  %v2819_v56 = vadd.f32 %v8282_v40, %v8783_v25  ;;  %v2206_v41 = vpop.f32.mrf.mxu0  ;;  %v8785_v59 = vld [vmem:[#allocation14_spill] sm:$0xff] }
 0x274   : > { %v6539_v60 = vpop.eup %6538  ;;  %v3900_v9 = vmul.f32 %v6537_v19, %v8196_v3  ;;  %6558 = vrcp.f32 %v3647_v54  ;;  %v3267_v48 = vsub.f32 0.0, %v8323_v51  ;;  %v2742_v17 = vadd.f32 %v8147_v27, %v8290_v36  ;;  %v2834_v19 = vpop.f32.mrf.mxu1 }
 0x275   : > { %v6541_v46 = vpop.eup %6540  ;;  %6560 = vrcp.f32 %v3665_v16  ;;  %v3663_v50 = vadd.f32 1.0, %v6539_v60  ;;  %v3513_v44 = vmul.f32 1.442695, %v3284_v1  ;;  %v3026_v49 = vmul.f32 %v8153_v28, %v2827_v38  ;;  %v8338_v43 = vpop.f32.mrf.mxu0 }
 0x276   : > { %v6543_v18 = vpop.eup %6542  ;;  %v5460_v61 = vpack.c.bf16 %v3900_v9, %v3899_v23  ;;  %v3648_v6 = vadd.f32 1.0, %v6541_v46  ;;  %6562 = vpow2.f32 %v3517_v53  ;;  %v3479_v3 = vmul.f32 1.442695, %v3267_v48 }
 0x277   : > { %6564 = vrcp.f32 %v3663_v50  ;;  %v3666_v52 = vadd.f32 1.0, %v6543_v18  ;;  %v8341_v40 = vadd.f32 %v8166_v10, %v3026_v49  ;;  %v3024_v14 = vmul.f32 %v8153_v28, %v2819_v56  ;;  %v2211_v16 = vpop.f32.mrf.mxu0  ;;  %v8367_v50 = vpop.f32.mrf.mxu1 }
 0x278   : > { %v6545_v45 = vpop.eup %6544  ;;  %5624 = vst [vmem:[%s7546_s6 + $0x130] sm:$0xff] %v5460_v61   ;;  %6566 = vrcp.f32 %v3648_v6  ;;  %v2830_v23 = vadd.f32 %v8301_v30, %v8784_v7  ;;  %v2822_v54 = vadd.f32 %v2821_v0, %v8785_v59  ;;  %v3005_v27 = vmul.f32 %v8153_v28, %v2742_v17 }
 0x279   : > { %v6547_v53 = vpop.eup %6546  ;;  %v3901_v1 = vmul.f32 %v6545_v45, %v8210_v20  ;;  %6568 = vrcp.f32 %v3666_v52  ;;  %v3289_v8 = vsub.f32 0.0, %v8341_v40  ;;  %v8353_v38 = vadd.f32 %v8166_v10, %v3024_v14  ;;  %v8357_v30 = vpop.f32.mrf.mxu0 }
 0x27a   : > { %v6549_v60 = vpop.eup %6548  ;;  %v3664_v9 = vadd.f32 1.0, %v6547_v53  ;;  %6570 = vpow2.f32 %v3513_v44  ;;  %v3027_v36 = vmul.f32 %v8153_v28, %v2830_v23  ;;  %v8362_v41 = vadd.f32 %v8166_v10, %v3005_v27 }
 0x27b   : > { %v6551_v0 = vpop.eup %6550  ;;  %v3902_v48 = vmul.f32 %v6549_v60, %v8219_v5  ;;  %6572 = vpow2.f32 %v3479_v3  ;;  %v3523_v20 = vmul.f32 1.442695, %v3289_v8  ;;  %v3287_v25 = vsub.f32 0.0, %v8353_v38  ;;  %v2214_v44 = vpop.f32.mrf.mxu0 }
 0x27c   : > { %6574 = vrcp.f32 %v3664_v9  ;;  %v3649_v56 = vadd.f32 1.0, %v6551_v0  ;;  %v8365_v46 = vadd.f32 %v8166_v10, %v3027_v36  ;;  %v3025_v61 = vmul.f32 %v8153_v28, %v2822_v54  ;;  %v8786_v36 = vld [vmem:[#allocation19_spill] sm:$0xff] }
 0x27d   : > { %v6553_v49 = vpop.eup %6552  ;;  %v5465_v18 = vpack.c.bf16 %v3902_v48, %v3901_v1  ;;  %6576 = vpow2.f32 %v3523_v20  ;;  %v3519_v5 = vmul.f32 1.442695, %v3287_v25  ;;  %v3268_v52 = vsub.f32 0.0, %v8362_v41  ;;  %v8372_v45 = vpop.f32.mrf.mxu0 }
 0x27e   : > { %v6555_v6 = vpop.eup %6554  ;;  %6578 = vrcp.f32 %v3649_v56  ;;  %v3669_v3 = vadd.f32 1.0, %v6553_v49  ;;  %v3290_v14 = vsub.f32 0.0, %v8365_v46  ;;  %v8376_v23 = vadd.f32 %v8166_v10, %v3025_v61  ;;  %v8380_v1 = vpop.f32.mrf.mxu1 }
 0x27f   : > { %v6557_v17 = vpop.eup %6556  ;;  %5625 = vst [vmem:[%s7546_s6 + $0x138] sm:$0xff] %v5465_v18   ;;  %v3667_v7 = vadd.f32 1.0, %v6555_v6  ;;  %6580 = vpow2.f32 %v3519_v5  ;;  %v2747_v59 = vadd.f32 %v8124_v4, %v8308_v32  ;;  %v3481_v16 = vmul.f32 1.442695, %v3268_v52  ;;  %v2219_v8 = vpop.f32.mrf.mxu0  ;;  %v8787_v4 = vld [vmem:[#allocation17_spill] sm:$0xff] }
 0x280   : > { %6582 = vrcp.f32 %v3669_v3  ;;  %v3650_v54 = vadd.f32 1.0, %v6557_v17  ;;  %v3525_v53 = vmul.f32 1.442695, %v3290_v14  ;;  %v3288_v9 = vsub.f32 0.0, %v8376_v23  ;;  %v5837_v6 = vpop.f32.mrf.mxu1 }
 0x281   : > { %v6559_v60 = vpop.eup %6558  ;;  %6584 = vrcp.f32 %v3667_v7  ;;  %v3006_v27 = vmul.f32 %v8153_v28, %v2747_v59  ;;  %v2843_v0 = vadd.f32 %v8335_v12, %v8786_v36  ;;  %v2835_v32 = vadd.f32 %v2834_v19, %v8787_v4  ;;  %v8390_v56 = vpop.f32.mrf.mxu0 }
 0x282   : > { %v6561_v48 = vpop.eup %6560  ;;  %v3903_v20 = vmul.f32 %v6559_v60, %v8231_v22  ;;  %6586 = vrcp.f32 %v3650_v54  ;;  %v2750_v25 = vadd.f32 %v8140_v42, %v8325_v58  ;;  %v3521_v18 = vmul.f32 1.442695, %v3288_v9  ;;  %v8788_v60 = vld [vmem:[#allocation20_spill] sm:$0xff]  ;;  %v2850_v4 = vpop.f32.mrf.mxu1 }
 0x283   : > { %v6563_v44 = vpop.eup %6562  ;;  %v3921_v49 = vmul.f32 %v6561_v48, %v8234_v13  ;;  %6588 = vpow2.f32 %v3481_v16  ;;  %v8394_v5 = vadd.f32 %v8166_v10, %v3006_v27  ;;  %v3030_v22 = vmul.f32 %v8153_v28, %v2843_v0  ;;  %v2222_v3 = vpop.f32.mrf.mxu0 }
 0x284   : > { %v6565_v12 = vpop.eup %6564  ;;  %v3670_v61 = vadd.f32 1.0, %v6563_v44  ;;  %6590 = vpow2.f32 %v3525_v53  ;;  %v3028_v19 = vmul.f32 %v8153_v28, %v2835_v32  ;;  %v3007_v52 = vmul.f32 %v8153_v28, %v2750_v25 }
 0x285   : > { %v6567_v42 = vpop.eup %6566  ;;  %v3919_v58 = vmul.f32 %v6565_v12, %v8245_v39  ;;  %6592 = vpow2.f32 %v3521_v18  ;;  %v3269_v13 = vsub.f32 0.0, %v8394_v5  ;;  %v8403_v7 = vadd.f32 %v8166_v10, %v3030_v22  ;;  %v8408_v54 = vpop.f32.mrf.mxu0 }
 0x286   : > { %v6569_v14 = vpop.eup %6568  ;;  %v3904_v17 = vmul.f32 %v6567_v42, %v8252_v57  ;;  %6594 = vrcp.f32 %v3670_v61  ;;  %v8406_v59 = vadd.f32 %v8166_v10, %v3028_v19  ;;  %v8412_v8 = vadd.f32 %v8166_v10, %v3007_v52 }
 0x287   : > { %v6571_v16 = vpop.eup %6570  ;;  %v3922_v39 = vmul.f32 %v6569_v14, %v8255_v63  ;;  %v3483_v53 = vmul.f32 1.442695, %v3269_v13  ;;  %v2846_v57 = vadd.f32 %v8367_v50, %v8788_v60  ;;  %v3293_v0 = vsub.f32 0.0, %v8403_v7  ;;  %v2227_v32 = vpop.f32.mrf.mxu0 }
 0x288   : > { %v6573_v9 = vpop.eup %6572  ;;  %v5470_v27 = vpack.c.bf16 %v3904_v17, %v3903_v20  ;;  %v3668_v36 = vadd.f32 1.0, %v6571_v16  ;;  %v3291_v48 = vsub.f32 0.0, %v8406_v59  ;;  %v3270_v18 = vsub.f32 0.0, %v8412_v8  ;;  %v8789_v17 = vld [vmem:[#allocation18_spill] sm:$0xff]  ;;  %v5838_v16 = vpop.f32.mrf.mxu1 }
 0x289   : > { %v6575_v25 = vpop.eup %6574  ;;  %v5515_v63 = vpack.c.bf16 %v3922_v39, %v3921_v49  ;;  %v3651_v44 = vadd.f32 1.0, %v6573_v9  ;;  %6596 = vpow2.f32 %v3483_v53  ;;  %v3531_v20 = vmul.f32 1.442695, %v3293_v0  ;;  %v8421_v22 = vpop.f32.mrf.mxu0 }
 0x28a   : > { %v6577_v12 = vpop.eup %6576  ;;  %5626 = vst [vmem:[%s7546_s6 + $0x140] sm:$0xff] %v5470_v27   ;;  %v3920_v50 = vmul.f32 %v6575_v25, %v8266_v62  ;;  %6598 = vrcp.f32 %v3668_v36  ;;  %v3527_v61 = vmul.f32 1.442695, %v3291_v48  ;;  %v3485_v42 = vmul.f32 1.442695, %v3270_v18  ;;  %v8790_v36 = vld [vmem:[#allocation23_spill] sm:$0xff] }
 0x28b   : > { %v6579_v19 = vpop.eup %6578  ;;  %5635 = vst [vmem:[%s7546_s6 + $0x188] sm:$0xff] %v5515_v63   ;;  %6600 = vrcp.f32 %v3651_v44  ;;  %v3673_v3 = vadd.f32 1.0, %v6577_v12  ;;  %v3031_v49 = vmul.f32 %v8153_v28, %v2846_v57  ;;  %v2838_v62 = vadd.f32 %v8380_v1, %v8789_v17  ;;  %v2230_v39 = vpop.f32.mrf.mxu0 }
 0x28c   : > { %v6581_v13 = vpop.eup %6580  ;;  %v5510_v52 = vpack.c.bf16 %v3920_v50, %v3919_v58  ;;  %v3905_v14 = vmul.f32 %v6579_v19, %v8279_v29  ;;  %6602 = vpow2.f32 %v3531_v20  ;;  %v2755_v27 = vadd.f32 %v8174_v33, %v8338_v43  ;;  %v2853_v44 = vpop.f32.mrf.mxu1 }
 0x28d   : > { %v6583_v53 = vpop.eup %6582  ;;  %6604 = vrcp.f32 %v3673_v3  ;;  %v3671_v60 = vadd.f32 1.0, %v6581_v13  ;;  %v8429_v9 = vadd.f32 %v8166_v10, %v3031_v49  ;;  %v3029_v29 = vmul.f32 %v8153_v28, %v2838_v62  ;;  %v8437_v0 = vpop.f32.mrf.mxu0 }
 0x28e   : > { %v6585_v57 = vpop.eup %6584  ;;  %5634 = vst [vmem:[%s7546_s6 + $0x180] sm:$0xff] %v5510_v52   ;;  %v3925_v58 = vmul.f32 %v6583_v53, %v8287_v35  ;;  %6606 = vpow2.f32 %v3527_v61  ;;  %v2859_v1 = vadd.f32 %v5837_v6, %v8790_v36  ;;  %v3008_v33 = vmul.f32 %v8153_v28, %v2755_v27  ;;  %v8791_v61 = vld [vmem:[#allocation21_spill] sm:$0xff]  ;;  %v5841_v27 = vpop.f32.mrf.mxu1 }
 0x28f   : > { %v6587_v48 = vpop.eup %6586  ;;  %v8440_v32 = vmul.f32 %v6585_v57, %v8293_v15  ;;  %6608 = vrcp.f32 %v3671_v60  ;;  %v3294_v25 = vsub.f32 0.0, %v8429_v9  ;;  %v8446_v35 = vadd.f32 %v8166_v10, %v3029_v29  ;;  %v2235_v18 = vpop.f32.mrf.mxu0 }
 0x290   : > { %v6589_v43 = vpop.eup %6588  ;;  %v3906_v63 = vmul.f32 %v6587_v48, %v8299_v2  ;;  %6610 = vpow2.f32 %v3485_v42  ;;  %v3034_v6 = vmul.f32 %v8153_v28, %v2859_v1  ;;  %v8450_v20 = vadd.f32 %v8166_v10, %v3008_v33 }
 0x291   : > { %v6591_v12 = vpop.eup %6590  ;;  %v3652_v15 = vadd.f32 1.0, %v6589_v43  ;;  %v3533_v50 = vmul.f32 1.442695, %v3294_v25  ;;  %v2851_v19 = vadd.f32 %v2850_v4, %v8791_v61  ;;  %v3292_v42 = vsub.f32 0.0, %v8446_v35  ;;  %v8457_v52 = vpop.f32.mrf.mxu0 }
 0x292   : > { %v6593_v3 = vpop.eup %6592  ;;  %v5475_v49 = vpack.c.bf16 %v3906_v63, %v3905_v14  ;;  %v3674_v2 = vadd.f32 1.0, %v6591_v12  ;;  %v8455_v13 = vadd.f32 %v8166_v10, %v3034_v6  ;;  %v3271_v39 = vsub.f32 0.0, %v8450_v20 }
 0x293   : > { %v6595_v17 = vpop.eup %6594  ;;  %6612 = vrcp.f32 %v3652_v15  ;;  %v3672_v62 = vadd.f32 1.0, %v6593_v3  ;;  %v3032_v53 = vmul.f32 %v8153_v28, %v2851_v19  ;;  %v3529_v14 = vmul.f32 1.442695, %v3292_v42  ;;  %v2238_v57 = vpop.f32.mrf.mxu0 }
 0x294   : > { %5627 = vst [vmem:[%s7546_s6 + $0x148] sm:$0xff] %v5475_v49   ;;  %v3926_v4 = vmul.f32 %v6595_v17, %v8312_v47  ;;  %6614 = vrcp.f32 %v3674_v2  ;;  %v3297_v60 = vsub.f32 0.0, %v8455_v13  ;;  %v3487_v29 = vmul.f32 1.442695, %v3271_v39  ;;  %v8792_v47 = vld [vmem:[#allocation24_spill] sm:$0xff] }
 0x295   : > { %6616 = vrcp.f32 %v3672_v62  ;;  %v8465_v36 = vadd.f32 %v8166_v10, %v3032_v53  ;;  %v2758_v1 = vadd.f32 %v8187_v21, %v8357_v30  ;;  %v2862_v43 = vadd.f32 %v5838_v16, %v8792_v47  ;;  %v8793_v30 = vld [vmem:[#allocation22_spill] sm:$0xff] }
 0x296   : > { %v6597_v48 = vpop.eup %6596  ;;  %v5525_v25 = vpack.c.bf16 %v3926_v4, %v3925_v58  ;;  %6618 = vpow2.f32 %v3533_v50  ;;  %v3539_v33 = vmul.f32 1.442695, %v3297_v60  ;;  %v2854_v58 = vadd.f32 %v2853_v44, %v8793_v30  ;;  %v2866_v50 = vpop.f32.mrf.mxu1 }
 0x297   : > { %v6599_v63 = vpop.eup %6598  ;;  %v3653_v6 = vadd.f32 1.0, %v6597_v48  ;;  %6620 = vpow2.f32 %v3529_v14  ;;  %v3295_v18 = vsub.f32 0.0, %v8465_v36  ;;  %v3009_v12 = vmul.f32 %v8153_v28, %v2758_v1  ;;  %v8794_v48 = vld [vmem:[#allocation27_spill] sm:$0xff] }
 0x298   : > { %v6601_v15 = vpop.eup %6600  ;;  %5637 = vst [vmem:[%s7546_s6 + $0x198] sm:$0xff] %v5525_v25   ;;  %v3924_v61 = vmul.f32 %v6599_v63, %v8320_v11  ;;  %6622 = vpow2.f32 %v3487_v29  ;;  %v3035_v21 = vmul.f32 %v8153_v28, %v2862_v43  ;;  %v3033_v39 = vmul.f32 %v8153_v28, %v2854_v58  ;;  %v5842_v60 = vpop.f32.mrf.mxu1 }
 0x299   : > { %v6603_v19 = vpop.eup %6602  ;;  %6624 = vrcp.f32 %v3653_v6  ;;  %v3535_v16 = vmul.f32 1.442695, %v3295_v18  ;;  %v8477_v3 = vadd.f32 %v8166_v10, %v3009_v12  ;;  %v3907_v62 = vmul.f32 %v6601_v15, %v8323_v51 }
 0x29a   : > { %v6605_v49 = vpop.eup %6604  ;;  %v5520_v2 = vpack.c.bf16 %v3924_v61, %v8440_v32  ;;  %v3677_v42 = vadd.f32 1.0, %v6603_v19  ;;  %6626 = vpow2.f32 %v3539_v33  ;;  %v8481_v11 = vadd.f32 %v8166_v10, %v3035_v21  ;;  %v2869_v61 = vpop.f32.mrf.mxu1 }
 0x29b   : > { %v6607_v17 = vpop.eup %6606  ;;  %6628 = vpow2.f32 %v3535_v16  ;;  %v3272_v44 = vsub.f32 0.0, %v8477_v3  ;;  %v3929_v4 = vmul.f32 %v6605_v49, %v8341_v40  ;;  %v2763_v14 = vadd.f32 %v8157_v31, %v8372_v45  ;;  %v8795_v45 = vld [vmem:[#allocation25_spill] sm:$0xff] }
 0x29c   : > { %v6609_v53 = vpop.eup %6608  ;;  %5636 = vst [vmem:[%s7546_s6 + $0x190] sm:$0xff] %v5520_v2   ;;  %6630 = vrcp.f32 %v3677_v42  ;;  %v3298_v32 = vsub.f32 0.0, %v8481_v11  ;;  %v3675_v29 = vadd.f32 1.0, %v6607_v17  ;;  %v8492_v51 = vadd.f32 %v8166_v10, %v3033_v39  ;;  %v8524_v39 = vld [vmem:[%s8728_s3] ss:$0 sm:$0xff] }
 0x29d   : > { %v6611_v57 = vpop.eup %6610  ;;  %v3489_v1 = vmul.f32 1.442695, %v3272_v44  ;;  %v2875_v25 = vadd.f32 %v5841_v27, %v8794_v48  ;;  %v3927_v33 = vmul.f32 %v6609_v53, %v8353_v38  ;;  %v3010_v40 = vmul.f32 %v8153_v28, %v2763_v14  ;;  %v8796_v38 = vld [vmem:[#allocation28_spill] sm:$0xff] }
 0x29e   : > { %v3654_v47 = vadd.f32 1.0, %v6611_v57  ;;  %v3541_v43 = vmul.f32 1.442695, %v3298_v32  ;;  %v3296_v63 = vsub.f32 0.0, %v8492_v51  ;;  %v2867_v6 = vadd.f32 %v2866_v50, %v8795_v45 }
 0x29f   : > { %6632 = vpow2.f32 %v3489_v1  ;;  %v3038_v31 = vmul.f32 %v8153_v28, %v2875_v25  ;;  %v8501_v12 = vadd.f32 %v8166_v10, %v3010_v40  ;;  %v2766_v27 = vadd.f32 %v8178_v34, %v8390_v56  ;;  %v8515_v34 = vld [vmem:[%s8727_s2] ss:$0 sm:$0xff] }
 0x2a0   : > { %v6613_v18 = vpop.eup %6612  ;;  %6634 = vrcp.f32 %v3654_v47  ;;  %v2878_v15 = vadd.f32 %v5842_v60, %v8796_v38  ;;  %v3537_v58 = vmul.f32 1.442695, %v3296_v63  ;;  %v3036_v56 = vmul.f32 %v8515_v34, %v2867_v6 }
 0x2a1   : > { %v6615_v21 = vpop.eup %6614  ;;  %v3908_v30 = vmul.f32 %v6613_v18, %v8362_v41  ;;  %6636 = vpow2.f32 %v3541_v43  ;;  %v8508_v28 = vadd.f32 %v8166_v10, %v3038_v31  ;;  %v3273_v16 = vsub.f32 0.0, %v8501_v12 }
 0x2a2   : > { %v6617_v50 = vpop.eup %6616  ;;  %v3930_v19 = vmul.f32 %v6615_v21, %v8365_v46  ;;  %v3011_v41 = vmul.f32 %v8515_v34, %v2766_v27  ;;  %6638 = vpow2.f32 %v3537_v58  ;;  %v8527_v53 = vadd.f32 %v8524_v39, %v3036_v56 }
 0x2a3   : > { %v6619_v49 = vpop.eup %6618  ;;  %v5480_v2 = vpack.c.bf16 %v3908_v30, %v3907_v62  ;;  %v3928_v10 = vmul.f32 %v6617_v50, %v8376_v23  ;;  %v3301_v46 = vsub.f32 0.0, %v8508_v28  ;;  %6640 = vrcp.f32 %v3675_v29  ;;  %v5845_v62 = vpop.f32.mrf.mxu1  ;;  %v8798_v50 = vld [vmem:[#allocation31_spill] sm:$0xff] }
 0x2a4   : > { %v6621_v42 = vpop.eup %6620  ;;  %v5535_v17 = vpack.c.bf16 %v3930_v19, %v3929_v4  ;;  %v3678_v44 = vadd.f32 1.0, %v6619_v49  ;;  %v3491_v60 = vmul.f32 1.442695, %v3273_v16  ;;  %v8531_v57 = vadd.f32 %v8524_v39, %v3011_v41  ;;  %v8799_v16 = vld [vmem:[#allocation29_spill] sm:$0xff] }
 0x2a5   : > { %v6623_v32 = vpop.eup %6622  ;;  %5628 = vst [vmem:[%s7546_s6 + $0x150] sm:$0xff] %v5480_v2   ;;  %v5530_v23 = vpack.c.bf16 %v3928_v10, %v3927_v33  ;;  %v3676_v14 = vadd.f32 1.0, %v6621_v42  ;;  %v3299_v1 = vsub.f32 0.0, %v8527_v53  ;;  %v3039_v48 = vmul.f32 %v8515_v34, %v2878_v15  ;;  %v8797_v33 = vld [vmem:[#allocation26_spill] sm:$0xff]  ;;  %v2882_v18 = vpop.f32.mrf.mxu1 }
 0x2a6   : > { %v6625_v4 = vpop.eup %6624  ;;  %5639 = vst [vmem:[%s7546_s6 + $0x1a8] sm:$0xff] %v5535_v17   ;;  %6642 = vrcp.f32 %v3678_v44  ;;  %v3655_v29 = vadd.f32 1.0, %v6623_v32  ;;  %v3547_v47 = vmul.f32 1.442695, %v3301_v46  ;;  %v3274_v43 = vsub.f32 0.0, %v8531_v57 }
 0x2a7   : > { %v6627_v25 = vpop.eup %6626  ;;  %5638 = vst [vmem:[%s7546_s6 + $0x1a0] sm:$0xff] %v5530_v23   ;;  %6644 = vrcp.f32 %v3676_v14  ;;  %v2870_v40 = vadd.f32 %v2869_v61, %v8797_v33  ;;  %v3909_v31 = vmul.f32 %v6625_v4, %v8394_v5  ;;  %v8541_v6 = vadd.f32 %v8524_v39, %v3039_v48  ;;  %v5846_v46 = vpop.f32.mrf.mxu1 }
 0x2a8   : > { %v6629_v63 = vpop.eup %6628  ;;  %6646 = vrcp.f32 %v3655_v29  ;;  %v3681_v45 = vadd.f32 1.0, %v6627_v25  ;;  %v3543_v15 = vmul.f32 1.442695, %v3299_v1  ;;  %v3493_v30 = vmul.f32 1.442695, %v3274_v43 }
 0x2a9   : > { %v6631_v27 = vpop.eup %6630  ;;  %v3679_v38 = vadd.f32 1.0, %v6629_v63  ;;  %6648 = vpow2.f32 %v3491_v60  ;;  %v3037_v21 = vmul.f32 %v8515_v34, %v2870_v40  ;;  %v3302_v58 = vsub.f32 0.0, %v8541_v6  ;;  %v2885_v48 = vpop.f32.mrf.mxu1 }
 0x2aa   : > { %6650 = vrcp.f32 %v3681_v45  ;;  %v2771_v61 = vadd.f32 %v8199_v26, %v8408_v54  ;;  %v2891_v19 = vadd.f32 %v5845_v62, %v8798_v50  ;;  %v2883_v56 = vadd.f32 %v2882_v18, %v8799_v16 }
 0x2ab   : > { %6652 = vrcp.f32 %v3679_v38  ;;  %v8548_v5 = vadd.f32 %v8524_v39, %v3037_v21  ;;  %v3933_v49 = vmul.f32 %v6631_v27, %v8403_v7  ;;  %v3549_v2 = vmul.f32 1.442695, %v3302_v58 }
 0x2ac   : > { %v6633_v41 = vpop.eup %6632  ;;  %6654 = vpow2.f32 %v3547_v47  ;;  %v3012_v10 = vmul.f32 %v8515_v34, %v2771_v61  ;;  %v3042_v54 = vmul.f32 %v8515_v34, %v2891_v19  ;;  %v3040_v7 = vmul.f32 %v8515_v34, %v2883_v56 }
 0x2ad   : > { %v6635_v42 = vpop.eup %6634  ;;  %v3656_v17 = vadd.f32 1.0, %v6633_v41  ;;  %6656 = vpow2.f32 %v3543_v15  ;;  %v3300_v26 = vsub.f32 0.0, %v8548_v5  ;;  %v2774_v33 = vadd.f32 %v8212_v37, %v8421_v22  ;;  %v8801_v15 = vld [vmem:[#allocation30_spill] sm:$0xff]  ;;  %v5849_v22 = vpop.f32.mrf.mxu1 }
 0x2ae   : > { %v6637_v44 = vpop.eup %6636  ;;  %v3910_v62 = vmul.f32 %v6635_v42, %v8412_v8  ;;  %6658 = vpow2.f32 %v3493_v30  ;;  %v8558_v32 = vadd.f32 %v8524_v39, %v3012_v10  ;;  %v8562_v60 = vadd.f32 %v8524_v39, %v3042_v54 }
 0x2af   : > { %6660 = vrcp.f32 %v3656_v17  ;;  %v3682_v23 = vadd.f32 1.0, %v6637_v44  ;;  %v3545_v14 = vmul.f32 1.442695, %v3300_v26  ;;  %v6639_v4 = vpop.eup %6638  ;;  %v8566_v8 = vadd.f32 %v8524_v39, %v3040_v7  ;;  %v8802_v44 = vld [vmem:[#allocation35_spill] sm:$0xff]  ;;  %v2898_v7 = vpop.f32.mrf.mxu1 }
 0x2b0   : > { %v5485_v29 = vpack.c.bf16 %v3910_v62, %v3909_v31  ;;  %6662 = vpow2.f32 %v3549_v2  ;;  %v3275_v1 = vsub.f32 0.0, %v8558_v32  ;;  %v6641_v25 = vpop.eup %6640  ;;  %v3680_v47 = vadd.f32 1.0, %v6639_v4  ;;  %v8800_v31 = vld [vmem:[#allocation32_spill] sm:$0xff] }
 0x2b1   : > { %6664 = vrcp.f32 %v3682_v23  ;;  %v3305_v43 = vsub.f32 0.0, %v8562_v60  ;;  %v3303_v63 = vsub.f32 0.0, %v8566_v8  ;;  %v2894_v45 = vadd.f32 %v5846_v46, %v8800_v31 }
 0x2b2   : > { %5629 = vst [vmem:[%s7546_s6 + $0x158] sm:$0xff] %v5485_v29   ;;  %6666 = vpow2.f32 %v3545_v14  ;;  %v3495_v40 = vmul.f32 1.442695, %v3275_v1  ;;  %v3013_v38 = vmul.f32 %v8515_v34, %v2774_v33  ;;  %v2886_v21 = vadd.f32 %v2885_v48, %v8801_v15 }
 0x2b3   : > { %v6643_v18 = vpop.eup %6642  ;;  %6668 = vrcp.f32 %v3680_v47  ;;  %v3555_v27 = vmul.f32 1.442695, %v3305_v43  ;;  %v3551_v61 = vmul.f32 1.442695, %v3303_v63  ;;  %v3043_v37 = vmul.f32 %v8515_v34, %v2894_v45 }
 0x2b4   : > { %v6645_v30 = vpop.eup %6644  ;;  %v3934_v58 = vmul.f32 %v6643_v18, %v8429_v9  ;;  %6670 = vpow2.f32 %v3495_v40  ;;  %v3931_v19 = vmul.f32 %v6641_v25, %v8406_v59  ;;  %v8581_v56 = vadd.f32 %v8524_v39, %v3013_v38  ;;  %v8803_v40 = vld [vmem:[#allocation33_spill] sm:$0xff] }
 0x2b5   : > { %v6647_v50 = vpop.eup %6646  ;;  %v3932_v16 = vmul.f32 %v6645_v30, %v8446_v35  ;;  %v3041_v41 = vmul.f32 %v8515_v34, %v2886_v21  ;;  %6672 = vpow2.f32 %v3555_v27  ;;  %v8586_v46 = vadd.f32 %v8524_v39, %v3043_v37 }
 0x2b6   : > { %v6649_v2 = vpop.eup %6648  ;;  %v5545_v10 = vpack.c.bf16 %v3934_v58, %v3933_v49  ;;  %v3911_v9 = vmul.f32 %v6647_v50, %v8450_v20  ;;  %v3276_v59 = vsub.f32 0.0, %v8581_v56  ;;  %6674 = vpow2.f32 %v3551_v61 }
 0x2b7   : > { %v6651_v42 = vpop.eup %6650  ;;  %v5540_v17 = vpack.c.bf16 %v3932_v16, %v3931_v19  ;;  %v3657_v26 = vadd.f32 1.0, %v6649_v2  ;;  %v8590_v35 = vadd.f32 %v8524_v39, %v3041_v41  ;;  %v3306_v49 = vsub.f32 0.0, %v8586_v46 }
 0x2b8   : > { %v6653_v54 = vpop.eup %6652  ;;  %5641 = vst [vmem:[%s7546_s6 + $0x1b8] sm:$0xff] %v5545_v10   ;;  %v2779_v20 = vadd.f32 %v8192_v55, %v8437_v0  ;;  %v2907_v62 = vadd.f32 %v5849_v22, %v8802_v44  ;;  %v3937_v14 = vmul.f32 %v6651_v42, %v8455_v13  ;;  %v3497_v4 = vmul.f32 1.442695, %v3276_v59  ;;  %v5850_v22 = vpop.f32.mrf.mxu1 }
 0x2b9   : > { %v6655_v23 = vpop.eup %6654  ;;  %5640 = vst [vmem:[%s7546_s6 + $0x1b0] sm:$0xff] %v5540_v17   ;;  %6676 = vrcp.f32 %v3657_v26  ;;  %v3304_v29 = vsub.f32 0.0, %v8590_v35  ;;  %v3557_v25 = vmul.f32 1.442695, %v3306_v49  ;;  %v2899_v63 = vadd.f32 %v2898_v7, %v8803_v40  ;;  %v8804_v26 = vld [vmem:[#allocation36_spill] sm:$0xff] }
 0x2ba   : > { %v6657_v1 = vpop.eup %6656  ;;  %v3685_v48 = vadd.f32 1.0, %v6655_v23  ;;  %v3014_v47 = vmul.f32 %v8515_v34, %v2779_v20  ;;  %v3046_v43 = vmul.f32 %v8515_v34, %v2907_v62  ;;  %6678 = vpow2.f32 %v3497_v4  ;;  %v2901_v49 = vpop.f32.mrf.mxu1 }
 0x2bb   : > { %v6659_v33 = vpop.eup %6658  ;;  %v3683_v55 = vadd.f32 1.0, %v6657_v1  ;;  %v3553_v0 = vmul.f32 1.442695, %v3304_v29  ;;  %v3044_v15 = vmul.f32 %v8515_v34, %v2899_v63  ;;  %v2782_v21 = vadd.f32 %v8203_v24, %v8457_v52 }
 0x2bc   : > { %v6661_v31 = vpop.eup %6660  ;;  %6680 = vrcp.f32 %v3685_v48  ;;  %v3658_v13 = vadd.f32 1.0, %v6659_v33  ;;  %v8604_v45 = vadd.f32 %v8524_v39, %v3014_v47  ;;  %v8607_v18 = vadd.f32 %v8524_v39, %v3046_v43 }
 0x2bd   : > { %v6663_v27 = vpop.eup %6662  ;;  %v3912_v38 = vmul.f32 %v6661_v31, %v8477_v3  ;;  %6682 = vrcp.f32 %v3683_v55  ;;  %v8617_v3 = vadd.f32 %v8524_v39, %v3044_v15  ;;  %v3935_v24 = vmul.f32 %v6653_v54, %v8465_v36 }
 0x2be   : > { %v6665_v30 = vpop.eup %6664  ;;  %6684 = vrcp.f32 %v3658_v13  ;;  %v3686_v58 = vadd.f32 1.0, %v6663_v27  ;;  %v3277_v61 = vsub.f32 0.0, %v8604_v45  ;;  %v3309_v37 = vsub.f32 0.0, %v8607_v18 }
 0x2bf   : > { %v6667_v50 = vpop.eup %6666  ;;  %v5490_v19 = vpack.c.bf16 %v3912_v38, %v3911_v9  ;;  %v3938_v16 = vmul.f32 %v6665_v30, %v8481_v11  ;;  %6686 = vpow2.f32 %v3557_v25  ;;  %v3307_v11 = vsub.f32 0.0, %v8617_v3 }
 0x2c0   : > { %v6669_v41 = vpop.eup %6668  ;;  %6688 = vrcp.f32 %v3686_v58  ;;  %v3684_v52 = vadd.f32 1.0, %v6667_v50  ;;  %v3499_v2 = vmul.f32 1.442695, %v3277_v61  ;;  %v3015_v9 = vmul.f32 %v8515_v34, %v2782_v21 }
 0x2c1   : > { %v6671_v10 = vpop.eup %6670  ;;  %5630 = vst [vmem:[%s7546_s6 + $0x160] sm:$0xff] %v5490_v19   ;;  %v5555_v42 = vpack.c.bf16 %v3938_v16, %v3937_v14  ;;  %v3936_v17 = vmul.f32 %v6669_v41, %v8492_v51  ;;  %6690 = vpow2.f32 %v3553_v0  ;;  %v2910_v59 = vadd.f32 %v5850_v22, %v8804_v26  ;;  %v8805_v14 = vld [vmem:[#allocation34_spill] sm:$0xff] }
 0x2c2   : > { %6692 = vrcp.f32 %v3684_v52  ;;  %v6673_v20 = vpop.eup %6672  ;;  %v3563_v54 = vmul.f32 1.442695, %v3309_v37  ;;  %v3659_v44 = vadd.f32 1.0, %v6671_v10  ;;  %v8627_v62 = vadd.f32 %v8524_v39, %v3015_v9 }
 0x2c3   : > { %5643 = vst [vmem:[%s7546_s6 + $0x1c8] sm:$0xff] %v5555_v42   ;;  %v5550_v36 = vpack.c.bf16 %v3936_v17, %v3935_v24  ;;  %6694 = vpow2.f32 %v3499_v2  ;;  %v3047_v51 = vmul.f32 %v8515_v34, %v2910_v59  ;;  %v6675_v7 = vpop.eup %6674  ;;  %v3559_v23 = vmul.f32 1.442695, %v3307_v11 }
 0x2c4   : > { %v2902_v4 = vadd.f32 %v2901_v49, %v8805_v14  ;;  %v3278_v1 = vsub.f32 0.0, %v8627_v62  ;;  %6696 = vpow2.f32 %v3563_v54  ;;  %v3689_v0 = vadd.f32 1.0, %v6673_v20 }
 0x2c5   : > { %5642 = vst [vmem:[%s7546_s6 + $0x1c0] sm:$0xff] %v5550_v36   ;;  %v8634_v48 = vadd.f32 %v8524_v39, %v3047_v51  ;;  %6698 = vrcp.f32 %v3659_v44  ;;  %v3687_v13 = vadd.f32 1.0, %v6675_v7 }
 0x2c6   : > { %v6677_v29 = vpop.eup %6676  ;;  %v3045_v25 = vmul.f32 %v8515_v34, %v2902_v4  ;;  %v3501_v43 = vmul.f32 1.442695, %v3278_v1  ;;  %6700 = vpow2.f32 %v3559_v23 }
 0x2c7   : > { %v6679_v47 = vpop.eup %6678  ;;  %v3310_v33 = vsub.f32 0.0, %v8634_v48  ;;  %v3913_v21 = vmul.f32 %v6677_v29, %v8501_v12 }
 0x2c8   : > { %v3660_v40 = vadd.f32 1.0, %v6679_v47  ;;  %v8639_v63 = vadd.f32 %v8524_v39, %v3045_v25  ;;  %6702 = vpow2.f32 %v3501_v43 }
 0x2c9   : > { %v6681_v55 = vpop.eup %6680  ;;  %v3565_v27 = vmul.f32 1.442695, %v3310_v33 }
 0x2ca   : > { %v6683_v31 = vpop.eup %6682  ;;  %6704 = vrcp.f32 %v3660_v40  ;;  %v3308_v34 = vsub.f32 0.0, %v8639_v63  ;;  %v3941_v22 = vmul.f32 %v6681_v55, %v8508_v28 }
 0x2cb   : > { %v6685_v38 = vpop.eup %6684  ;;  %6706 = vpow2.f32 %v3565_v27  ;;  %v3939_v41 = vmul.f32 %v6683_v31, %v8527_v53 }
 0x2cc   : > { %v6687_v15 = vpop.eup %6686  ;;  %v3914_v30 = vmul.f32 %v6685_v38, %v8531_v57  ;;  %6708 = vrcp.f32 %v3689_v0  ;;  %v3561_v39 = vmul.f32 1.442695, %v3308_v34 }
 0x2cd   : > { %v6689_v58 = vpop.eup %6688  ;;  %v3690_v61 = vadd.f32 1.0, %v6687_v15  ;;  %6710 = vrcp.f32 %v3687_v13 }
 0x2ce   : > { %v6691_v37 = vpop.eup %6690  ;;  %v5495_v50 = vpack.c.bf16 %v3914_v30, %v3913_v21  ;;  %v3942_v19 = vmul.f32 %v6689_v58, %v8541_v6 }
 0x2cf   : > { %v6693_v16 = vpop.eup %6692  ;;  %6712 = vrcp.f32 %v3690_v61  ;;  %v3688_v12 = vadd.f32 1.0, %v6691_v37 }
 0x2d0   : > { %5631 = vst [vmem:[%s7546_s6 + $0x168] sm:$0xff] %v5495_v50   ;;  %v5565_v57 = vpack.c.bf16 %v3942_v19, %v3941_v22  ;;  %v3940_v24 = vmul.f32 %v6693_v16, %v8548_v5  ;;  %6714 = vpow2.f32 %v3561_v39  ;;  %v6695_v52 = vpop.eup %6694 }
 0x2d1   : > { %6716 = vrcp.f32 %v3688_v12  ;;  %v6697_v28 = vpop.eup %6696  ;;  %v3661_v10 = vadd.f32 1.0, %v6695_v52 }
 0x2d2   : > { %5645 = vst [vmem:[%s7546_s6 + $0x1d8] sm:$0xff] %v5565_v57   ;;  %v5560_v2 = vpack.c.bf16 %v3940_v24, %v3939_v41  ;;  %v6699_v42 = vpop.eup %6698  ;;  %v3693_v6 = vadd.f32 1.0, %v6697_v28 }
 0x2d3   : > { %v6701_v17 = vpop.eup %6700  ;;  %6718 = vrcp.f32 %v3661_v10  ;;  %v3915_v59 = vmul.f32 %v6699_v42, %v8558_v32 }
 0x2d4   : > { %5644 = vst [vmem:[%s7546_s6 + $0x1d0] sm:$0xff] %v5560_v2   ;;  %6720 = vrcp.f32 %v3693_v6  ;;  %v3691_v20 = vadd.f32 1.0, %v6701_v17 }
 0x2d5   : > { %v6703_v11 = vpop.eup %6702 }
 0x2d6   : > { %v3662_v53 = vadd.f32 1.0, %v6703_v11 }
 0x2d7   : > { %v6705_v9 = vpop.eup %6704 }
 0x2d8   : > { %v6707_v26 = vpop.eup %6706  ;;  %v3916_v5 = vmul.f32 %v6705_v9, %v8581_v56  ;;  %6722 = vrcp.f32 %v3662_v53 }
 0x2d9   : > { %v6709_v49 = vpop.eup %6708  ;;  %v3694_v36 = vadd.f32 1.0, %v6707_v26 }
 0x2da   : > { %v6711_v54 = vpop.eup %6710  ;;  %v5500_v44 = vpack.c.bf16 %v3916_v5, %v3915_v59  ;;  %v3945_v23 = vmul.f32 %v6709_v49, %v8562_v60 }
 0x2db   : > { %6724 = vrcp.f32 %v3694_v36  ;;  %v3943_v4 = vmul.f32 %v6711_v54, %v8566_v8 }
 0x2dc   : > { %v6713_v51 = vpop.eup %6712  ;;  %5632 = vst [vmem:[%s7546_s6 + $0x170] sm:$0xff] %v5500_v44   ;;  %6726 = vrcp.f32 %v3691_v20 }
 0x2dd   : > { %v6715_v7 = vpop.eup %6714  ;;  %v3946_v14 = vmul.f32 %v6713_v51, %v8586_v46 }
 0x2de   : > { %v6717_v32 = vpop.eup %6716  ;;  %v3692_v56 = vadd.f32 1.0, %v6715_v7 }
 0x2df   : > { %v5575_v29 = vpack.c.bf16 %v3946_v14, %v3945_v23  ;;  %v3944_v1 = vmul.f32 %v6717_v32, %v8590_v35 }
 0x2e0   : > { %6728 = vrcp.f32 %v3692_v56  ;;  %v6719_v47 = vpop.eup %6718 }
 0x2e1   : > { %5647 = vst [vmem:[%s7546_s6 + $0x1e8] sm:$0xff] %v5575_v29   ;;  %v5570_v25 = vpack.c.bf16 %v3944_v1, %v3943_v4  ;;  %v6721_v60 = vpop.eup %6720  ;;  %v3917_v46 = vmul.f32 %v6719_v47, %v8604_v45 }
 0x2e2   : > { %v3949_v8 = vmul.f32 %v6721_v60, %v8607_v18 }
 0x2e3   : > { %5646 = vst [vmem:[%s7546_s6 + $0x1e0] sm:$0xff] %v5570_v25  }
 0x2e5   : > { %v6723_v43 = vpop.eup %6722 }
 0x2e6   : > { %v3918_v33 = vmul.f32 %v6723_v43, %v8627_v62 }
 0x2e8   : > { %v6725_v55 = vpop.eup %6724  ;;  %v5505_v35 = vpack.c.bf16 %v3918_v33, %v3917_v46 }
 0x2e9   : > { %v3950_v0 = vmul.f32 %v6725_v55, %v8634_v48  ;;  %v6727_v40 = vpop.eup %6726 }
 0x2ea   : > { %5633 = vst [vmem:[%s7546_s6 + $0x178] sm:$0xff] %v5505_v35   ;;  %v3947_v27 = vmul.f32 %v6727_v40, %v8617_v3 }
 0x2eb   : > { %v5585_v31 = vpack.c.bf16 %v3950_v0, %v3949_v8 }
 0x2ed   : > { %v6729_v13 = vpop.eup %6728  ;;  %5649 = vst [vmem:[%s7546_s6 + $0x1f8] sm:$0xff] %v5585_v31  }
 0x2ee   : > { %v3948_v45 = vmul.f32 %v6729_v13, %v8639_v63 }
 0x2f0   : > { %v5580_v18 = vpack.c.bf16 %v3948_v45, %v3947_v27 }
 0x2f2   : > { %5648 = vst [vmem:[%s7546_s6 + $0x1f0] sm:$0xff] %v5580_v18  }
 0x2f3   : > { %6749 = shalt.err (!%p6746_p5)
}
 0x2f4   : > { %s6750_s30 = scalar_lea.hbm %s8673_s8, 8192  ;;  %s6754_s14 = scalar_lea.hbm %s8729_s4, 16384 }
 0x2f5   : > { %p6751_p6 = scmp.ne.s32.totalorder %s8673_s8, %s6750_s30  ;;  %p6755_p10 = scmp.lt.s32.totalorder %s8673_s8, %s8729_s4 }
 0x2f6   : > { %p6756_p11 = scmp.lt.s32.totalorder %s6754_s14, %s6750_s30 }
 0x2f7   : > { %p6752_p7 = pnand %p6751_p6, %p6883_p4 }
 0x2f8   : > { %p6757_p12 = por %p6756_p11, %p6755_p10 }
 0x2f9   : > { %p6753_p9 = pneg %p6752_p7 }
 0x2fb   : > { %p6758_p13 = pnand %p6757_p12, %p6753_p9 }
 0x2fd   : > { %6761 = shalt.err (!%p6758_p13)
}
 0x2fe   : > { %s6816_s26 = smov 64   ;;  %s6817_s29 = smov 4  }
 0x2ff   : > { %5885 = dma.vmem_to_hbm [thread:$0]  (%p6883_p4), %s8675_s5, 8192, %s8673_s8, %s8680_s18, %s6816_s26, %s6816_s26, %s6817_s29  }
 0x300 PF: > { %p5891_p0 = scmp.ge.s32.totalorder %s6812_s20, 2  ;;  %s4621_s24 = sand.u32 1, %s6792_s15  }
 0x301   : > { %s4622_s7 = scalar_lea.sflag [#allocation3], %s4621_s24 }
 0x302   : > { %p5888_p1 = pnand %p5891_p0, %p6890_p8 }
 0x304   : > { %p5889_p2 = pneg %p5888_p1 }
 0x306   : > { %6787 = dma.done.wait (%p5889_p2), %s4622_s7, 8192  }
 0x307   : > { %6789 = vsyncadd (%p5889_p2), %s4622_s7, 4294959104  ;;  %s17_s20 = sadd.s32 1, %s6812_s20   ;;  %s8806_s15 = smov %s6796_s16 }
 0x308   : > { %p14_p3 = scmp.ge.s32.totalorder %s17_s20, 4   ;;  %s8807_s16 = smov %s6800_s17 }
 0x309   : > { %s8808_s17 = smov %s6896_s28  ;;  %s8809_s18 = smov %s6808_s19 }
 0x30a   : > { %s8810_s19 = smov %s8812_s23  ;;  %16 = sbr.rel (!%p14_p3) target bundleno = 4 (0x4), region = 80 }
 0x30f   :  { %4627 = vsyncpa [#allocation3], 1 }
 0x310   :  { %4629 = vsyncpa [#allocation3 + $0x1], 1 }

</bundles_post_ra>
